<compile_context>
chip_gen: v5e
topology: v5e:2x2
jax: 0.10.0
libtpu: 0.0.40
codegen_flags: <defaults>
</compile_context>

<pallas_src>
import math
import jax
import jax.numpy as jnp
from jax import lax
from jax.experimental import pallas as pl
from jax.experimental.pallas import tpu as pltpu

# ---------------------------------------------------------------------------
# Model hyper-parameters (small, consistent with the module's forward)
# ---------------------------------------------------------------------------
NUM_EMB = 16       # vocabulary size
HIDDEN = 32        # d_model
NUM_HEADS = 4
HEAD_DIM = HIDDEN // NUM_HEADS
FFN = 4 * HIDDEN   # 128 -> exactly one lane group, lane-dense
NUM_LAYERS = 3
BATCH = 2
TGT_LEN = 8        # decoder sequence length L
MEM_LEN = 8        # encoder sequence length S
LN_EPS = 1e-5
SCALE = 1.0 / math.sqrt(HEAD_DIM)

# Per-layer parameters, stacked on a leading (NUM_LAYERS, ...) axis.
STACKED_NAMES = (
    "sa_wq", "sa_wk", "sa_wv", "sa_wo", "sa_bq", "sa_bk", "sa_bv", "sa_bo",
    "ln1_g", "ln1_b",
    "ca_wq", "ca_wk", "ca_wv", "ca_wo", "ca_bq", "ca_bk", "ca_bv", "ca_bo",
    "ln2_g", "ln2_b",
    "ff_w1", "ff_b1", "ff_w2", "ff_b2",
    "ln3_g", "ln3_b",
)
ALL_PARAM_NAMES = STACKED_NAMES + ("fc_w", "fc_b")


# ---------------------------------------------------------------------------
# Small math helpers (usable both inside the kernel and in the JAX reference)
# ---------------------------------------------------------------------------
def _layernorm(v, g, b):
    mu = jnp.mean(v, axis=-1, keepdims=True)
    var = jnp.mean((v - mu) * (v - mu), axis=-1, keepdims=True)
    return (v - mu) * lax.rsqrt(var + LN_EPS) * g + b


def _dot(a, b):
    return jnp.dot(a, b, preferred_element_type=jnp.float32)


def _dot_t(a, b):
    # a: (m, k), b: (n, k) -> (m, n) without materializing an explicit transpose
    return lax.dot_general(a, b, (((1,), (1,)), ((), ())),
                           preferred_element_type=jnp.float32)


# ---------------------------------------------------------------------------
# Fused Pallas kernel: embedding + 3 decoder layers + final FC, one grid step
# per batch element.
# ---------------------------------------------------------------------------
def fused_decoder_kernel(ids_ref, emb_ref, pos_ref, mask_ref, mem_ref, *refs):
    out_ref = refs[-1]
    p = dict(zip(ALL_PARAM_NAMES, refs[:-1]))

    mask = mask_ref[...]          # (L, L) additive causal mask
    mem = mem_ref[0]              # (S, H)

    # ---- embedding lookup as a one-hot matmul (table stays VMEM-resident) ----
    ids = ids_ref[0]              # (L, 1) int32
    iota = lax.broadcasted_iota(jnp.int32, (ids.shape[0], NUM_EMB), 1)
    onehot = (iota == ids).astype(jnp.float32)            # (L, V)
    x = _dot(onehot, emb_ref[...]) + pos_ref[...]          # (L, H)

    # ---- head-fused multi-head attention -------------------------------------
    def attention(q_in, kv_in, wq, wk, wv, wo, bq, bk, bv, bo, add_mask):
        q = _dot(q_in, wq) + bq        # (Lq, H)   single fused projection
        k = _dot(kv_in, wk) + bk       # (Lk, H)
        v = _dot(kv_in, wv) + bv       # (Lk, H)
        heads = []
        for h in range(NUM_HEADS):     # tiny per-head score/softmax only
            lo = h * HEAD_DIM
            hi = lo + HEAD_DIM
            s = _dot_t(q[:, lo:hi], k[:, lo:hi]) * SCALE   # (Lq, Lk)
            if add_mask is not None:
                s = s + add_mask
            s = s - jnp.max(s, axis=-1, keepdims=True)
            e = jnp.exp(s)
            pr = e * pl.reciprocal(jnp.sum(e, axis=-1, keepdims=True),
                                   approx=True)
            heads.append(_dot(pr, v[:, lo:hi]))            # (Lq, dH)
        o = jnp.concatenate(heads, axis=-1)                # (Lq, H)
        return _dot(o, wo) + bo                            # fused output proj

    # ---- all decoder layers, statically unrolled -----------------------------
    for l in range(NUM_LAYERS):
        sa = attention(x, x,
                       p["sa_wq"][l], p["sa_wk"][l], p["sa_wv"][l], p["sa_wo"][l],
                       p["sa_bq"][l], p["sa_bk"][l], p["sa_bv"][l], p["sa_bo"][l],
                       mask)
        x = _layernorm(x + sa, p["ln1_g"][l], p["ln1_b"][l])

        ca = attention(x, mem,
                       p["ca_wq"][l], p["ca_wk"][l], p["ca_wv"][l], p["ca_wo"][l],
                       p["ca_bq"][l], p["ca_bk"][l], p["ca_bv"][l], p["ca_bo"][l],
                       None)
        x = _layernorm(x + ca, p["ln2_g"][l], p["ln2_b"][l])

        h1 = jnp.maximum(_dot(x, p["ff_w1"][l]) + p["ff_b1"][l], 0.0)
        ff = _dot(h1, p["ff_w2"][l]) + p["ff_b2"][l]
        x = _layernorm(x + ff, p["ln3_g"][l], p["ln3_b"][l])

    # ---- final vocabulary projection ------------------------------------------
    out_ref[0] = (_dot(x, p["fc_w"][...]) + p["fc_b"][...]).astype(out_ref.dtype)


# ---------------------------------------------------------------------------
# pallas_call wrapper
# ---------------------------------------------------------------------------
def _full_spec(shape):
    nd = len(shape)
    return pl.BlockSpec(shape, lambda b, nd=nd: (0,) * nd)


def _decoder_forward(params, input_seq, encoder_output):
    B, L = input_seq.shape
    S = encoder_output.shape[1]

    pos = sinusoidal_pos_emb(L, HIDDEN)                    # (L, H) constant
    mask = causal_mask(L)                                  # (L, L) constant
    ids = input_seq.astype(jnp.int32).reshape(B, L, 1)

    stacked = [params[k] for k in ALL_PARAM_NAMES]

    in_specs = [
        pl.BlockSpec((1, L, 1), lambda b: (b, 0, 0)),      # token ids
        _full_spec(params["embedding"].shape),             # embedding table
        _full_spec(pos.shape),                             # positional emb
        _full_spec(mask.shape),                            # causal mask
        pl.BlockSpec((1, S, HIDDEN), lambda b: (b, 0, 0)), # encoder memory
    ] + [_full_spec(w.shape) for w in stacked]

    return pl.pallas_call(
        fused_decoder_kernel,
        out_shape=jax.ShapeDtypeStruct((B, L, NUM_EMB), jnp.float32),
        grid=(B,),
        in_specs=in_specs,
        out_specs=pl.BlockSpec((1, L, NUM_EMB), lambda b: (b, 0, 0)),
        compiler_params=pltpu.CompilerParams(
            dimension_semantics=("parallel",)),            # 2 TCs on v7x
    )(ids, params["embedding"], pos, mask, encoder_output, *stacked)


decoder_forward = jax.jit(_decoder_forward)


# ---------------------------------------------------------------------------
# Parameter init (deterministic), head-fused layout, stacked over layers
# ---------------------------------------------------------------------------
def _init_layer(key):
    ks = iter(jax.random.split(key, 24))

    def w(shape, scale=0.05):
        return scale * jax.random.normal(next(ks), shape, jnp.float32)

    p = {}
    for pre in ("sa", "ca"):
        p[f"{pre}_wq"] = w((HIDDEN, HIDDEN))
        p[f"{pre}_wk"] = w((HIDDEN, HIDDEN))
        p[f"{pre}_wv"] = w((HIDDEN, HIDDEN))
        p[f"{pre}_wo"] = w((HIDDEN, HIDDEN))
        p[f"{pre}_bq"] = w((1, HIDDEN), 0.01)
        p[f"{pre}_bk"] = w((1, HIDDEN), 0.01)
        p[f"{pre}_bv"] = w((1, HIDDEN), 0.01)
        p[f"{pre}_bo"] = w((1, HIDDEN), 0.01)
    for i in (1, 2, 3):
        p[f"ln{i}_g"] = jnp.ones((1, HIDDEN), jnp.float32)
        p[f"ln{i}_b"] = jnp.zeros((1, HIDDEN), jnp.float32)
    p["ff_w1"] = w((HIDDEN, FFN))
    p["ff_b1"] = w((1, FFN), 0.01)
    p["ff_w2"] = w((FFN, HIDDEN))
    p["ff_b2"] = w((1, HIDDEN), 0.01)
    return p


def init_params(key):
    k_emb, k_fc, *k_layers = jax.random.split(key, 2 + NUM_LAYERS)
    layers = [_init_layer(k) for k in k_layers]
    params = {name: jnp.stack([lp[name] for lp in layers]) for name in STACKED_NAMES}
    params["embedding"] = 0.001 * jax.random.normal(
        k_emb, (NUM_EMB, HIDDEN), jnp.float32)
    params["fc_w"] = 0.05 * jax.random.normal(k_fc, (HIDDEN, NUM_EMB), jnp.float32)
    params["fc_b"] = jnp.zeros((1, NUM_EMB), jnp.float32)
    return params


def sinusoidal_pos_emb(length, dim):
    half = dim // 2
    freq = jnp.exp(jnp.arange(half, dtype=jnp.float32)
                   * -(math.log(10000.0) / (half - 1)))
    ang = jnp.arange(length, dtype=jnp.float32)[:, None] * freq[None, :]
    return jnp.concatenate([jnp.sin(ang), jnp.cos(ang)], axis=-1)  # (L, dim)


def causal_mask(length):
    m = jnp.triu(jnp.ones((length, length), jnp.float32), 1)
    return jnp.where(m > 0, -1e9, 0.0).astype(jnp.float32)


# ---------------------------------------------------------------------------
# Pure-JAX reference (standard MHA math, PyTorch semantics) for correctness
# ---------------------------------------------------------------------------
def _ref_mha(q_in, kv_in, wq, wk, wv, wo, bq, bk, bv, bo, mask):
    Lq, Lk = q_in.shape[0], kv_in.shape[0]
    q = (q_in @ wq + bq).reshape(Lq, NUM_HEADS, HEAD_DIM).transpose(1, 0, 2)
    k = (kv_in @ wk + bk).reshape(Lk, NUM_HEADS, HEAD_DIM).transpose(1, 0, 2)
    v = (kv_in @ wv + bv).reshape(Lk, NUM_HEADS, HEAD_DIM).transpose(1, 0, 2)
    s = jnp.einsum("hqd,hkd->hqk", q, k) * SCALE
    if mask is not None:
        s = s + mask[None]
    a = jax.nn.softmax(s, axis=-1)
    o = jnp.einsum("hqk,hkd->hqd", a, v).transpose(1, 0, 2).reshape(Lq, HIDDEN)
    return o @ wo + bo


def reference_forward(params, input_seq, encoder_output):
    B, L = input_seq.shape
    pos = sinusoidal_pos_emb(L, HIDDEN)
    mask = causal_mask(L)
    embs = params["embedding"][input_seq] + pos[None]
    outs = []
    for bi in range(B):
        x = embs[bi]
        mem = encoder_output[bi]
        for l in range(NUM_LAYERS):
            p = {k: params[k][l] for k in STACKED_NAMES}
            sa = _ref_mha(x, x, p["sa_wq"], p["sa_wk"], p["sa_wv"], p["sa_wo"],
                          p["sa_bq"], p["sa_bk"], p["sa_bv"], p["sa_bo"], mask)
            x = _layernorm(x + sa, p["ln1_g"], p["ln1_b"])
            ca = _ref_mha(x, mem, p["ca_wq"], p["ca_wk"], p["ca_wv"], p["ca_wo"],
                          p["ca_bq"], p["ca_bk"], p["ca_bv"], p["ca_bo"], None)
            x = _layernorm(x + ca, p["ln2_g"], p["ln2_b"])
            ff = (jnp.maximum(x @ p["ff_w1"] + p["ff_b1"], 0.0)
                  @ p["ff_w2"] + p["ff_b2"])
            x = _layernorm(x + ff, p["ln3_g"], p["ln3_b"])
        outs.append(x @ params["fc_w"] + params["fc_b"])
    return jnp.stack(outs)


# ---------------------------------------------------------------------------
if __name__ == "__main__":
    key = jax.random.PRNGKey(0)
    k_params, k_seq, k_mem = jax.random.split(key, 3)

    params = init_params(k_params)
    input_seq = jax.random.randint(k_seq, (BATCH, TGT_LEN), 0, NUM_EMB,
                                   dtype=jnp.int32)
    encoder_output = jax.random.normal(k_mem, (BATCH, MEM_LEN, HIDDEN),
                                       jnp.float32)

    logits = decoder_forward(params, input_seq, encoder_output)
    logits = jax.block_until_ready(logits)

    assert logits.shape == (BATCH, TGT_LEN, NUM_EMB), logits.shape
    assert bool(jnp.all(jnp.isfinite(logits)))

    ref = reference_forward(params, input_seq, encoder_output)
    max_err = float(jnp.max(jnp.abs(logits - ref)))
    assert max_err < 1e-2, f"mismatch vs reference: {max_err}"

    print("KERNEL_OK")
</pallas_src>

<mosaic_0001>
module attributes {stable_mosaic.version = 11 : i64} {
  func.func @fused_decoder_kernel(%arg0: i32, %arg1: memref<1x8x1xi32, #tpu.memory_space<vmem>>, %arg2: memref<16x32xf32, #tpu.memory_space<vmem>>, %arg3: memref<8x32xf32, #tpu.memory_space<vmem>>, %arg4: memref<8x8xf32, #tpu.memory_space<vmem>>, %arg5: memref<1x8x32xf32, #tpu.memory_space<vmem>>, %arg6: memref<3x32x32xf32, #tpu.memory_space<vmem>>, %arg7: memref<3x32x32xf32, #tpu.memory_space<vmem>>, %arg8: memref<3x32x32xf32, #tpu.memory_space<vmem>>, %arg9: memref<3x32x32xf32, #tpu.memory_space<vmem>>, %arg10: memref<3x1x32xf32, #tpu.memory_space<vmem>>, %arg11: memref<3x1x32xf32, #tpu.memory_space<vmem>>, %arg12: memref<3x1x32xf32, #tpu.memory_space<vmem>>, %arg13: memref<3x1x32xf32, #tpu.memory_space<vmem>>, %arg14: memref<3x1x32xf32, #tpu.memory_space<vmem>>, %arg15: memref<3x1x32xf32, #tpu.memory_space<vmem>>, %arg16: memref<3x32x32xf32, #tpu.memory_space<vmem>>, %arg17: memref<3x32x32xf32, #tpu.memory_space<vmem>>, %arg18: memref<3x32x32xf32, #tpu.memory_space<vmem>>, %arg19: memref<3x32x32xf32, #tpu.memory_space<vmem>>, %arg20: memref<3x1x32xf32, #tpu.memory_space<vmem>>, %arg21: memref<3x1x32xf32, #tpu.memory_space<vmem>>, %arg22: memref<3x1x32xf32, #tpu.memory_space<vmem>>, %arg23: memref<3x1x32xf32, #tpu.memory_space<vmem>>, %arg24: memref<3x1x32xf32, #tpu.memory_space<vmem>>, %arg25: memref<3x1x32xf32, #tpu.memory_space<vmem>>, %arg26: memref<3x32x128xf32, #tpu.memory_space<vmem>>, %arg27: memref<3x1x128xf32, #tpu.memory_space<vmem>>, %arg28: memref<3x128x32xf32, #tpu.memory_space<vmem>>, %arg29: memref<3x1x32xf32, #tpu.memory_space<vmem>>, %arg30: memref<3x1x32xf32, #tpu.memory_space<vmem>>, %arg31: memref<3x1x32xf32, #tpu.memory_space<vmem>>, %arg32: memref<32x16xf32, #tpu.memory_space<vmem>>, %arg33: memref<1x16xf32, #tpu.memory_space<vmem>>, %arg34: memref<1x8x16xf32, #tpu.memory_space<vmem>>) attributes {dimension_semantics = [#tpu.dimension_semantics<parallel>], iteration_bounds = array<i64: 2>, scalar_prefetch = 0 : i64, scratch_operands = 0 : i64, tpu.core_type = #tpu.core_type<tc>, window_params = [{transform_indices = @transform_0, window_bounds = array<i64: 1, 8, 1>}, {pipeline_mode = #tpu.pipeline_mode<synchronous>, transform_indices = @transform_1, window_bounds = array<i64: 16, 32>}, {pipeline_mode = #tpu.pipeline_mode<synchronous>, transform_indices = @transform_2, window_bounds = array<i64: 8, 32>}, {pipeline_mode = #tpu.pipeline_mode<synchronous>, transform_indices = @transform_3, window_bounds = array<i64: 8, 8>}, {transform_indices = @transform_4, window_bounds = array<i64: 1, 8, 32>}, {pipeline_mode = #tpu.pipeline_mode<synchronous>, transform_indices = @transform_5, window_bounds = array<i64: 3, 32, 32>}, {pipeline_mode = #tpu.pipeline_mode<synchronous>, transform_indices = @transform_6, window_bounds = array<i64: 3, 32, 32>}, {pipeline_mode = #tpu.pipeline_mode<synchronous>, transform_indices = @transform_7, window_bounds = array<i64: 3, 32, 32>}, {pipeline_mode = #tpu.pipeline_mode<synchronous>, transform_indices = @transform_8, window_bounds = array<i64: 3, 32, 32>}, {pipeline_mode = #tpu.pipeline_mode<synchronous>, transform_indices = @transform_9, window_bounds = array<i64: 3, 1, 32>}, {pipeline_mode = #tpu.pipeline_mode<synchronous>, transform_indices = @transform_10, window_bounds = array<i64: 3, 1, 32>}, {pipeline_mode = #tpu.pipeline_mode<synchronous>, transform_indices = @transform_11, window_bounds = array<i64: 3, 1, 32>}, {pipeline_mode = #tpu.pipeline_mode<synchronous>, transform_indices = @transform_12, window_bounds = array<i64: 3, 1, 32>}, {pipeline_mode = #tpu.pipeline_mode<synchronous>, transform_indices = @transform_13, window_bounds = array<i64: 3, 1, 32>}, {pipeline_mode = #tpu.pipeline_mode<synchronous>, transform_indices = @transform_14, window_bounds = array<i64: 3, 1, 32>}, {pipeline_mode = #tpu.pipeline_mode<synchronous>, transform_indices = @transform_15, window_bounds = array<i64: 3, 32, 32>}, {pipeline_mode = #tpu.pipeline_mode<synchronous>, transform_indices = @transform_16, window_bounds = array<i64: 3, 32, 32>}, {pipeline_mode = #tpu.pipeline_mode<synchronous>, transform_indices = @transform_17, window_bounds = array<i64: 3, 32, 32>}, {pipeline_mode = #tpu.pipeline_mode<synchronous>, transform_indices = @transform_18, window_bounds = array<i64: 3, 32, 32>}, {pipeline_mode = #tpu.pipeline_mode<synchronous>, transform_indices = @transform_19, window_bounds = array<i64: 3, 1, 32>}, {pipeline_mode = #tpu.pipeline_mode<synchronous>, transform_indices = @transform_20, window_bounds = array<i64: 3, 1, 32>}, {pipeline_mode = #tpu.pipeline_mode<synchronous>, transform_indices = @transform_21, window_bounds = array<i64: 3, 1, 32>}, {pipeline_mode = #tpu.pipeline_mode<synchronous>, transform_indices = @transform_22, window_bounds = array<i64: 3, 1, 32>}, {pipeline_mode = #tpu.pipeline_mode<synchronous>, transform_indices = @transform_23, window_bounds = array<i64: 3, 1, 32>}, {pipeline_mode = #tpu.pipeline_mode<synchronous>, transform_indices = @transform_24, window_bounds = array<i64: 3, 1, 32>}, {pipeline_mode = #tpu.pipeline_mode<synchronous>, transform_indices = @transform_25, window_bounds = array<i64: 3, 32, 128>}, {pipeline_mode = #tpu.pipeline_mode<synchronous>, transform_indices = @transform_26, window_bounds = array<i64: 3, 1, 128>}, {pipeline_mode = #tpu.pipeline_mode<synchronous>, transform_indices = @transform_27, window_bounds = array<i64: 3, 128, 32>}, {pipeline_mode = #tpu.pipeline_mode<synchronous>, transform_indices = @transform_28, window_bounds = array<i64: 3, 1, 32>}, {pipeline_mode = #tpu.pipeline_mode<synchronous>, transform_indices = @transform_29, window_bounds = array<i64: 3, 1, 32>}, {pipeline_mode = #tpu.pipeline_mode<synchronous>, transform_indices = @transform_30, window_bounds = array<i64: 3, 1, 32>}, {pipeline_mode = #tpu.pipeline_mode<synchronous>, transform_indices = @transform_31, window_bounds = array<i64: 32, 16>}, {pipeline_mode = #tpu.pipeline_mode<synchronous>, transform_indices = @transform_32, window_bounds = array<i64: 1, 16>}, {transform_indices = @transform_33, window_bounds = array<i64: 1, 8, 16>}]} {
    %c0 = arith.constant 0 : index
    %c0_0 = arith.constant 0 : index
    %0 = vector.load %arg4[%c0, %c0_0] : memref<8x8xf32, #tpu.memory_space<vmem>>, vector<8x8xf32>
    %c0_1 = arith.constant 0 : index
    %c0_2 = arith.constant 0 : index
    %c0_3 = arith.constant 0 : index
    %1 = vector.load %arg5[%c0_1, %c0_2, %c0_3] : memref<1x8x32xf32, #tpu.memory_space<vmem>>, vector<1x8x32xf32>
    %2 = vector.shape_cast %1 : vector<1x8x32xf32> to vector<8x32xf32>
    %c0_4 = arith.constant 0 : index
    %c0_5 = arith.constant 0 : index
    %c0_6 = arith.constant 0 : index
    %3 = vector.load %arg1[%c0_4, %c0_5, %c0_6] : memref<1x8x1xi32, #tpu.memory_space<vmem>>, vector<1x8x1xi32>
    %4 = vector.shape_cast %3 : vector<1x8x1xi32> to vector<8x1xi32>
    %5 = tpu.iota {dimensions = array<i32: 1>} : vector<8x16xi32>
    %6 = vector.broadcast %4 : vector<8x1xi32> to vector<8x16xi32>
    %7 = arith.cmpi eq, %5, %6 : vector<8x16xi32>
    %8 = arith.extui %7 : vector<8x16xi1> to vector<8x16xi32>
    %9 = arith.sitofp %8 : vector<8x16xi32> to vector<8x16xf32>
    %c0_7 = arith.constant 0 : index
    %c0_8 = arith.constant 0 : index
    %10 = vector.load %arg2[%c0_7, %c0_8] : memref<16x32xf32, #tpu.memory_space<vmem>>, vector<16x32xf32>
    %cst = arith.constant dense<0.000000e+00> : vector<8x32xf32>
    %11 = tpu.matmul %9, %10, %cst {dimension_numbers = #tpu.dot_dimension_numbers<[1], [0], [0], [1], [0, 0, 1, 1], [], []>} : vector<8x16xf32>, vector<16x32xf32>, vector<8x32xf32> -> vector<8x32xf32>
    %c0_9 = arith.constant 0 : index
    %c0_10 = arith.constant 0 : index
    %12 = vector.load %arg3[%c0_9, %c0_10] : memref<8x32xf32, #tpu.memory_space<vmem>>, vector<8x32xf32>
    %13 = arith.addf %11, %12 : vector<8x32xf32>
    %c0_11 = arith.constant 0 : index
    %c0_12 = arith.constant 0 : index
    %c0_13 = arith.constant 0 : index
    %14 = vector.load %arg6[%c0_11, %c0_12, %c0_13] : memref<3x32x32xf32, #tpu.memory_space<vmem>>, vector<1x32x32xf32>
    %15 = vector.shape_cast %14 : vector<1x32x32xf32> to vector<32x32xf32>
    %c0_14 = arith.constant 0 : index
    %c0_15 = arith.constant 0 : index
    %c0_16 = arith.constant 0 : index
    %16 = vector.load %arg7[%c0_14, %c0_15, %c0_16] : memref<3x32x32xf32, #tpu.memory_space<vmem>>, vector<1x32x32xf32>
    %17 = vector.shape_cast %16 : vector<1x32x32xf32> to vector<32x32xf32>
    %c0_17 = arith.constant 0 : index
    %c0_18 = arith.constant 0 : index
    %c0_19 = arith.constant 0 : index
    %18 = vector.load %arg8[%c0_17, %c0_18, %c0_19] : memref<3x32x32xf32, #tpu.memory_space<vmem>>, vector<1x32x32xf32>
    %19 = vector.shape_cast %18 : vector<1x32x32xf32> to vector<32x32xf32>
    %c0_20 = arith.constant 0 : index
    %c0_21 = arith.constant 0 : index
    %c0_22 = arith.constant 0 : index
    %20 = vector.load %arg9[%c0_20, %c0_21, %c0_22] : memref<3x32x32xf32, #tpu.memory_space<vmem>>, vector<1x32x32xf32>
    %21 = vector.shape_cast %20 : vector<1x32x32xf32> to vector<32x32xf32>
    %c0_23 = arith.constant 0 : index
    %c0_24 = arith.constant 0 : index
    %c0_25 = arith.constant 0 : index
    %22 = vector.load %arg10[%c0_23, %c0_24, %c0_25] : memref<3x1x32xf32, #tpu.memory_space<vmem>>, vector<1x1x32xf32>
    %23 = vector.shape_cast %22 : vector<1x1x32xf32> to vector<1x32xf32>
    %c0_26 = arith.constant 0 : index
    %c0_27 = arith.constant 0 : index
    %c0_28 = arith.constant 0 : index
    %24 = vector.load %arg11[%c0_26, %c0_27, %c0_28] : memref<3x1x32xf32, #tpu.memory_space<vmem>>, vector<1x1x32xf32>
    %25 = vector.shape_cast %24 : vector<1x1x32xf32> to vector<1x32xf32>
    %c0_29 = arith.constant 0 : index
    %c0_30 = arith.constant 0 : index
    %c0_31 = arith.constant 0 : index
    %26 = vector.load %arg12[%c0_29, %c0_30, %c0_31] : memref<3x1x32xf32, #tpu.memory_space<vmem>>, vector<1x1x32xf32>
    %27 = vector.shape_cast %26 : vector<1x1x32xf32> to vector<1x32xf32>
    %c0_32 = arith.constant 0 : index
    %c0_33 = arith.constant 0 : index
    %c0_34 = arith.constant 0 : index
    %28 = vector.load %arg13[%c0_32, %c0_33, %c0_34] : memref<3x1x32xf32, #tpu.memory_space<vmem>>, vector<1x1x32xf32>
    %29 = vector.shape_cast %28 : vector<1x1x32xf32> to vector<1x32xf32>
    %cst_35 = arith.constant dense<0.000000e+00> : vector<8x32xf32>
    %30 = tpu.matmul %13, %15, %cst_35 {dimension_numbers = #tpu.dot_dimension_numbers<[1], [0], [0], [1], [0, 0, 1, 1], [], []>} : vector<8x32xf32>, vector<32x32xf32>, vector<8x32xf32> -> vector<8x32xf32>
    %31 = vector.broadcast %23 : vector<1x32xf32> to vector<8x32xf32>
    %32 = arith.addf %30, %31 : vector<8x32xf32>
    %cst_36 = arith.constant dense<0.000000e+00> : vector<8x32xf32>
    %33 = tpu.matmul %13, %17, %cst_36 {dimension_numbers = #tpu.dot_dimension_numbers<[1], [0], [0], [1], [0, 0, 1, 1], [], []>} : vector<8x32xf32>, vector<32x32xf32>, vector<8x32xf32> -> vector<8x32xf32>
    %34 = vector.broadcast %25 : vector<1x32xf32> to vector<8x32xf32>
    %35 = arith.addf %33, %34 : vector<8x32xf32>
    %cst_37 = arith.constant dense<0.000000e+00> : vector<8x32xf32>
    %36 = tpu.matmul %13, %19, %cst_37 {dimension_numbers = #tpu.dot_dimension_numbers<[1], [0], [0], [1], [0, 0, 1, 1], [], []>} : vector<8x32xf32>, vector<32x32xf32>, vector<8x32xf32> -> vector<8x32xf32>
    %37 = vector.broadcast %27 : vector<1x32xf32> to vector<8x32xf32>
    %38 = arith.addf %36, %37 : vector<8x32xf32>
    %39 = vector.extract_strided_slice %32 {offsets = [0, 0], sizes = [8, 8], strides = [1, 1]} : vector<8x32xf32> to vector<8x8xf32>
    %40 = vector.extract_strided_slice %35 {offsets = [0, 0], sizes = [8, 8], strides = [1, 1]} : vector<8x32xf32> to vector<8x8xf32>
    %cst_38 = arith.constant dense<0.000000e+00> : vector<8x8xf32>
    %41 = tpu.matmul %39, %40, %cst_38 {dimension_numbers = #tpu.dot_dimension_numbers<[1], [1], [0], [0], [0, 0, 1, 0], [], []>} : vector<8x8xf32>, vector<8x8xf32>, vector<8x8xf32> -> vector<8x8xf32>
    %cst_39 = arith.constant 0.353553385 : f32
    %42 = vector.broadcast %cst_39 : f32 to vector<8x8xf32>
    %43 = arith.mulf %41, %42 : vector<8x8xf32>
    %44 = arith.addf %43, %0 : vector<8x8xf32>
    %cst_40 = arith.constant dense<0xFF800000> : vector<8xf32>
    %45 = vector.multi_reduction <maximumf>, %44, %cst_40 [1] : vector<8x8xf32> to vector<8xf32>
    %46 = vector.shape_cast %45 : vector<8xf32> to vector<8x1xf32>
    %47 = vector.broadcast %46 : vector<8x1xf32> to vector<8x8xf32>
    %48 = arith.subf %44, %47 : vector<8x8xf32>
    %49 = math.exp %48 : vector<8x8xf32>
    %cst_41 = arith.constant dense<0.000000e+00> : vector<8xf32>
    %50 = vector.multi_reduction <add>, %49, %cst_41 [1] : vector<8x8xf32> to vector<8xf32>
    %51 = vector.shape_cast %50 : vector<8xf32> to vector<8x1xf32>
    %52 = tpu.reciprocal %51 {approx = true} : vector<8x1xf32> -> vector<8x1xf32>
    %53 = vector.broadcast %52 : vector<8x1xf32> to vector<8x8xf32>
    %54 = arith.mulf %49, %53 : vector<8x8xf32>
    %55 = vector.extract_strided_slice %38 {offsets = [0, 0], sizes = [8, 8], strides = [1, 1]} : vector<8x32xf32> to vector<8x8xf32>
    %cst_42 = arith.constant dense<0.000000e+00> : vector<8x8xf32>
    %56 = tpu.matmul %54, %55, %cst_42 {dimension_numbers = #tpu.dot_dimension_numbers<[1], [0], [0], [1], [0, 0, 1, 1], [], []>} : vector<8x8xf32>, vector<8x8xf32>, vector<8x8xf32> -> vector<8x8xf32>
    %57 = vector.extract_strided_slice %32 {offsets = [0, 8], sizes = [8, 8], strides = [1, 1]} : vector<8x32xf32> to vector<8x8xf32>
    %58 = vector.extract_strided_slice %35 {offsets = [0, 8], sizes = [8, 8], strides = [1, 1]} : vector<8x32xf32> to vector<8x8xf32>
    %cst_43 = arith.constant dense<0.000000e+00> : vector<8x8xf32>
    %59 = tpu.matmul %57, %58, %cst_43 {dimension_numbers = #tpu.dot_dimension_numbers<[1], [1], [0], [0], [0, 0, 1, 0], [], []>} : vector<8x8xf32>, vector<8x8xf32>, vector<8x8xf32> -> vector<8x8xf32>
    %cst_44 = arith.constant 0.353553385 : f32
    %60 = vector.broadcast %cst_44 : f32 to vector<8x8xf32>
    %61 = arith.mulf %59, %60 : vector<8x8xf32>
    %62 = arith.addf %61, %0 : vector<8x8xf32>
    %cst_45 = arith.constant dense<0xFF800000> : vector<8xf32>
    %63 = vector.multi_reduction <maximumf>, %62, %cst_45 [1] : vector<8x8xf32> to vector<8xf32>
    %64 = vector.shape_cast %63 : vector<8xf32> to vector<8x1xf32>
    %65 = vector.broadcast %64 : vector<8x1xf32> to vector<8x8xf32>
    %66 = arith.subf %62, %65 : vector<8x8xf32>
    %67 = math.exp %66 : vector<8x8xf32>
    %cst_46 = arith.constant dense<0.000000e+00> : vector<8xf32>
    %68 = vector.multi_reduction <add>, %67, %cst_46 [1] : vector<8x8xf32> to vector<8xf32>
    %69 = vector.shape_cast %68 : vector<8xf32> to vector<8x1xf32>
    %70 = tpu.reciprocal %69 {approx = true} : vector<8x1xf32> -> vector<8x1xf32>
    %71 = vector.broadcast %70 : vector<8x1xf32> to vector<8x8xf32>
    %72 = arith.mulf %67, %71 : vector<8x8xf32>
    %73 = vector.extract_strided_slice %38 {offsets = [0, 8], sizes = [8, 8], strides = [1, 1]} : vector<8x32xf32> to vector<8x8xf32>
    %cst_47 = arith.constant dense<0.000000e+00> : vector<8x8xf32>
    %74 = tpu.matmul %72, %73, %cst_47 {dimension_numbers = #tpu.dot_dimension_numbers<[1], [0], [0], [1], [0, 0, 1, 1], [], []>} : vector<8x8xf32>, vector<8x8xf32>, vector<8x8xf32> -> vector<8x8xf32>
    %75 = vector.extract_strided_slice %32 {offsets = [0, 16], sizes = [8, 8], strides = [1, 1]} : vector<8x32xf32> to vector<8x8xf32>
    %76 = vector.extract_strided_slice %35 {offsets = [0, 16], sizes = [8, 8], strides = [1, 1]} : vector<8x32xf32> to vector<8x8xf32>
    %cst_48 = arith.constant dense<0.000000e+00> : vector<8x8xf32>
    %77 = tpu.matmul %75, %76, %cst_48 {dimension_numbers = #tpu.dot_dimension_numbers<[1], [1], [0], [0], [0, 0, 1, 0], [], []>} : vector<8x8xf32>, vector<8x8xf32>, vector<8x8xf32> -> vector<8x8xf32>
    %cst_49 = arith.constant 0.353553385 : f32
    %78 = vector.broadcast %cst_49 : f32 to vector<8x8xf32>
    %79 = arith.mulf %77, %78 : vector<8x8xf32>
    %80 = arith.addf %79, %0 : vector<8x8xf32>
    %cst_50 = arith.constant dense<0xFF800000> : vector<8xf32>
    %81 = vector.multi_reduction <maximumf>, %80, %cst_50 [1] : vector<8x8xf32> to vector<8xf32>
    %82 = vector.shape_cast %81 : vector<8xf32> to vector<8x1xf32>
    %83 = vector.broadcast %82 : vector<8x1xf32> to vector<8x8xf32>
    %84 = arith.subf %80, %83 : vector<8x8xf32>
    %85 = math.exp %84 : vector<8x8xf32>
    %cst_51 = arith.constant dense<0.000000e+00> : vector<8xf32>
    %86 = vector.multi_reduction <add>, %85, %cst_51 [1] : vector<8x8xf32> to vector<8xf32>
    %87 = vector.shape_cast %86 : vector<8xf32> to vector<8x1xf32>
    %88 = tpu.reciprocal %87 {approx = true} : vector<8x1xf32> -> vector<8x1xf32>
    %89 = vector.broadcast %88 : vector<8x1xf32> to vector<8x8xf32>
    %90 = arith.mulf %85, %89 : vector<8x8xf32>
    %91 = vector.extract_strided_slice %38 {offsets = [0, 16], sizes = [8, 8], strides = [1, 1]} : vector<8x32xf32> to vector<8x8xf32>
    %cst_52 = arith.constant dense<0.000000e+00> : vector<8x8xf32>
    %92 = tpu.matmul %90, %91, %cst_52 {dimension_numbers = #tpu.dot_dimension_numbers<[1], [0], [0], [1], [0, 0, 1, 1], [], []>} : vector<8x8xf32>, vector<8x8xf32>, vector<8x8xf32> -> vector<8x8xf32>
    %93 = vector.extract_strided_slice %32 {offsets = [0, 24], sizes = [8, 8], strides = [1, 1]} : vector<8x32xf32> to vector<8x8xf32>
    %94 = vector.extract_strided_slice %35 {offsets = [0, 24], sizes = [8, 8], strides = [1, 1]} : vector<8x32xf32> to vector<8x8xf32>
    %cst_53 = arith.constant dense<0.000000e+00> : vector<8x8xf32>
    %95 = tpu.matmul %93, %94, %cst_53 {dimension_numbers = #tpu.dot_dimension_numbers<[1], [1], [0], [0], [0, 0, 1, 0], [], []>} : vector<8x8xf32>, vector<8x8xf32>, vector<8x8xf32> -> vector<8x8xf32>
    %cst_54 = arith.constant 0.353553385 : f32
    %96 = vector.broadcast %cst_54 : f32 to vector<8x8xf32>
    %97 = arith.mulf %95, %96 : vector<8x8xf32>
    %98 = arith.addf %97, %0 : vector<8x8xf32>
    %cst_55 = arith.constant dense<0xFF800000> : vector<8xf32>
    %99 = vector.multi_reduction <maximumf>, %98, %cst_55 [1] : vector<8x8xf32> to vector<8xf32>
    %100 = vector.shape_cast %99 : vector<8xf32> to vector<8x1xf32>
    %101 = vector.broadcast %100 : vector<8x1xf32> to vector<8x8xf32>
    %102 = arith.subf %98, %101 : vector<8x8xf32>
    %103 = math.exp %102 : vector<8x8xf32>
    %cst_56 = arith.constant dense<0.000000e+00> : vector<8xf32>
    %104 = vector.multi_reduction <add>, %103, %cst_56 [1] : vector<8x8xf32> to vector<8xf32>
    %105 = vector.shape_cast %104 : vector<8xf32> to vector<8x1xf32>
    %106 = tpu.reciprocal %105 {approx = true} : vector<8x1xf32> -> vector<8x1xf32>
    %107 = vector.broadcast %106 : vector<8x1xf32> to vector<8x8xf32>
    %108 = arith.mulf %103, %107 : vector<8x8xf32>
    %109 = vector.extract_strided_slice %38 {offsets = [0, 24], sizes = [8, 8], strides = [1, 1]} : vector<8x32xf32> to vector<8x8xf32>
    %cst_57 = arith.constant dense<0.000000e+00> : vector<8x8xf32>
    %110 = tpu.matmul %108, %109, %cst_57 {dimension_numbers = #tpu.dot_dimension_numbers<[1], [0], [0], [1], [0, 0, 1, 1], [], []>} : vector<8x8xf32>, vector<8x8xf32>, vector<8x8xf32> -> vector<8x8xf32>
    %111 = tpu.concatenate %56, %74, %92, %110 in 1 : vector<8x8xf32>, vector<8x8xf32>, vector<8x8xf32>, vector<8x8xf32> -> vector<8x32xf32>
    %cst_58 = arith.constant dense<0.000000e+00> : vector<8x32xf32>
    %112 = tpu.matmul %111, %21, %cst_58 {dimension_numbers = #tpu.dot_dimension_numbers<[1], [0], [0], [1], [0, 0, 1, 1], [], []>} : vector<8x32xf32>, vector<32x32xf32>, vector<8x32xf32> -> vector<8x32xf32>
    %113 = vector.broadcast %29 : vector<1x32xf32> to vector<8x32xf32>
    %114 = arith.addf %112, %113 : vector<8x32xf32>
    %115 = arith.addf %13, %114 : vector<8x32xf32>
    %c0_59 = arith.constant 0 : index
    %c0_60 = arith.constant 0 : index
    %c0_61 = arith.constant 0 : index
    %116 = vector.load %arg14[%c0_59, %c0_60, %c0_61] : memref<3x1x32xf32, #tpu.memory_space<vmem>>, vector<1x1x32xf32>
    %117 = vector.shape_cast %116 : vector<1x1x32xf32> to vector<1x32xf32>
    %c0_62 = arith.constant 0 : index
    %c0_63 = arith.constant 0 : index
    %c0_64 = arith.constant 0 : index
    %118 = vector.load %arg15[%c0_62, %c0_63, %c0_64] : memref<3x1x32xf32, #tpu.memory_space<vmem>>, vector<1x1x32xf32>
    %119 = vector.shape_cast %118 : vector<1x1x32xf32> to vector<1x32xf32>
    %cst_65 = arith.constant dense<0.000000e+00> : vector<8xf32>
    %120 = vector.multi_reduction <add>, %115, %cst_65 [1] : vector<8x32xf32> to vector<8xf32>
    %121 = vector.shape_cast %120 : vector<8xf32> to vector<8x1xf32>
    %cst_66 = arith.constant 3.200000e+01 : f32
    %122 = vector.broadcast %cst_66 : f32 to vector<8x1xf32>
    %123 = arith.divf %121, %122 : vector<8x1xf32>
    %124 = vector.broadcast %123 : vector<8x1xf32> to vector<8x32xf32>
    %125 = arith.subf %115, %124 : vector<8x32xf32>
    %126 = vector.broadcast %123 : vector<8x1xf32> to vector<8x32xf32>
    %127 = arith.subf %115, %126 : vector<8x32xf32>
    %128 = arith.mulf %125, %127 : vector<8x32xf32>
    %cst_67 = arith.constant dense<0.000000e+00> : vector<8xf32>
    %129 = vector.multi_reduction <add>, %128, %cst_67 [1] : vector<8x32xf32> to vector<8xf32>
    %130 = vector.shape_cast %129 : vector<8xf32> to vector<8x1xf32>
    %cst_68 = arith.constant 3.200000e+01 : f32
    %131 = vector.broadcast %cst_68 : f32 to vector<8x1xf32>
    %132 = arith.divf %130, %131 : vector<8x1xf32>
    %133 = vector.broadcast %123 : vector<8x1xf32> to vector<8x32xf32>
    %134 = arith.subf %115, %133 : vector<8x32xf32>
    %cst_69 = arith.constant 9.99999974E-6 : f32
    %135 = vector.broadcast %cst_69 : f32 to vector<8x1xf32>
    %136 = arith.addf %132, %135 : vector<8x1xf32>
    %137 = math.rsqrt %136 : vector<8x1xf32>
    %138 = vector.broadcast %137 : vector<8x1xf32> to vector<8x32xf32>
    %139 = arith.mulf %134, %138 : vector<8x32xf32>
    %140 = vector.broadcast %117 : vector<1x32xf32> to vector<8x32xf32>
    %141 = arith.mulf %139, %140 : vector<8x32xf32>
    %142 = vector.broadcast %119 : vector<1x32xf32> to vector<8x32xf32>
    %143 = arith.addf %141, %142 : vector<8x32xf32>
    %c0_70 = arith.constant 0 : index
    %c0_71 = arith.constant 0 : index
    %c0_72 = arith.constant 0 : index
    %144 = vector.load %arg16[%c0_70, %c0_71, %c0_72] : memref<3x32x32xf32, #tpu.memory_space<vmem>>, vector<1x32x32xf32>
    %145 = vector.shape_cast %144 : vector<1x32x32xf32> to vector<32x32xf32>
    %c0_73 = arith.constant 0 : index
    %c0_74 = arith.constant 0 : index
    %c0_75 = arith.constant 0 : index
    %146 = vector.load %arg17[%c0_73, %c0_74, %c0_75] : memref<3x32x32xf32, #tpu.memory_space<vmem>>, vector<1x32x32xf32>
    %147 = vector.shape_cast %146 : vector<1x32x32xf32> to vector<32x32xf32>
    %c0_76 = arith.constant 0 : index
    %c0_77 = arith.constant 0 : index
    %c0_78 = arith.constant 0 : index
    %148 = vector.load %arg18[%c0_76, %c0_77, %c0_78] : memref<3x32x32xf32, #tpu.memory_space<vmem>>, vector<1x32x32xf32>
    %149 = vector.shape_cast %148 : vector<1x32x32xf32> to vector<32x32xf32>
    %c0_79 = arith.constant 0 : index
    %c0_80 = arith.constant 0 : index
    %c0_81 = arith.constant 0 : index
    %150 = vector.load %arg19[%c0_79, %c0_80, %c0_81] : memref<3x32x32xf32, #tpu.memory_space<vmem>>, vector<1x32x32xf32>
    %151 = vector.shape_cast %150 : vector<1x32x32xf32> to vector<32x32xf32>
    %c0_82 = arith.constant 0 : index
    %c0_83 = arith.constant 0 : index
    %c0_84 = arith.constant 0 : index
    %152 = vector.load %arg20[%c0_82, %c0_83, %c0_84] : memref<3x1x32xf32, #tpu.memory_space<vmem>>, vector<1x1x32xf32>
    %153 = vector.shape_cast %152 : vector<1x1x32xf32> to vector<1x32xf32>
    %c0_85 = arith.constant 0 : index
    %c0_86 = arith.constant 0 : index
    %c0_87 = arith.constant 0 : index
    %154 = vector.load %arg21[%c0_85, %c0_86, %c0_87] : memref<3x1x32xf32, #tpu.memory_space<vmem>>, vector<1x1x32xf32>
    %155 = vector.shape_cast %154 : vector<1x1x32xf32> to vector<1x32xf32>
    %c0_88 = arith.constant 0 : index
    %c0_89 = arith.constant 0 : index
    %c0_90 = arith.constant 0 : index
    %156 = vector.load %arg22[%c0_88, %c0_89, %c0_90] : memref<3x1x32xf32, #tpu.memory_space<vmem>>, vector<1x1x32xf32>
    %157 = vector.shape_cast %156 : vector<1x1x32xf32> to vector<1x32xf32>
    %c0_91 = arith.constant 0 : index
    %c0_92 = arith.constant 0 : index
    %c0_93 = arith.constant 0 : index
    %158 = vector.load %arg23[%c0_91, %c0_92, %c0_93] : memref<3x1x32xf32, #tpu.memory_space<vmem>>, vector<1x1x32xf32>
    %159 = vector.shape_cast %158 : vector<1x1x32xf32> to vector<1x32xf32>
    %cst_94 = arith.constant dense<0.000000e+00> : vector<8x32xf32>
    %160 = tpu.matmul %143, %145, %cst_94 {dimension_numbers = #tpu.dot_dimension_numbers<[1], [0], [0], [1], [0, 0, 1, 1], [], []>} : vector<8x32xf32>, vector<32x32xf32>, vector<8x32xf32> -> vector<8x32xf32>
    %161 = vector.broadcast %153 : vector<1x32xf32> to vector<8x32xf32>
    %162 = arith.addf %160, %161 : vector<8x32xf32>
    %cst_95 = arith.constant dense<0.000000e+00> : vector<8x32xf32>
    %163 = tpu.matmul %2, %147, %cst_95 {dimension_numbers = #tpu.dot_dimension_numbers<[1], [0], [0], [1], [0, 0, 1, 1], [], []>} : vector<8x32xf32>, vector<32x32xf32>, vector<8x32xf32> -> vector<8x32xf32>
    %164 = vector.broadcast %155 : vector<1x32xf32> to vector<8x32xf32>
    %165 = arith.addf %163, %164 : vector<8x32xf32>
    %cst_96 = arith.constant dense<0.000000e+00> : vector<8x32xf32>
    %166 = tpu.matmul %2, %149, %cst_96 {dimension_numbers = #tpu.dot_dimension_numbers<[1], [0], [0], [1], [0, 0, 1, 1], [], []>} : vector<8x32xf32>, vector<32x32xf32>, vector<8x32xf32> -> vector<8x32xf32>
    %167 = vector.broadcast %157 : vector<1x32xf32> to vector<8x32xf32>
    %168 = arith.addf %166, %167 : vector<8x32xf32>
    %169 = vector.extract_strided_slice %162 {offsets = [0, 0], sizes = [8, 8], strides = [1, 1]} : vector<8x32xf32> to vector<8x8xf32>
    %170 = vector.extract_strided_slice %165 {offsets = [0, 0], sizes = [8, 8], strides = [1, 1]} : vector<8x32xf32> to vector<8x8xf32>
    %cst_97 = arith.constant dense<0.000000e+00> : vector<8x8xf32>
    %171 = tpu.matmul %169, %170, %cst_97 {dimension_numbers = #tpu.dot_dimension_numbers<[1], [1], [0], [0], [0, 0, 1, 0], [], []>} : vector<8x8xf32>, vector<8x8xf32>, vector<8x8xf32> -> vector<8x8xf32>
    %cst_98 = arith.constant 0.353553385 : f32
    %172 = vector.broadcast %cst_98 : f32 to vector<8x8xf32>
    %173 = arith.mulf %171, %172 : vector<8x8xf32>
    %cst_99 = arith.constant dense<0xFF800000> : vector<8xf32>
    %174 = vector.multi_reduction <maximumf>, %173, %cst_99 [1] : vector<8x8xf32> to vector<8xf32>
    %175 = vector.shape_cast %174 : vector<8xf32> to vector<8x1xf32>
    %176 = vector.broadcast %175 : vector<8x1xf32> to vector<8x8xf32>
    %177 = arith.subf %173, %176 : vector<8x8xf32>
    %178 = math.exp %177 : vector<8x8xf32>
    %cst_100 = arith.constant dense<0.000000e+00> : vector<8xf32>
    %179 = vector.multi_reduction <add>, %178, %cst_100 [1] : vector<8x8xf32> to vector<8xf32>
    %180 = vector.shape_cast %179 : vector<8xf32> to vector<8x1xf32>
    %181 = tpu.reciprocal %180 {approx = true} : vector<8x1xf32> -> vector<8x1xf32>
    %182 = vector.broadcast %181 : vector<8x1xf32> to vector<8x8xf32>
    %183 = arith.mulf %178, %182 : vector<8x8xf32>
    %184 = vector.extract_strided_slice %168 {offsets = [0, 0], sizes = [8, 8], strides = [1, 1]} : vector<8x32xf32> to vector<8x8xf32>
    %cst_101 = arith.constant dense<0.000000e+00> : vector<8x8xf32>
    %185 = tpu.matmul %183, %184, %cst_101 {dimension_numbers = #tpu.dot_dimension_numbers<[1], [0], [0], [1], [0, 0, 1, 1], [], []>} : vector<8x8xf32>, vector<8x8xf32>, vector<8x8xf32> -> vector<8x8xf32>
    %186 = vector.extract_strided_slice %162 {offsets = [0, 8], sizes = [8, 8], strides = [1, 1]} : vector<8x32xf32> to vector<8x8xf32>
    %187 = vector.extract_strided_slice %165 {offsets = [0, 8], sizes = [8, 8], strides = [1, 1]} : vector<8x32xf32> to vector<8x8xf32>
    %cst_102 = arith.constant dense<0.000000e+00> : vector<8x8xf32>
    %188 = tpu.matmul %186, %187, %cst_102 {dimension_numbers = #tpu.dot_dimension_numbers<[1], [1], [0], [0], [0, 0, 1, 0], [], []>} : vector<8x8xf32>, vector<8x8xf32>, vector<8x8xf32> -> vector<8x8xf32>
    %cst_103 = arith.constant 0.353553385 : f32
    %189 = vector.broadcast %cst_103 : f32 to vector<8x8xf32>
    %190 = arith.mulf %188, %189 : vector<8x8xf32>
    %cst_104 = arith.constant dense<0xFF800000> : vector<8xf32>
    %191 = vector.multi_reduction <maximumf>, %190, %cst_104 [1] : vector<8x8xf32> to vector<8xf32>
    %192 = vector.shape_cast %191 : vector<8xf32> to vector<8x1xf32>
    %193 = vector.broadcast %192 : vector<8x1xf32> to vector<8x8xf32>
    %194 = arith.subf %190, %193 : vector<8x8xf32>
    %195 = math.exp %194 : vector<8x8xf32>
    %cst_105 = arith.constant dense<0.000000e+00> : vector<8xf32>
    %196 = vector.multi_reduction <add>, %195, %cst_105 [1] : vector<8x8xf32> to vector<8xf32>
    %197 = vector.shape_cast %196 : vector<8xf32> to vector<8x1xf32>
    %198 = tpu.reciprocal %197 {approx = true} : vector<8x1xf32> -> vector<8x1xf32>
    %199 = vector.broadcast %198 : vector<8x1xf32> to vector<8x8xf32>
    %200 = arith.mulf %195, %199 : vector<8x8xf32>
    %201 = vector.extract_strided_slice %168 {offsets = [0, 8], sizes = [8, 8], strides = [1, 1]} : vector<8x32xf32> to vector<8x8xf32>
    %cst_106 = arith.constant dense<0.000000e+00> : vector<8x8xf32>
    %202 = tpu.matmul %200, %201, %cst_106 {dimension_numbers = #tpu.dot_dimension_numbers<[1], [0], [0], [1], [0, 0, 1, 1], [], []>} : vector<8x8xf32>, vector<8x8xf32>, vector<8x8xf32> -> vector<8x8xf32>
    %203 = vector.extract_strided_slice %162 {offsets = [0, 16], sizes = [8, 8], strides = [1, 1]} : vector<8x32xf32> to vector<8x8xf32>
    %204 = vector.extract_strided_slice %165 {offsets = [0, 16], sizes = [8, 8], strides = [1, 1]} : vector<8x32xf32> to vector<8x8xf32>
    %cst_107 = arith.constant dense<0.000000e+00> : vector<8x8xf32>
    %205 = tpu.matmul %203, %204, %cst_107 {dimension_numbers = #tpu.dot_dimension_numbers<[1], [1], [0], [0], [0, 0, 1, 0], [], []>} : vector<8x8xf32>, vector<8x8xf32>, vector<8x8xf32> -> vector<8x8xf32>
    %cst_108 = arith.constant 0.353553385 : f32
    %206 = vector.broadcast %cst_108 : f32 to vector<8x8xf32>
    %207 = arith.mulf %205, %206 : vector<8x8xf32>
    %cst_109 = arith.constant dense<0xFF800000> : vector<8xf32>
    %208 = vector.multi_reduction <maximumf>, %207, %cst_109 [1] : vector<8x8xf32> to vector<8xf32>
    %209 = vector.shape_cast %208 : vector<8xf32> to vector<8x1xf32>
    %210 = vector.broadcast %209 : vector<8x1xf32> to vector<8x8xf32>
    %211 = arith.subf %207, %210 : vector<8x8xf32>
    %212 = math.exp %211 : vector<8x8xf32>
    %cst_110 = arith.constant dense<0.000000e+00> : vector<8xf32>
    %213 = vector.multi_reduction <add>, %212, %cst_110 [1] : vector<8x8xf32> to vector<8xf32>
    %214 = vector.shape_cast %213 : vector<8xf32> to vector<8x1xf32>
    %215 = tpu.reciprocal %214 {approx = true} : vector<8x1xf32> -> vector<8x1xf32>
    %216 = vector.broadcast %215 : vector<8x1xf32> to vector<8x8xf32>
    %217 = arith.mulf %212, %216 : vector<8x8xf32>
    %218 = vector.extract_strided_slice %168 {offsets = [0, 16], sizes = [8, 8], strides = [1, 1]} : vector<8x32xf32> to vector<8x8xf32>
    %cst_111 = arith.constant dense<0.000000e+00> : vector<8x8xf32>
    %219 = tpu.matmul %217, %218, %cst_111 {dimension_numbers = #tpu.dot_dimension_numbers<[1], [0], [0], [1], [0, 0, 1, 1], [], []>} : vector<8x8xf32>, vector<8x8xf32>, vector<8x8xf32> -> vector<8x8xf32>
    %220 = vector.extract_strided_slice %162 {offsets = [0, 24], sizes = [8, 8], strides = [1, 1]} : vector<8x32xf32> to vector<8x8xf32>
    %221 = vector.extract_strided_slice %165 {offsets = [0, 24], sizes = [8, 8], strides = [1, 1]} : vector<8x32xf32> to vector<8x8xf32>
    %cst_112 = arith.constant dense<0.000000e+00> : vector<8x8xf32>
    %222 = tpu.matmul %220, %221, %cst_112 {dimension_numbers = #tpu.dot_dimension_numbers<[1], [1], [0], [0], [0, 0, 1, 0], [], []>} : vector<8x8xf32>, vector<8x8xf32>, vector<8x8xf32> -> vector<8x8xf32>
    %cst_113 = arith.constant 0.353553385 : f32
    %223 = vector.broadcast %cst_113 : f32 to vector<8x8xf32>
    %224 = arith.mulf %222, %223 : vector<8x8xf32>
    %cst_114 = arith.constant dense<0xFF800000> : vector<8xf32>
    %225 = vector.multi_reduction <maximumf>, %224, %cst_114 [1] : vector<8x8xf32> to vector<8xf32>
    %226 = vector.shape_cast %225 : vector<8xf32> to vector<8x1xf32>
    %227 = vector.broadcast %226 : vector<8x1xf32> to vector<8x8xf32>
    %228 = arith.subf %224, %227 : vector<8x8xf32>
    %229 = math.exp %228 : vector<8x8xf32>
    %cst_115 = arith.constant dense<0.000000e+00> : vector<8xf32>
    %230 = vector.multi_reduction <add>, %229, %cst_115 [1] : vector<8x8xf32> to vector<8xf32>
    %231 = vector.shape_cast %230 : vector<8xf32> to vector<8x1xf32>
    %232 = tpu.reciprocal %231 {approx = true} : vector<8x1xf32> -> vector<8x1xf32>
    %233 = vector.broadcast %232 : vector<8x1xf32> to vector<8x8xf32>
    %234 = arith.mulf %229, %233 : vector<8x8xf32>
    %235 = vector.extract_strided_slice %168 {offsets = [0, 24], sizes = [8, 8], strides = [1, 1]} : vector<8x32xf32> to vector<8x8xf32>
    %cst_116 = arith.constant dense<0.000000e+00> : vector<8x8xf32>
    %236 = tpu.matmul %234, %235, %cst_116 {dimension_numbers = #tpu.dot_dimension_numbers<[1], [0], [0], [1], [0, 0, 1, 1], [], []>} : vector<8x8xf32>, vector<8x8xf32>, vector<8x8xf32> -> vector<8x8xf32>
    %237 = tpu.concatenate %185, %202, %219, %236 in 1 : vector<8x8xf32>, vector<8x8xf32>, vector<8x8xf32>, vector<8x8xf32> -> vector<8x32xf32>
    %cst_117 = arith.constant dense<0.000000e+00> : vector<8x32xf32>
    %238 = tpu.matmul %237, %151, %cst_117 {dimension_numbers = #tpu.dot_dimension_numbers<[1], [0], [0], [1], [0, 0, 1, 1], [], []>} : vector<8x32xf32>, vector<32x32xf32>, vector<8x32xf32> -> vector<8x32xf32>
    %239 = vector.broadcast %159 : vector<1x32xf32> to vector<8x32xf32>
    %240 = arith.addf %238, %239 : vector<8x32xf32>
    %241 = arith.addf %143, %240 : vector<8x32xf32>
    %c0_118 = arith.constant 0 : index
    %c0_119 = arith.constant 0 : index
    %c0_120 = arith.constant 0 : index
    %242 = vector.load %arg24[%c0_118, %c0_119, %c0_120] : memref<3x1x32xf32, #tpu.memory_space<vmem>>, vector<1x1x32xf32>
    %243 = vector.shape_cast %242 : vector<1x1x32xf32> to vector<1x32xf32>
    %c0_121 = arith.constant 0 : index
    %c0_122 = arith.constant 0 : index
    %c0_123 = arith.constant 0 : index
    %244 = vector.load %arg25[%c0_121, %c0_122, %c0_123] : memref<3x1x32xf32, #tpu.memory_space<vmem>>, vector<1x1x32xf32>
    %245 = vector.shape_cast %244 : vector<1x1x32xf32> to vector<1x32xf32>
    %cst_124 = arith.constant dense<0.000000e+00> : vector<8xf32>
    %246 = vector.multi_reduction <add>, %241, %cst_124 [1] : vector<8x32xf32> to vector<8xf32>
    %247 = vector.shape_cast %246 : vector<8xf32> to vector<8x1xf32>
    %cst_125 = arith.constant 3.200000e+01 : f32
    %248 = vector.broadcast %cst_125 : f32 to vector<8x1xf32>
    %249 = arith.divf %247, %248 : vector<8x1xf32>
    %250 = vector.broadcast %249 : vector<8x1xf32> to vector<8x32xf32>
    %251 = arith.subf %241, %250 : vector<8x32xf32>
    %252 = vector.broadcast %249 : vector<8x1xf32> to vector<8x32xf32>
    %253 = arith.subf %241, %252 : vector<8x32xf32>
    %254 = arith.mulf %251, %253 : vector<8x32xf32>
    %cst_126 = arith.constant dense<0.000000e+00> : vector<8xf32>
    %255 = vector.multi_reduction <add>, %254, %cst_126 [1] : vector<8x32xf32> to vector<8xf32>
    %256 = vector.shape_cast %255 : vector<8xf32> to vector<8x1xf32>
    %cst_127 = arith.constant 3.200000e+01 : f32
    %257 = vector.broadcast %cst_127 : f32 to vector<8x1xf32>
    %258 = arith.divf %256, %257 : vector<8x1xf32>
    %259 = vector.broadcast %249 : vector<8x1xf32> to vector<8x32xf32>
    %260 = arith.subf %241, %259 : vector<8x32xf32>
    %cst_128 = arith.constant 9.99999974E-6 : f32
    %261 = vector.broadcast %cst_128 : f32 to vector<8x1xf32>
    %262 = arith.addf %258, %261 : vector<8x1xf32>
    %263 = math.rsqrt %262 : vector<8x1xf32>
    %264 = vector.broadcast %263 : vector<8x1xf32> to vector<8x32xf32>
    %265 = arith.mulf %260, %264 : vector<8x32xf32>
    %266 = vector.broadcast %243 : vector<1x32xf32> to vector<8x32xf32>
    %267 = arith.mulf %265, %266 : vector<8x32xf32>
    %268 = vector.broadcast %245 : vector<1x32xf32> to vector<8x32xf32>
    %269 = arith.addf %267, %268 : vector<8x32xf32>
    %c0_129 = arith.constant 0 : index
    %c0_130 = arith.constant 0 : index
    %c0_131 = arith.constant 0 : index
    %270 = vector.load %arg26[%c0_129, %c0_130, %c0_131] : memref<3x32x128xf32, #tpu.memory_space<vmem>>, vector<1x32x128xf32>
    %271 = vector.shape_cast %270 : vector<1x32x128xf32> to vector<32x128xf32>
    %cst_132 = arith.constant dense<0.000000e+00> : vector<8x128xf32>
    %272 = tpu.matmul %269, %271, %cst_132 {dimension_numbers = #tpu.dot_dimension_numbers<[1], [0], [0], [1], [0, 0, 1, 1], [], []>} : vector<8x32xf32>, vector<32x128xf32>, vector<8x128xf32> -> vector<8x128xf32>
    %c0_133 = arith.constant 0 : index
    %c0_134 = arith.constant 0 : index
    %c0_135 = arith.constant 0 : index
    %273 = vector.load %arg27[%c0_133, %c0_134, %c0_135] : memref<3x1x128xf32, #tpu.memory_space<vmem>>, vector<1x1x128xf32>
    %274 = vector.shape_cast %273 : vector<1x1x128xf32> to vector<1x128xf32>
    %275 = vector.broadcast %274 : vector<1x128xf32> to vector<8x128xf32>
    %276 = arith.addf %272, %275 : vector<8x128xf32>
    %cst_136 = arith.constant 0.000000e+00 : f32
    %277 = vector.broadcast %cst_136 : f32 to vector<8x128xf32>
    %278 = arith.maximumf %276, %277 : vector<8x128xf32>
    %c0_137 = arith.constant 0 : index
    %c0_138 = arith.constant 0 : index
    %c0_139 = arith.constant 0 : index
    %279 = vector.load %arg28[%c0_137, %c0_138, %c0_139] : memref<3x128x32xf32, #tpu.memory_space<vmem>>, vector<1x128x32xf32>
    %280 = vector.shape_cast %279 : vector<1x128x32xf32> to vector<128x32xf32>
    %cst_140 = arith.constant dense<0.000000e+00> : vector<8x32xf32>
    %281 = tpu.matmul %278, %280, %cst_140 {dimension_numbers = #tpu.dot_dimension_numbers<[1], [0], [0], [1], [0, 0, 1, 1], [], []>} : vector<8x128xf32>, vector<128x32xf32>, vector<8x32xf32> -> vector<8x32xf32>
    %c0_141 = arith.constant 0 : index
    %c0_142 = arith.constant 0 : index
    %c0_143 = arith.constant 0 : index
    %282 = vector.load %arg29[%c0_141, %c0_142, %c0_143] : memref<3x1x32xf32, #tpu.memory_space<vmem>>, vector<1x1x32xf32>
    %283 = vector.shape_cast %282 : vector<1x1x32xf32> to vector<1x32xf32>
    %284 = vector.broadcast %283 : vector<1x32xf32> to vector<8x32xf32>
    %285 = arith.addf %281, %284 : vector<8x32xf32>
    %286 = arith.addf %269, %285 : vector<8x32xf32>
    %c0_144 = arith.constant 0 : index
    %c0_145 = arith.constant 0 : index
    %c0_146 = arith.constant 0 : index
    %287 = vector.load %arg30[%c0_144, %c0_145, %c0_146] : memref<3x1x32xf32, #tpu.memory_space<vmem>>, vector<1x1x32xf32>
    %288 = vector.shape_cast %287 : vector<1x1x32xf32> to vector<1x32xf32>
    %c0_147 = arith.constant 0 : index
    %c0_148 = arith.constant 0 : index
    %c0_149 = arith.constant 0 : index
    %289 = vector.load %arg31[%c0_147, %c0_148, %c0_149] : memref<3x1x32xf32, #tpu.memory_space<vmem>>, vector<1x1x32xf32>
    %290 = vector.shape_cast %289 : vector<1x1x32xf32> to vector<1x32xf32>
    %cst_150 = arith.constant dense<0.000000e+00> : vector<8xf32>
    %291 = vector.multi_reduction <add>, %286, %cst_150 [1] : vector<8x32xf32> to vector<8xf32>
    %292 = vector.shape_cast %291 : vector<8xf32> to vector<8x1xf32>
    %cst_151 = arith.constant 3.200000e+01 : f32
    %293 = vector.broadcast %cst_151 : f32 to vector<8x1xf32>
    %294 = arith.divf %292, %293 : vector<8x1xf32>
    %295 = vector.broadcast %294 : vector<8x1xf32> to vector<8x32xf32>
    %296 = arith.subf %286, %295 : vector<8x32xf32>
    %297 = vector.broadcast %294 : vector<8x1xf32> to vector<8x32xf32>
    %298 = arith.subf %286, %297 : vector<8x32xf32>
    %299 = arith.mulf %296, %298 : vector<8x32xf32>
    %cst_152 = arith.constant dense<0.000000e+00> : vector<8xf32>
    %300 = vector.multi_reduction <add>, %299, %cst_152 [1] : vector<8x32xf32> to vector<8xf32>
    %301 = vector.shape_cast %300 : vector<8xf32> to vector<8x1xf32>
    %cst_153 = arith.constant 3.200000e+01 : f32
    %302 = vector.broadcast %cst_153 : f32 to vector<8x1xf32>
    %303 = arith.divf %301, %302 : vector<8x1xf32>
    %304 = vector.broadcast %294 : vector<8x1xf32> to vector<8x32xf32>
    %305 = arith.subf %286, %304 : vector<8x32xf32>
    %cst_154 = arith.constant 9.99999974E-6 : f32
    %306 = vector.broadcast %cst_154 : f32 to vector<8x1xf32>
    %307 = arith.addf %303, %306 : vector<8x1xf32>
    %308 = math.rsqrt %307 : vector<8x1xf32>
    %309 = vector.broadcast %308 : vector<8x1xf32> to vector<8x32xf32>
    %310 = arith.mulf %305, %309 : vector<8x32xf32>
    %311 = vector.broadcast %288 : vector<1x32xf32> to vector<8x32xf32>
    %312 = arith.mulf %310, %311 : vector<8x32xf32>
    %313 = vector.broadcast %290 : vector<1x32xf32> to vector<8x32xf32>
    %314 = arith.addf %312, %313 : vector<8x32xf32>
    %c1 = arith.constant 1 : index
    %c0_155 = arith.constant 0 : index
    %c0_156 = arith.constant 0 : index
    %315 = vector.load %arg6[%c1, %c0_155, %c0_156] : memref<3x32x32xf32, #tpu.memory_space<vmem>>, vector<1x32x32xf32>
    %316 = vector.shape_cast %315 : vector<1x32x32xf32> to vector<32x32xf32>
    %c1_157 = arith.constant 1 : index
    %c0_158 = arith.constant 0 : index
    %c0_159 = arith.constant 0 : index
    %317 = vector.load %arg7[%c1_157, %c0_158, %c0_159] : memref<3x32x32xf32, #tpu.memory_space<vmem>>, vector<1x32x32xf32>
    %318 = vector.shape_cast %317 : vector<1x32x32xf32> to vector<32x32xf32>
    %c1_160 = arith.constant 1 : index
    %c0_161 = arith.constant 0 : index
    %c0_162 = arith.constant 0 : index
    %319 = vector.load %arg8[%c1_160, %c0_161, %c0_162] : memref<3x32x32xf32, #tpu.memory_space<vmem>>, vector<1x32x32xf32>
    %320 = vector.shape_cast %319 : vector<1x32x32xf32> to vector<32x32xf32>
    %c1_163 = arith.constant 1 : index
    %c0_164 = arith.constant 0 : index
    %c0_165 = arith.constant 0 : index
    %321 = vector.load %arg9[%c1_163, %c0_164, %c0_165] : memref<3x32x32xf32, #tpu.memory_space<vmem>>, vector<1x32x32xf32>
    %322 = vector.shape_cast %321 : vector<1x32x32xf32> to vector<32x32xf32>
    %c1_166 = arith.constant 1 : index
    %c0_167 = arith.constant 0 : index
    %c0_168 = arith.constant 0 : index
    %323 = vector.load %arg10[%c1_166, %c0_167, %c0_168] : memref<3x1x32xf32, #tpu.memory_space<vmem>>, vector<1x1x32xf32>
    %324 = vector.shape_cast %323 : vector<1x1x32xf32> to vector<1x32xf32>
    %c1_169 = arith.constant 1 : index
    %c0_170 = arith.constant 0 : index
    %c0_171 = arith.constant 0 : index
    %325 = vector.load %arg11[%c1_169, %c0_170, %c0_171] : memref<3x1x32xf32, #tpu.memory_space<vmem>>, vector<1x1x32xf32>
    %326 = vector.shape_cast %325 : vector<1x1x32xf32> to vector<1x32xf32>
    %c1_172 = arith.constant 1 : index
    %c0_173 = arith.constant 0 : index
    %c0_174 = arith.constant 0 : index
    %327 = vector.load %arg12[%c1_172, %c0_173, %c0_174] : memref<3x1x32xf32, #tpu.memory_space<vmem>>, vector<1x1x32xf32>
    %328 = vector.shape_cast %327 : vector<1x1x32xf32> to vector<1x32xf32>
    %c1_175 = arith.constant 1 : index
    %c0_176 = arith.constant 0 : index
    %c0_177 = arith.constant 0 : index
    %329 = vector.load %arg13[%c1_175, %c0_176, %c0_177] : memref<3x1x32xf32, #tpu.memory_space<vmem>>, vector<1x1x32xf32>
    %330 = vector.shape_cast %329 : vector<1x1x32xf32> to vector<1x32xf32>
    %cst_178 = arith.constant dense<0.000000e+00> : vector<8x32xf32>
    %331 = tpu.matmul %314, %316, %cst_178 {dimension_numbers = #tpu.dot_dimension_numbers<[1], [0], [0], [1], [0, 0, 1, 1], [], []>} : vector<8x32xf32>, vector<32x32xf32>, vector<8x32xf32> -> vector<8x32xf32>
    %332 = vector.broadcast %324 : vector<1x32xf32> to vector<8x32xf32>
    %333 = arith.addf %331, %332 : vector<8x32xf32>
    %cst_179 = arith.constant dense<0.000000e+00> : vector<8x32xf32>
    %334 = tpu.matmul %314, %318, %cst_179 {dimension_numbers = #tpu.dot_dimension_numbers<[1], [0], [0], [1], [0, 0, 1, 1], [], []>} : vector<8x32xf32>, vector<32x32xf32>, vector<8x32xf32> -> vector<8x32xf32>
    %335 = vector.broadcast %326 : vector<1x32xf32> to vector<8x32xf32>
    %336 = arith.addf %334, %335 : vector<8x32xf32>
    %cst_180 = arith.constant dense<0.000000e+00> : vector<8x32xf32>
    %337 = tpu.matmul %314, %320, %cst_180 {dimension_numbers = #tpu.dot_dimension_numbers<[1], [0], [0], [1], [0, 0, 1, 1], [], []>} : vector<8x32xf32>, vector<32x32xf32>, vector<8x32xf32> -> vector<8x32xf32>
    %338 = vector.broadcast %328 : vector<1x32xf32> to vector<8x32xf32>
    %339 = arith.addf %337, %338 : vector<8x32xf32>
    %340 = vector.extract_strided_slice %333 {offsets = [0, 0], sizes = [8, 8], strides = [1, 1]} : vector<8x32xf32> to vector<8x8xf32>
    %341 = vector.extract_strided_slice %336 {offsets = [0, 0], sizes = [8, 8], strides = [1, 1]} : vector<8x32xf32> to vector<8x8xf32>
    %cst_181 = arith.constant dense<0.000000e+00> : vector<8x8xf32>
    %342 = tpu.matmul %340, %341, %cst_181 {dimension_numbers = #tpu.dot_dimension_numbers<[1], [1], [0], [0], [0, 0, 1, 0], [], []>} : vector<8x8xf32>, vector<8x8xf32>, vector<8x8xf32> -> vector<8x8xf32>
    %cst_182 = arith.constant 0.353553385 : f32
    %343 = vector.broadcast %cst_182 : f32 to vector<8x8xf32>
    %344 = arith.mulf %342, %343 : vector<8x8xf32>
    %345 = arith.addf %344, %0 : vector<8x8xf32>
    %cst_183 = arith.constant dense<0xFF800000> : vector<8xf32>
    %346 = vector.multi_reduction <maximumf>, %345, %cst_183 [1] : vector<8x8xf32> to vector<8xf32>
    %347 = vector.shape_cast %346 : vector<8xf32> to vector<8x1xf32>
    %348 = vector.broadcast %347 : vector<8x1xf32> to vector<8x8xf32>
    %349 = arith.subf %345, %348 : vector<8x8xf32>
    %350 = math.exp %349 : vector<8x8xf32>
    %cst_184 = arith.constant dense<0.000000e+00> : vector<8xf32>
    %351 = vector.multi_reduction <add>, %350, %cst_184 [1] : vector<8x8xf32> to vector<8xf32>
    %352 = vector.shape_cast %351 : vector<8xf32> to vector<8x1xf32>
    %353 = tpu.reciprocal %352 {approx = true} : vector<8x1xf32> -> vector<8x1xf32>
    %354 = vector.broadcast %353 : vector<8x1xf32> to vector<8x8xf32>
    %355 = arith.mulf %350, %354 : vector<8x8xf32>
    %356 = vector.extract_strided_slice %339 {offsets = [0, 0], sizes = [8, 8], strides = [1, 1]} : vector<8x32xf32> to vector<8x8xf32>
    %cst_185 = arith.constant dense<0.000000e+00> : vector<8x8xf32>
    %357 = tpu.matmul %355, %356, %cst_185 {dimension_numbers = #tpu.dot_dimension_numbers<[1], [0], [0], [1], [0, 0, 1, 1], [], []>} : vector<8x8xf32>, vector<8x8xf32>, vector<8x8xf32> -> vector<8x8xf32>
    %358 = vector.extract_strided_slice %333 {offsets = [0, 8], sizes = [8, 8], strides = [1, 1]} : vector<8x32xf32> to vector<8x8xf32>
    %359 = vector.extract_strided_slice %336 {offsets = [0, 8], sizes = [8, 8], strides = [1, 1]} : vector<8x32xf32> to vector<8x8xf32>
    %cst_186 = arith.constant dense<0.000000e+00> : vector<8x8xf32>
    %360 = tpu.matmul %358, %359, %cst_186 {dimension_numbers = #tpu.dot_dimension_numbers<[1], [1], [0], [0], [0, 0, 1, 0], [], []>} : vector<8x8xf32>, vector<8x8xf32>, vector<8x8xf32> -> vector<8x8xf32>
    %cst_187 = arith.constant 0.353553385 : f32
    %361 = vector.broadcast %cst_187 : f32 to vector<8x8xf32>
    %362 = arith.mulf %360, %361 : vector<8x8xf32>
    %363 = arith.addf %362, %0 : vector<8x8xf32>
    %cst_188 = arith.constant dense<0xFF800000> : vector<8xf32>
    %364 = vector.multi_reduction <maximumf>, %363, %cst_188 [1] : vector<8x8xf32> to vector<8xf32>
    %365 = vector.shape_cast %364 : vector<8xf32> to vector<8x1xf32>
    %366 = vector.broadcast %365 : vector<8x1xf32> to vector<8x8xf32>
    %367 = arith.subf %363, %366 : vector<8x8xf32>
    %368 = math.exp %367 : vector<8x8xf32>
    %cst_189 = arith.constant dense<0.000000e+00> : vector<8xf32>
    %369 = vector.multi_reduction <add>, %368, %cst_189 [1] : vector<8x8xf32> to vector<8xf32>
    %370 = vector.shape_cast %369 : vector<8xf32> to vector<8x1xf32>
    %371 = tpu.reciprocal %370 {approx = true} : vector<8x1xf32> -> vector<8x1xf32>
    %372 = vector.broadcast %371 : vector<8x1xf32> to vector<8x8xf32>
    %373 = arith.mulf %368, %372 : vector<8x8xf32>
    %374 = vector.extract_strided_slice %339 {offsets = [0, 8], sizes = [8, 8], strides = [1, 1]} : vector<8x32xf32> to vector<8x8xf32>
    %cst_190 = arith.constant dense<0.000000e+00> : vector<8x8xf32>
    %375 = tpu.matmul %373, %374, %cst_190 {dimension_numbers = #tpu.dot_dimension_numbers<[1], [0], [0], [1], [0, 0, 1, 1], [], []>} : vector<8x8xf32>, vector<8x8xf32>, vector<8x8xf32> -> vector<8x8xf32>
    %376 = vector.extract_strided_slice %333 {offsets = [0, 16], sizes = [8, 8], strides = [1, 1]} : vector<8x32xf32> to vector<8x8xf32>
    %377 = vector.extract_strided_slice %336 {offsets = [0, 16], sizes = [8, 8], strides = [1, 1]} : vector<8x32xf32> to vector<8x8xf32>
    %cst_191 = arith.constant dense<0.000000e+00> : vector<8x8xf32>
    %378 = tpu.matmul %376, %377, %cst_191 {dimension_numbers = #tpu.dot_dimension_numbers<[1], [1], [0], [0], [0, 0, 1, 0], [], []>} : vector<8x8xf32>, vector<8x8xf32>, vector<8x8xf32> -> vector<8x8xf32>
    %cst_192 = arith.constant 0.353553385 : f32
    %379 = vector.broadcast %cst_192 : f32 to vector<8x8xf32>
    %380 = arith.mulf %378, %379 : vector<8x8xf32>
    %381 = arith.addf %380, %0 : vector<8x8xf32>
    %cst_193 = arith.constant dense<0xFF800000> : vector<8xf32>
    %382 = vector.multi_reduction <maximumf>, %381, %cst_193 [1] : vector<8x8xf32> to vector<8xf32>
    %383 = vector.shape_cast %382 : vector<8xf32> to vector<8x1xf32>
    %384 = vector.broadcast %383 : vector<8x1xf32> to vector<8x8xf32>
    %385 = arith.subf %381, %384 : vector<8x8xf32>
    %386 = math.exp %385 : vector<8x8xf32>
    %cst_194 = arith.constant dense<0.000000e+00> : vector<8xf32>
    %387 = vector.multi_reduction <add>, %386, %cst_194 [1] : vector<8x8xf32> to vector<8xf32>
    %388 = vector.shape_cast %387 : vector<8xf32> to vector<8x1xf32>
    %389 = tpu.reciprocal %388 {approx = true} : vector<8x1xf32> -> vector<8x1xf32>
    %390 = vector.broadcast %389 : vector<8x1xf32> to vector<8x8xf32>
    %391 = arith.mulf %386, %390 : vector<8x8xf32>
    %392 = vector.extract_strided_slice %339 {offsets = [0, 16], sizes = [8, 8], strides = [1, 1]} : vector<8x32xf32> to vector<8x8xf32>
    %cst_195 = arith.constant dense<0.000000e+00> : vector<8x8xf32>
    %393 = tpu.matmul %391, %392, %cst_195 {dimension_numbers = #tpu.dot_dimension_numbers<[1], [0], [0], [1], [0, 0, 1, 1], [], []>} : vector<8x8xf32>, vector<8x8xf32>, vector<8x8xf32> -> vector<8x8xf32>
    %394 = vector.extract_strided_slice %333 {offsets = [0, 24], sizes = [8, 8], strides = [1, 1]} : vector<8x32xf32> to vector<8x8xf32>
    %395 = vector.extract_strided_slice %336 {offsets = [0, 24], sizes = [8, 8], strides = [1, 1]} : vector<8x32xf32> to vector<8x8xf32>
    %cst_196 = arith.constant dense<0.000000e+00> : vector<8x8xf32>
    %396 = tpu.matmul %394, %395, %cst_196 {dimension_numbers = #tpu.dot_dimension_numbers<[1], [1], [0], [0], [0, 0, 1, 0], [], []>} : vector<8x8xf32>, vector<8x8xf32>, vector<8x8xf32> -> vector<8x8xf32>
    %cst_197 = arith.constant 0.353553385 : f32
    %397 = vector.broadcast %cst_197 : f32 to vector<8x8xf32>
    %398 = arith.mulf %396, %397 : vector<8x8xf32>
    %399 = arith.addf %398, %0 : vector<8x8xf32>
    %cst_198 = arith.constant dense<0xFF800000> : vector<8xf32>
    %400 = vector.multi_reduction <maximumf>, %399, %cst_198 [1] : vector<8x8xf32> to vector<8xf32>
    %401 = vector.shape_cast %400 : vector<8xf32> to vector<8x1xf32>
    %402 = vector.broadcast %401 : vector<8x1xf32> to vector<8x8xf32>
    %403 = arith.subf %399, %402 : vector<8x8xf32>
    %404 = math.exp %403 : vector<8x8xf32>
    %cst_199 = arith.constant dense<0.000000e+00> : vector<8xf32>
    %405 = vector.multi_reduction <add>, %404, %cst_199 [1] : vector<8x8xf32> to vector<8xf32>
    %406 = vector.shape_cast %405 : vector<8xf32> to vector<8x1xf32>
    %407 = tpu.reciprocal %406 {approx = true} : vector<8x1xf32> -> vector<8x1xf32>
    %408 = vector.broadcast %407 : vector<8x1xf32> to vector<8x8xf32>
    %409 = arith.mulf %404, %408 : vector<8x8xf32>
    %410 = vector.extract_strided_slice %339 {offsets = [0, 24], sizes = [8, 8], strides = [1, 1]} : vector<8x32xf32> to vector<8x8xf32>
    %cst_200 = arith.constant dense<0.000000e+00> : vector<8x8xf32>
    %411 = tpu.matmul %409, %410, %cst_200 {dimension_numbers = #tpu.dot_dimension_numbers<[1], [0], [0], [1], [0, 0, 1, 1], [], []>} : vector<8x8xf32>, vector<8x8xf32>, vector<8x8xf32> -> vector<8x8xf32>
    %412 = tpu.concatenate %357, %375, %393, %411 in 1 : vector<8x8xf32>, vector<8x8xf32>, vector<8x8xf32>, vector<8x8xf32> -> vector<8x32xf32>
    %cst_201 = arith.constant dense<0.000000e+00> : vector<8x32xf32>
    %413 = tpu.matmul %412, %322, %cst_201 {dimension_numbers = #tpu.dot_dimension_numbers<[1], [0], [0], [1], [0, 0, 1, 1], [], []>} : vector<8x32xf32>, vector<32x32xf32>, vector<8x32xf32> -> vector<8x32xf32>
    %414 = vector.broadcast %330 : vector<1x32xf32> to vector<8x32xf32>
    %415 = arith.addf %413, %414 : vector<8x32xf32>
    %416 = arith.addf %314, %415 : vector<8x32xf32>
    %c1_202 = arith.constant 1 : index
    %c0_203 = arith.constant 0 : index
    %c0_204 = arith.constant 0 : index
    %417 = vector.load %arg14[%c1_202, %c0_203, %c0_204] : memref<3x1x32xf32, #tpu.memory_space<vmem>>, vector<1x1x32xf32>
    %418 = vector.shape_cast %417 : vector<1x1x32xf32> to vector<1x32xf32>
    %c1_205 = arith.constant 1 : index
    %c0_206 = arith.constant 0 : index
    %c0_207 = arith.constant 0 : index
    %419 = vector.load %arg15[%c1_205, %c0_206, %c0_207] : memref<3x1x32xf32, #tpu.memory_space<vmem>>, vector<1x1x32xf32>
    %420 = vector.shape_cast %419 : vector<1x1x32xf32> to vector<1x32xf32>
    %cst_208 = arith.constant dense<0.000000e+00> : vector<8xf32>
    %421 = vector.multi_reduction <add>, %416, %cst_208 [1] : vector<8x32xf32> to vector<8xf32>
    %422 = vector.shape_cast %421 : vector<8xf32> to vector<8x1xf32>
    %cst_209 = arith.constant 3.200000e+01 : f32
    %423 = vector.broadcast %cst_209 : f32 to vector<8x1xf32>
    %424 = arith.divf %422, %423 : vector<8x1xf32>
    %425 = vector.broadcast %424 : vector<8x1xf32> to vector<8x32xf32>
    %426 = arith.subf %416, %425 : vector<8x32xf32>
    %427 = vector.broadcast %424 : vector<8x1xf32> to vector<8x32xf32>
    %428 = arith.subf %416, %427 : vector<8x32xf32>
    %429 = arith.mulf %426, %428 : vector<8x32xf32>
    %cst_210 = arith.constant dense<0.000000e+00> : vector<8xf32>
    %430 = vector.multi_reduction <add>, %429, %cst_210 [1] : vector<8x32xf32> to vector<8xf32>
    %431 = vector.shape_cast %430 : vector<8xf32> to vector<8x1xf32>
    %cst_211 = arith.constant 3.200000e+01 : f32
    %432 = vector.broadcast %cst_211 : f32 to vector<8x1xf32>
    %433 = arith.divf %431, %432 : vector<8x1xf32>
    %434 = vector.broadcast %424 : vector<8x1xf32> to vector<8x32xf32>
    %435 = arith.subf %416, %434 : vector<8x32xf32>
    %cst_212 = arith.constant 9.99999974E-6 : f32
    %436 = vector.broadcast %cst_212 : f32 to vector<8x1xf32>
    %437 = arith.addf %433, %436 : vector<8x1xf32>
    %438 = math.rsqrt %437 : vector<8x1xf32>
    %439 = vector.broadcast %438 : vector<8x1xf32> to vector<8x32xf32>
    %440 = arith.mulf %435, %439 : vector<8x32xf32>
    %441 = vector.broadcast %418 : vector<1x32xf32> to vector<8x32xf32>
    %442 = arith.mulf %440, %441 : vector<8x32xf32>
    %443 = vector.broadcast %420 : vector<1x32xf32> to vector<8x32xf32>
    %444 = arith.addf %442, %443 : vector<8x32xf32>
    %c1_213 = arith.constant 1 : index
    %c0_214 = arith.constant 0 : index
    %c0_215 = arith.constant 0 : index
    %445 = vector.load %arg16[%c1_213, %c0_214, %c0_215] : memref<3x32x32xf32, #tpu.memory_space<vmem>>, vector<1x32x32xf32>
    %446 = vector.shape_cast %445 : vector<1x32x32xf32> to vector<32x32xf32>
    %c1_216 = arith.constant 1 : index
    %c0_217 = arith.constant 0 : index
    %c0_218 = arith.constant 0 : index
    %447 = vector.load %arg17[%c1_216, %c0_217, %c0_218] : memref<3x32x32xf32, #tpu.memory_space<vmem>>, vector<1x32x32xf32>
    %448 = vector.shape_cast %447 : vector<1x32x32xf32> to vector<32x32xf32>
    %c1_219 = arith.constant 1 : index
    %c0_220 = arith.constant 0 : index
    %c0_221 = arith.constant 0 : index
    %449 = vector.load %arg18[%c1_219, %c0_220, %c0_221] : memref<3x32x32xf32, #tpu.memory_space<vmem>>, vector<1x32x32xf32>
    %450 = vector.shape_cast %449 : vector<1x32x32xf32> to vector<32x32xf32>
    %c1_222 = arith.constant 1 : index
    %c0_223 = arith.constant 0 : index
    %c0_224 = arith.constant 0 : index
    %451 = vector.load %arg19[%c1_222, %c0_223, %c0_224] : memref<3x32x32xf32, #tpu.memory_space<vmem>>, vector<1x32x32xf32>
    %452 = vector.shape_cast %451 : vector<1x32x32xf32> to vector<32x32xf32>
    %c1_225 = arith.constant 1 : index
    %c0_226 = arith.constant 0 : index
    %c0_227 = arith.constant 0 : index
    %453 = vector.load %arg20[%c1_225, %c0_226, %c0_227] : memref<3x1x32xf32, #tpu.memory_space<vmem>>, vector<1x1x32xf32>
    %454 = vector.shape_cast %453 : vector<1x1x32xf32> to vector<1x32xf32>
    %c1_228 = arith.constant 1 : index
    %c0_229 = arith.constant 0 : index
    %c0_230 = arith.constant 0 : index
    %455 = vector.load %arg21[%c1_228, %c0_229, %c0_230] : memref<3x1x32xf32, #tpu.memory_space<vmem>>, vector<1x1x32xf32>
    %456 = vector.shape_cast %455 : vector<1x1x32xf32> to vector<1x32xf32>
    %c1_231 = arith.constant 1 : index
    %c0_232 = arith.constant 0 : index
    %c0_233 = arith.constant 0 : index
    %457 = vector.load %arg22[%c1_231, %c0_232, %c0_233] : memref<3x1x32xf32, #tpu.memory_space<vmem>>, vector<1x1x32xf32>
    %458 = vector.shape_cast %457 : vector<1x1x32xf32> to vector<1x32xf32>
    %c1_234 = arith.constant 1 : index
    %c0_235 = arith.constant 0 : index
    %c0_236 = arith.constant 0 : index
    %459 = vector.load %arg23[%c1_234, %c0_235, %c0_236] : memref<3x1x32xf32, #tpu.memory_space<vmem>>, vector<1x1x32xf32>
    %460 = vector.shape_cast %459 : vector<1x1x32xf32> to vector<1x32xf32>
    %cst_237 = arith.constant dense<0.000000e+00> : vector<8x32xf32>
    %461 = tpu.matmul %444, %446, %cst_237 {dimension_numbers = #tpu.dot_dimension_numbers<[1], [0], [0], [1], [0, 0, 1, 1], [], []>} : vector<8x32xf32>, vector<32x32xf32>, vector<8x32xf32> -> vector<8x32xf32>
    %462 = vector.broadcast %454 : vector<1x32xf32> to vector<8x32xf32>
    %463 = arith.addf %461, %462 : vector<8x32xf32>
    %cst_238 = arith.constant dense<0.000000e+00> : vector<8x32xf32>
    %464 = tpu.matmul %2, %448, %cst_238 {dimension_numbers = #tpu.dot_dimension_numbers<[1], [0], [0], [1], [0, 0, 1, 1], [], []>} : vector<8x32xf32>, vector<32x32xf32>, vector<8x32xf32> -> vector<8x32xf32>
    %465 = vector.broadcast %456 : vector<1x32xf32> to vector<8x32xf32>
    %466 = arith.addf %464, %465 : vector<8x32xf32>
    %cst_239 = arith.constant dense<0.000000e+00> : vector<8x32xf32>
    %467 = tpu.matmul %2, %450, %cst_239 {dimension_numbers = #tpu.dot_dimension_numbers<[1], [0], [0], [1], [0, 0, 1, 1], [], []>} : vector<8x32xf32>, vector<32x32xf32>, vector<8x32xf32> -> vector<8x32xf32>
    %468 = vector.broadcast %458 : vector<1x32xf32> to vector<8x32xf32>
    %469 = arith.addf %467, %468 : vector<8x32xf32>
    %470 = vector.extract_strided_slice %463 {offsets = [0, 0], sizes = [8, 8], strides = [1, 1]} : vector<8x32xf32> to vector<8x8xf32>
    %471 = vector.extract_strided_slice %466 {offsets = [0, 0], sizes = [8, 8], strides = [1, 1]} : vector<8x32xf32> to vector<8x8xf32>
    %cst_240 = arith.constant dense<0.000000e+00> : vector<8x8xf32>
    %472 = tpu.matmul %470, %471, %cst_240 {dimension_numbers = #tpu.dot_dimension_numbers<[1], [1], [0], [0], [0, 0, 1, 0], [], []>} : vector<8x8xf32>, vector<8x8xf32>, vector<8x8xf32> -> vector<8x8xf32>
    %cst_241 = arith.constant 0.353553385 : f32
    %473 = vector.broadcast %cst_241 : f32 to vector<8x8xf32>
    %474 = arith.mulf %472, %473 : vector<8x8xf32>
    %cst_242 = arith.constant dense<0xFF800000> : vector<8xf32>
    %475 = vector.multi_reduction <maximumf>, %474, %cst_242 [1] : vector<8x8xf32> to vector<8xf32>
    %476 = vector.shape_cast %475 : vector<8xf32> to vector<8x1xf32>
    %477 = vector.broadcast %476 : vector<8x1xf32> to vector<8x8xf32>
    %478 = arith.subf %474, %477 : vector<8x8xf32>
    %479 = math.exp %478 : vector<8x8xf32>
    %cst_243 = arith.constant dense<0.000000e+00> : vector<8xf32>
    %480 = vector.multi_reduction <add>, %479, %cst_243 [1] : vector<8x8xf32> to vector<8xf32>
    %481 = vector.shape_cast %480 : vector<8xf32> to vector<8x1xf32>
    %482 = tpu.reciprocal %481 {approx = true} : vector<8x1xf32> -> vector<8x1xf32>
    %483 = vector.broadcast %482 : vector<8x1xf32> to vector<8x8xf32>
    %484 = arith.mulf %479, %483 : vector<8x8xf32>
    %485 = vector.extract_strided_slice %469 {offsets = [0, 0], sizes = [8, 8], strides = [1, 1]} : vector<8x32xf32> to vector<8x8xf32>
    %cst_244 = arith.constant dense<0.000000e+00> : vector<8x8xf32>
    %486 = tpu.matmul %484, %485, %cst_244 {dimension_numbers = #tpu.dot_dimension_numbers<[1], [0], [0], [1], [0, 0, 1, 1], [], []>} : vector<8x8xf32>, vector<8x8xf32>, vector<8x8xf32> -> vector<8x8xf32>
    %487 = vector.extract_strided_slice %463 {offsets = [0, 8], sizes = [8, 8], strides = [1, 1]} : vector<8x32xf32> to vector<8x8xf32>
    %488 = vector.extract_strided_slice %466 {offsets = [0, 8], sizes = [8, 8], strides = [1, 1]} : vector<8x32xf32> to vector<8x8xf32>
    %cst_245 = arith.constant dense<0.000000e+00> : vector<8x8xf32>
    %489 = tpu.matmul %487, %488, %cst_245 {dimension_numbers = #tpu.dot_dimension_numbers<[1], [1], [0], [0], [0, 0, 1, 0], [], []>} : vector<8x8xf32>, vector<8x8xf32>, vector<8x8xf32> -> vector<8x8xf32>
    %cst_246 = arith.constant 0.353553385 : f32
    %490 = vector.broadcast %cst_246 : f32 to vector<8x8xf32>
    %491 = arith.mulf %489, %490 : vector<8x8xf32>
    %cst_247 = arith.constant dense<0xFF800000> : vector<8xf32>
    %492 = vector.multi_reduction <maximumf>, %491, %cst_247 [1] : vector<8x8xf32> to vector<8xf32>
    %493 = vector.shape_cast %492 : vector<8xf32> to vector<8x1xf32>
    %494 = vector.broadcast %493 : vector<8x1xf32> to vector<8x8xf32>
    %495 = arith.subf %491, %494 : vector<8x8xf32>
    %496 = math.exp %495 : vector<8x8xf32>
    %cst_248 = arith.constant dense<0.000000e+00> : vector<8xf32>
    %497 = vector.multi_reduction <add>, %496, %cst_248 [1] : vector<8x8xf32> to vector<8xf32>
    %498 = vector.shape_cast %497 : vector<8xf32> to vector<8x1xf32>
    %499 = tpu.reciprocal %498 {approx = true} : vector<8x1xf32> -> vector<8x1xf32>
    %500 = vector.broadcast %499 : vector<8x1xf32> to vector<8x8xf32>
    %501 = arith.mulf %496, %500 : vector<8x8xf32>
    %502 = vector.extract_strided_slice %469 {offsets = [0, 8], sizes = [8, 8], strides = [1, 1]} : vector<8x32xf32> to vector<8x8xf32>
    %cst_249 = arith.constant dense<0.000000e+00> : vector<8x8xf32>
    %503 = tpu.matmul %501, %502, %cst_249 {dimension_numbers = #tpu.dot_dimension_numbers<[1], [0], [0], [1], [0, 0, 1, 1], [], []>} : vector<8x8xf32>, vector<8x8xf32>, vector<8x8xf32> -> vector<8x8xf32>
    %504 = vector.extract_strided_slice %463 {offsets = [0, 16], sizes = [8, 8], strides = [1, 1]} : vector<8x32xf32> to vector<8x8xf32>
    %505 = vector.extract_strided_slice %466 {offsets = [0, 16], sizes = [8, 8], strides = [1, 1]} : vector<8x32xf32> to vector<8x8xf32>
    %cst_250 = arith.constant dense<0.000000e+00> : vector<8x8xf32>
    %506 = tpu.matmul %504, %505, %cst_250 {dimension_numbers = #tpu.dot_dimension_numbers<[1], [1], [0], [0], [0, 0, 1, 0], [], []>} : vector<8x8xf32>, vector<8x8xf32>, vector<8x8xf32> -> vector<8x8xf32>
    %cst_251 = arith.constant 0.353553385 : f32
    %507 = vector.broadcast %cst_251 : f32 to vector<8x8xf32>
    %508 = arith.mulf %506, %507 : vector<8x8xf32>
    %cst_252 = arith.constant dense<0xFF800000> : vector<8xf32>
    %509 = vector.multi_reduction <maximumf>, %508, %cst_252 [1] : vector<8x8xf32> to vector<8xf32>
    %510 = vector.shape_cast %509 : vector<8xf32> to vector<8x1xf32>
    %511 = vector.broadcast %510 : vector<8x1xf32> to vector<8x8xf32>
    %512 = arith.subf %508, %511 : vector<8x8xf32>
    %513 = math.exp %512 : vector<8x8xf32>
    %cst_253 = arith.constant dense<0.000000e+00> : vector<8xf32>
    %514 = vector.multi_reduction <add>, %513, %cst_253 [1] : vector<8x8xf32> to vector<8xf32>
    %515 = vector.shape_cast %514 : vector<8xf32> to vector<8x1xf32>
    %516 = tpu.reciprocal %515 {approx = true} : vector<8x1xf32> -> vector<8x1xf32>
    %517 = vector.broadcast %516 : vector<8x1xf32> to vector<8x8xf32>
    %518 = arith.mulf %513, %517 : vector<8x8xf32>
    %519 = vector.extract_strided_slice %469 {offsets = [0, 16], sizes = [8, 8], strides = [1, 1]} : vector<8x32xf32> to vector<8x8xf32>
    %cst_254 = arith.constant dense<0.000000e+00> : vector<8x8xf32>
    %520 = tpu.matmul %518, %519, %cst_254 {dimension_numbers = #tpu.dot_dimension_numbers<[1], [0], [0], [1], [0, 0, 1, 1], [], []>} : vector<8x8xf32>, vector<8x8xf32>, vector<8x8xf32> -> vector<8x8xf32>
    %521 = vector.extract_strided_slice %463 {offsets = [0, 24], sizes = [8, 8], strides = [1, 1]} : vector<8x32xf32> to vector<8x8xf32>
    %522 = vector.extract_strided_slice %466 {offsets = [0, 24], sizes = [8, 8], strides = [1, 1]} : vector<8x32xf32> to vector<8x8xf32>
    %cst_255 = arith.constant dense<0.000000e+00> : vector<8x8xf32>
    %523 = tpu.matmul %521, %522, %cst_255 {dimension_numbers = #tpu.dot_dimension_numbers<[1], [1], [0], [0], [0, 0, 1, 0], [], []>} : vector<8x8xf32>, vector<8x8xf32>, vector<8x8xf32> -> vector<8x8xf32>
    %cst_256 = arith.constant 0.353553385 : f32
    %524 = vector.broadcast %cst_256 : f32 to vector<8x8xf32>
    %525 = arith.mulf %523, %524 : vector<8x8xf32>
    %cst_257 = arith.constant dense<0xFF800000> : vector<8xf32>
    %526 = vector.multi_reduction <maximumf>, %525, %cst_257 [1] : vector<8x8xf32> to vector<8xf32>
    %527 = vector.shape_cast %526 : vector<8xf32> to vector<8x1xf32>
    %528 = vector.broadcast %527 : vector<8x1xf32> to vector<8x8xf32>
    %529 = arith.subf %525, %528 : vector<8x8xf32>
    %530 = math.exp %529 : vector<8x8xf32>
    %cst_258 = arith.constant dense<0.000000e+00> : vector<8xf32>
    %531 = vector.multi_reduction <add>, %530, %cst_258 [1] : vector<8x8xf32> to vector<8xf32>
    %532 = vector.shape_cast %531 : vector<8xf32> to vector<8x1xf32>
    %533 = tpu.reciprocal %532 {approx = true} : vector<8x1xf32> -> vector<8x1xf32>
    %534 = vector.broadcast %533 : vector<8x1xf32> to vector<8x8xf32>
    %535 = arith.mulf %530, %534 : vector<8x8xf32>
    %536 = vector.extract_strided_slice %469 {offsets = [0, 24], sizes = [8, 8], strides = [1, 1]} : vector<8x32xf32> to vector<8x8xf32>
    %cst_259 = arith.constant dense<0.000000e+00> : vector<8x8xf32>
    %537 = tpu.matmul %535, %536, %cst_259 {dimension_numbers = #tpu.dot_dimension_numbers<[1], [0], [0], [1], [0, 0, 1, 1], [], []>} : vector<8x8xf32>, vector<8x8xf32>, vector<8x8xf32> -> vector<8x8xf32>
    %538 = tpu.concatenate %486, %503, %520, %537 in 1 : vector<8x8xf32>, vector<8x8xf32>, vector<8x8xf32>, vector<8x8xf32> -> vector<8x32xf32>
    %cst_260 = arith.constant dense<0.000000e+00> : vector<8x32xf32>
    %539 = tpu.matmul %538, %452, %cst_260 {dimension_numbers = #tpu.dot_dimension_numbers<[1], [0], [0], [1], [0, 0, 1, 1], [], []>} : vector<8x32xf32>, vector<32x32xf32>, vector<8x32xf32> -> vector<8x32xf32>
    %540 = vector.broadcast %460 : vector<1x32xf32> to vector<8x32xf32>
    %541 = arith.addf %539, %540 : vector<8x32xf32>
    %542 = arith.addf %444, %541 : vector<8x32xf32>
    %c1_261 = arith.constant 1 : index
    %c0_262 = arith.constant 0 : index
    %c0_263 = arith.constant 0 : index
    %543 = vector.load %arg24[%c1_261, %c0_262, %c0_263] : memref<3x1x32xf32, #tpu.memory_space<vmem>>, vector<1x1x32xf32>
    %544 = vector.shape_cast %543 : vector<1x1x32xf32> to vector<1x32xf32>
    %c1_264 = arith.constant 1 : index
    %c0_265 = arith.constant 0 : index
    %c0_266 = arith.constant 0 : index
    %545 = vector.load %arg25[%c1_264, %c0_265, %c0_266] : memref<3x1x32xf32, #tpu.memory_space<vmem>>, vector<1x1x32xf32>
    %546 = vector.shape_cast %545 : vector<1x1x32xf32> to vector<1x32xf32>
    %cst_267 = arith.constant dense<0.000000e+00> : vector<8xf32>
    %547 = vector.multi_reduction <add>, %542, %cst_267 [1] : vector<8x32xf32> to vector<8xf32>
    %548 = vector.shape_cast %547 : vector<8xf32> to vector<8x1xf32>
    %cst_268 = arith.constant 3.200000e+01 : f32
    %549 = vector.broadcast %cst_268 : f32 to vector<8x1xf32>
    %550 = arith.divf %548, %549 : vector<8x1xf32>
    %551 = vector.broadcast %550 : vector<8x1xf32> to vector<8x32xf32>
    %552 = arith.subf %542, %551 : vector<8x32xf32>
    %553 = vector.broadcast %550 : vector<8x1xf32> to vector<8x32xf32>
    %554 = arith.subf %542, %553 : vector<8x32xf32>
    %555 = arith.mulf %552, %554 : vector<8x32xf32>
    %cst_269 = arith.constant dense<0.000000e+00> : vector<8xf32>
    %556 = vector.multi_reduction <add>, %555, %cst_269 [1] : vector<8x32xf32> to vector<8xf32>
    %557 = vector.shape_cast %556 : vector<8xf32> to vector<8x1xf32>
    %cst_270 = arith.constant 3.200000e+01 : f32
    %558 = vector.broadcast %cst_270 : f32 to vector<8x1xf32>
    %559 = arith.divf %557, %558 : vector<8x1xf32>
    %560 = vector.broadcast %550 : vector<8x1xf32> to vector<8x32xf32>
    %561 = arith.subf %542, %560 : vector<8x32xf32>
    %cst_271 = arith.constant 9.99999974E-6 : f32
    %562 = vector.broadcast %cst_271 : f32 to vector<8x1xf32>
    %563 = arith.addf %559, %562 : vector<8x1xf32>
    %564 = math.rsqrt %563 : vector<8x1xf32>
    %565 = vector.broadcast %564 : vector<8x1xf32> to vector<8x32xf32>
    %566 = arith.mulf %561, %565 : vector<8x32xf32>
    %567 = vector.broadcast %544 : vector<1x32xf32> to vector<8x32xf32>
    %568 = arith.mulf %566, %567 : vector<8x32xf32>
    %569 = vector.broadcast %546 : vector<1x32xf32> to vector<8x32xf32>
    %570 = arith.addf %568, %569 : vector<8x32xf32>
    %c1_272 = arith.constant 1 : index
    %c0_273 = arith.constant 0 : index
    %c0_274 = arith.constant 0 : index
    %571 = vector.load %arg26[%c1_272, %c0_273, %c0_274] : memref<3x32x128xf32, #tpu.memory_space<vmem>>, vector<1x32x128xf32>
    %572 = vector.shape_cast %571 : vector<1x32x128xf32> to vector<32x128xf32>
    %cst_275 = arith.constant dense<0.000000e+00> : vector<8x128xf32>
    %573 = tpu.matmul %570, %572, %cst_275 {dimension_numbers = #tpu.dot_dimension_numbers<[1], [0], [0], [1], [0, 0, 1, 1], [], []>} : vector<8x32xf32>, vector<32x128xf32>, vector<8x128xf32> -> vector<8x128xf32>
    %c1_276 = arith.constant 1 : index
    %c0_277 = arith.constant 0 : index
    %c0_278 = arith.constant 0 : index
    %574 = vector.load %arg27[%c1_276, %c0_277, %c0_278] : memref<3x1x128xf32, #tpu.memory_space<vmem>>, vector<1x1x128xf32>
    %575 = vector.shape_cast %574 : vector<1x1x128xf32> to vector<1x128xf32>
    %576 = vector.broadcast %575 : vector<1x128xf32> to vector<8x128xf32>
    %577 = arith.addf %573, %576 : vector<8x128xf32>
    %cst_279 = arith.constant 0.000000e+00 : f32
    %578 = vector.broadcast %cst_279 : f32 to vector<8x128xf32>
    %579 = arith.maximumf %577, %578 : vector<8x128xf32>
    %c1_280 = arith.constant 1 : index
    %c0_281 = arith.constant 0 : index
    %c0_282 = arith.constant 0 : index
    %580 = vector.load %arg28[%c1_280, %c0_281, %c0_282] : memref<3x128x32xf32, #tpu.memory_space<vmem>>, vector<1x128x32xf32>
    %581 = vector.shape_cast %580 : vector<1x128x32xf32> to vector<128x32xf32>
    %cst_283 = arith.constant dense<0.000000e+00> : vector<8x32xf32>
    %582 = tpu.matmul %579, %581, %cst_283 {dimension_numbers = #tpu.dot_dimension_numbers<[1], [0], [0], [1], [0, 0, 1, 1], [], []>} : vector<8x128xf32>, vector<128x32xf32>, vector<8x32xf32> -> vector<8x32xf32>
    %c1_284 = arith.constant 1 : index
    %c0_285 = arith.constant 0 : index
    %c0_286 = arith.constant 0 : index
    %583 = vector.load %arg29[%c1_284, %c0_285, %c0_286] : memref<3x1x32xf32, #tpu.memory_space<vmem>>, vector<1x1x32xf32>
    %584 = vector.shape_cast %583 : vector<1x1x32xf32> to vector<1x32xf32>
    %585 = vector.broadcast %584 : vector<1x32xf32> to vector<8x32xf32>
    %586 = arith.addf %582, %585 : vector<8x32xf32>
    %587 = arith.addf %570, %586 : vector<8x32xf32>
    %c1_287 = arith.constant 1 : index
    %c0_288 = arith.constant 0 : index
    %c0_289 = arith.constant 0 : index
    %588 = vector.load %arg30[%c1_287, %c0_288, %c0_289] : memref<3x1x32xf32, #tpu.memory_space<vmem>>, vector<1x1x32xf32>
    %589 = vector.shape_cast %588 : vector<1x1x32xf32> to vector<1x32xf32>
    %c1_290 = arith.constant 1 : index
    %c0_291 = arith.constant 0 : index
    %c0_292 = arith.constant 0 : index
    %590 = vector.load %arg31[%c1_290, %c0_291, %c0_292] : memref<3x1x32xf32, #tpu.memory_space<vmem>>, vector<1x1x32xf32>
    %591 = vector.shape_cast %590 : vector<1x1x32xf32> to vector<1x32xf32>
    %cst_293 = arith.constant dense<0.000000e+00> : vector<8xf32>
    %592 = vector.multi_reduction <add>, %587, %cst_293 [1] : vector<8x32xf32> to vector<8xf32>
    %593 = vector.shape_cast %592 : vector<8xf32> to vector<8x1xf32>
    %cst_294 = arith.constant 3.200000e+01 : f32
    %594 = vector.broadcast %cst_294 : f32 to vector<8x1xf32>
    %595 = arith.divf %593, %594 : vector<8x1xf32>
    %596 = vector.broadcast %595 : vector<8x1xf32> to vector<8x32xf32>
    %597 = arith.subf %587, %596 : vector<8x32xf32>
    %598 = vector.broadcast %595 : vector<8x1xf32> to vector<8x32xf32>
    %599 = arith.subf %587, %598 : vector<8x32xf32>
    %600 = arith.mulf %597, %599 : vector<8x32xf32>
    %cst_295 = arith.constant dense<0.000000e+00> : vector<8xf32>
    %601 = vector.multi_reduction <add>, %600, %cst_295 [1] : vector<8x32xf32> to vector<8xf32>
    %602 = vector.shape_cast %601 : vector<8xf32> to vector<8x1xf32>
    %cst_296 = arith.constant 3.200000e+01 : f32
    %603 = vector.broadcast %cst_296 : f32 to vector<8x1xf32>
    %604 = arith.divf %602, %603 : vector<8x1xf32>
    %605 = vector.broadcast %595 : vector<8x1xf32> to vector<8x32xf32>
    %606 = arith.subf %587, %605 : vector<8x32xf32>
    %cst_297 = arith.constant 9.99999974E-6 : f32
    %607 = vector.broadcast %cst_297 : f32 to vector<8x1xf32>
    %608 = arith.addf %604, %607 : vector<8x1xf32>
    %609 = math.rsqrt %608 : vector<8x1xf32>
    %610 = vector.broadcast %609 : vector<8x1xf32> to vector<8x32xf32>
    %611 = arith.mulf %606, %610 : vector<8x32xf32>
    %612 = vector.broadcast %589 : vector<1x32xf32> to vector<8x32xf32>
    %613 = arith.mulf %611, %612 : vector<8x32xf32>
    %614 = vector.broadcast %591 : vector<1x32xf32> to vector<8x32xf32>
    %615 = arith.addf %613, %614 : vector<8x32xf32>
    %c2 = arith.constant 2 : index
    %c0_298 = arith.constant 0 : index
    %c0_299 = arith.constant 0 : index
    %616 = vector.load %arg6[%c2, %c0_298, %c0_299] : memref<3x32x32xf32, #tpu.memory_space<vmem>>, vector<1x32x32xf32>
    %617 = vector.shape_cast %616 : vector<1x32x32xf32> to vector<32x32xf32>
    %c2_300 = arith.constant 2 : index
    %c0_301 = arith.constant 0 : index
    %c0_302 = arith.constant 0 : index
    %618 = vector.load %arg7[%c2_300, %c0_301, %c0_302] : memref<3x32x32xf32, #tpu.memory_space<vmem>>, vector<1x32x32xf32>
    %619 = vector.shape_cast %618 : vector<1x32x32xf32> to vector<32x32xf32>
    %c2_303 = arith.constant 2 : index
    %c0_304 = arith.constant 0 : index
    %c0_305 = arith.constant 0 : index
    %620 = vector.load %arg8[%c2_303, %c0_304, %c0_305] : memref<3x32x32xf32, #tpu.memory_space<vmem>>, vector<1x32x32xf32>
    %621 = vector.shape_cast %620 : vector<1x32x32xf32> to vector<32x32xf32>
    %c2_306 = arith.constant 2 : index
    %c0_307 = arith.constant 0 : index
    %c0_308 = arith.constant 0 : index
    %622 = vector.load %arg9[%c2_306, %c0_307, %c0_308] : memref<3x32x32xf32, #tpu.memory_space<vmem>>, vector<1x32x32xf32>
    %623 = vector.shape_cast %622 : vector<1x32x32xf32> to vector<32x32xf32>
    %c2_309 = arith.constant 2 : index
    %c0_310 = arith.constant 0 : index
    %c0_311 = arith.constant 0 : index
    %624 = vector.load %arg10[%c2_309, %c0_310, %c0_311] : memref<3x1x32xf32, #tpu.memory_space<vmem>>, vector<1x1x32xf32>
    %625 = vector.shape_cast %624 : vector<1x1x32xf32> to vector<1x32xf32>
    %c2_312 = arith.constant 2 : index
    %c0_313 = arith.constant 0 : index
    %c0_314 = arith.constant 0 : index
    %626 = vector.load %arg11[%c2_312, %c0_313, %c0_314] : memref<3x1x32xf32, #tpu.memory_space<vmem>>, vector<1x1x32xf32>
    %627 = vector.shape_cast %626 : vector<1x1x32xf32> to vector<1x32xf32>
    %c2_315 = arith.constant 2 : index
    %c0_316 = arith.constant 0 : index
    %c0_317 = arith.constant 0 : index
    %628 = vector.load %arg12[%c2_315, %c0_316, %c0_317] : memref<3x1x32xf32, #tpu.memory_space<vmem>>, vector<1x1x32xf32>
    %629 = vector.shape_cast %628 : vector<1x1x32xf32> to vector<1x32xf32>
    %c2_318 = arith.constant 2 : index
    %c0_319 = arith.constant 0 : index
    %c0_320 = arith.constant 0 : index
    %630 = vector.load %arg13[%c2_318, %c0_319, %c0_320] : memref<3x1x32xf32, #tpu.memory_space<vmem>>, vector<1x1x32xf32>
    %631 = vector.shape_cast %630 : vector<1x1x32xf32> to vector<1x32xf32>
    %cst_321 = arith.constant dense<0.000000e+00> : vector<8x32xf32>
    %632 = tpu.matmul %615, %617, %cst_321 {dimension_numbers = #tpu.dot_dimension_numbers<[1], [0], [0], [1], [0, 0, 1, 1], [], []>} : vector<8x32xf32>, vector<32x32xf32>, vector<8x32xf32> -> vector<8x32xf32>
    %633 = vector.broadcast %625 : vector<1x32xf32> to vector<8x32xf32>
    %634 = arith.addf %632, %633 : vector<8x32xf32>
    %cst_322 = arith.constant dense<0.000000e+00> : vector<8x32xf32>
    %635 = tpu.matmul %615, %619, %cst_322 {dimension_numbers = #tpu.dot_dimension_numbers<[1], [0], [0], [1], [0, 0, 1, 1], [], []>} : vector<8x32xf32>, vector<32x32xf32>, vector<8x32xf32> -> vector<8x32xf32>
    %636 = vector.broadcast %627 : vector<1x32xf32> to vector<8x32xf32>
    %637 = arith.addf %635, %636 : vector<8x32xf32>
    %cst_323 = arith.constant dense<0.000000e+00> : vector<8x32xf32>
    %638 = tpu.matmul %615, %621, %cst_323 {dimension_numbers = #tpu.dot_dimension_numbers<[1], [0], [0], [1], [0, 0, 1, 1], [], []>} : vector<8x32xf32>, vector<32x32xf32>, vector<8x32xf32> -> vector<8x32xf32>
    %639 = vector.broadcast %629 : vector<1x32xf32> to vector<8x32xf32>
    %640 = arith.addf %638, %639 : vector<8x32xf32>
    %641 = vector.extract_strided_slice %634 {offsets = [0, 0], sizes = [8, 8], strides = [1, 1]} : vector<8x32xf32> to vector<8x8xf32>
    %642 = vector.extract_strided_slice %637 {offsets = [0, 0], sizes = [8, 8], strides = [1, 1]} : vector<8x32xf32> to vector<8x8xf32>
    %cst_324 = arith.constant dense<0.000000e+00> : vector<8x8xf32>
    %643 = tpu.matmul %641, %642, %cst_324 {dimension_numbers = #tpu.dot_dimension_numbers<[1], [1], [0], [0], [0, 0, 1, 0], [], []>} : vector<8x8xf32>, vector<8x8xf32>, vector<8x8xf32> -> vector<8x8xf32>
    %cst_325 = arith.constant 0.353553385 : f32
    %644 = vector.broadcast %cst_325 : f32 to vector<8x8xf32>
    %645 = arith.mulf %643, %644 : vector<8x8xf32>
    %646 = arith.addf %645, %0 : vector<8x8xf32>
    %cst_326 = arith.constant dense<0xFF800000> : vector<8xf32>
    %647 = vector.multi_reduction <maximumf>, %646, %cst_326 [1] : vector<8x8xf32> to vector<8xf32>
    %648 = vector.shape_cast %647 : vector<8xf32> to vector<8x1xf32>
    %649 = vector.broadcast %648 : vector<8x1xf32> to vector<8x8xf32>
    %650 = arith.subf %646, %649 : vector<8x8xf32>
    %651 = math.exp %650 : vector<8x8xf32>
    %cst_327 = arith.constant dense<0.000000e+00> : vector<8xf32>
    %652 = vector.multi_reduction <add>, %651, %cst_327 [1] : vector<8x8xf32> to vector<8xf32>
    %653 = vector.shape_cast %652 : vector<8xf32> to vector<8x1xf32>
    %654 = tpu.reciprocal %653 {approx = true} : vector<8x1xf32> -> vector<8x1xf32>
    %655 = vector.broadcast %654 : vector<8x1xf32> to vector<8x8xf32>
    %656 = arith.mulf %651, %655 : vector<8x8xf32>
    %657 = vector.extract_strided_slice %640 {offsets = [0, 0], sizes = [8, 8], strides = [1, 1]} : vector<8x32xf32> to vector<8x8xf32>
    %cst_328 = arith.constant dense<0.000000e+00> : vector<8x8xf32>
    %658 = tpu.matmul %656, %657, %cst_328 {dimension_numbers = #tpu.dot_dimension_numbers<[1], [0], [0], [1], [0, 0, 1, 1], [], []>} : vector<8x8xf32>, vector<8x8xf32>, vector<8x8xf32> -> vector<8x8xf32>
    %659 = vector.extract_strided_slice %634 {offsets = [0, 8], sizes = [8, 8], strides = [1, 1]} : vector<8x32xf32> to vector<8x8xf32>
    %660 = vector.extract_strided_slice %637 {offsets = [0, 8], sizes = [8, 8], strides = [1, 1]} : vector<8x32xf32> to vector<8x8xf32>
    %cst_329 = arith.constant dense<0.000000e+00> : vector<8x8xf32>
    %661 = tpu.matmul %659, %660, %cst_329 {dimension_numbers = #tpu.dot_dimension_numbers<[1], [1], [0], [0], [0, 0, 1, 0], [], []>} : vector<8x8xf32>, vector<8x8xf32>, vector<8x8xf32> -> vector<8x8xf32>
    %cst_330 = arith.constant 0.353553385 : f32
    %662 = vector.broadcast %cst_330 : f32 to vector<8x8xf32>
    %663 = arith.mulf %661, %662 : vector<8x8xf32>
    %664 = arith.addf %663, %0 : vector<8x8xf32>
    %cst_331 = arith.constant dense<0xFF800000> : vector<8xf32>
    %665 = vector.multi_reduction <maximumf>, %664, %cst_331 [1] : vector<8x8xf32> to vector<8xf32>
    %666 = vector.shape_cast %665 : vector<8xf32> to vector<8x1xf32>
    %667 = vector.broadcast %666 : vector<8x1xf32> to vector<8x8xf32>
    %668 = arith.subf %664, %667 : vector<8x8xf32>
    %669 = math.exp %668 : vector<8x8xf32>
    %cst_332 = arith.constant dense<0.000000e+00> : vector<8xf32>
    %670 = vector.multi_reduction <add>, %669, %cst_332 [1] : vector<8x8xf32> to vector<8xf32>
    %671 = vector.shape_cast %670 : vector<8xf32> to vector<8x1xf32>
    %672 = tpu.reciprocal %671 {approx = true} : vector<8x1xf32> -> vector<8x1xf32>
    %673 = vector.broadcast %672 : vector<8x1xf32> to vector<8x8xf32>
    %674 = arith.mulf %669, %673 : vector<8x8xf32>
    %675 = vector.extract_strided_slice %640 {offsets = [0, 8], sizes = [8, 8], strides = [1, 1]} : vector<8x32xf32> to vector<8x8xf32>
    %cst_333 = arith.constant dense<0.000000e+00> : vector<8x8xf32>
    %676 = tpu.matmul %674, %675, %cst_333 {dimension_numbers = #tpu.dot_dimension_numbers<[1], [0], [0], [1], [0, 0, 1, 1], [], []>} : vector<8x8xf32>, vector<8x8xf32>, vector<8x8xf32> -> vector<8x8xf32>
    %677 = vector.extract_strided_slice %634 {offsets = [0, 16], sizes = [8, 8], strides = [1, 1]} : vector<8x32xf32> to vector<8x8xf32>
    %678 = vector.extract_strided_slice %637 {offsets = [0, 16], sizes = [8, 8], strides = [1, 1]} : vector<8x32xf32> to vector<8x8xf32>
    %cst_334 = arith.constant dense<0.000000e+00> : vector<8x8xf32>
    %679 = tpu.matmul %677, %678, %cst_334 {dimension_numbers = #tpu.dot_dimension_numbers<[1], [1], [0], [0], [0, 0, 1, 0], [], []>} : vector<8x8xf32>, vector<8x8xf32>, vector<8x8xf32> -> vector<8x8xf32>
    %cst_335 = arith.constant 0.353553385 : f32
    %680 = vector.broadcast %cst_335 : f32 to vector<8x8xf32>
    %681 = arith.mulf %679, %680 : vector<8x8xf32>
    %682 = arith.addf %681, %0 : vector<8x8xf32>
    %cst_336 = arith.constant dense<0xFF800000> : vector<8xf32>
    %683 = vector.multi_reduction <maximumf>, %682, %cst_336 [1] : vector<8x8xf32> to vector<8xf32>
    %684 = vector.shape_cast %683 : vector<8xf32> to vector<8x1xf32>
    %685 = vector.broadcast %684 : vector<8x1xf32> to vector<8x8xf32>
    %686 = arith.subf %682, %685 : vector<8x8xf32>
    %687 = math.exp %686 : vector<8x8xf32>
    %cst_337 = arith.constant dense<0.000000e+00> : vector<8xf32>
    %688 = vector.multi_reduction <add>, %687, %cst_337 [1] : vector<8x8xf32> to vector<8xf32>
    %689 = vector.shape_cast %688 : vector<8xf32> to vector<8x1xf32>
    %690 = tpu.reciprocal %689 {approx = true} : vector<8x1xf32> -> vector<8x1xf32>
    %691 = vector.broadcast %690 : vector<8x1xf32> to vector<8x8xf32>
    %692 = arith.mulf %687, %691 : vector<8x8xf32>
    %693 = vector.extract_strided_slice %640 {offsets = [0, 16], sizes = [8, 8], strides = [1, 1]} : vector<8x32xf32> to vector<8x8xf32>
    %cst_338 = arith.constant dense<0.000000e+00> : vector<8x8xf32>
    %694 = tpu.matmul %692, %693, %cst_338 {dimension_numbers = #tpu.dot_dimension_numbers<[1], [0], [0], [1], [0, 0, 1, 1], [], []>} : vector<8x8xf32>, vector<8x8xf32>, vector<8x8xf32> -> vector<8x8xf32>
    %695 = vector.extract_strided_slice %634 {offsets = [0, 24], sizes = [8, 8], strides = [1, 1]} : vector<8x32xf32> to vector<8x8xf32>
    %696 = vector.extract_strided_slice %637 {offsets = [0, 24], sizes = [8, 8], strides = [1, 1]} : vector<8x32xf32> to vector<8x8xf32>
    %cst_339 = arith.constant dense<0.000000e+00> : vector<8x8xf32>
    %697 = tpu.matmul %695, %696, %cst_339 {dimension_numbers = #tpu.dot_dimension_numbers<[1], [1], [0], [0], [0, 0, 1, 0], [], []>} : vector<8x8xf32>, vector<8x8xf32>, vector<8x8xf32> -> vector<8x8xf32>
    %cst_340 = arith.constant 0.353553385 : f32
    %698 = vector.broadcast %cst_340 : f32 to vector<8x8xf32>
    %699 = arith.mulf %697, %698 : vector<8x8xf32>
    %700 = arith.addf %699, %0 : vector<8x8xf32>
    %cst_341 = arith.constant dense<0xFF800000> : vector<8xf32>
    %701 = vector.multi_reduction <maximumf>, %700, %cst_341 [1] : vector<8x8xf32> to vector<8xf32>
    %702 = vector.shape_cast %701 : vector<8xf32> to vector<8x1xf32>
    %703 = vector.broadcast %702 : vector<8x1xf32> to vector<8x8xf32>
    %704 = arith.subf %700, %703 : vector<8x8xf32>
    %705 = math.exp %704 : vector<8x8xf32>
    %cst_342 = arith.constant dense<0.000000e+00> : vector<8xf32>
    %706 = vector.multi_reduction <add>, %705, %cst_342 [1] : vector<8x8xf32> to vector<8xf32>
    %707 = vector.shape_cast %706 : vector<8xf32> to vector<8x1xf32>
    %708 = tpu.reciprocal %707 {approx = true} : vector<8x1xf32> -> vector<8x1xf32>
    %709 = vector.broadcast %708 : vector<8x1xf32> to vector<8x8xf32>
    %710 = arith.mulf %705, %709 : vector<8x8xf32>
    %711 = vector.extract_strided_slice %640 {offsets = [0, 24], sizes = [8, 8], strides = [1, 1]} : vector<8x32xf32> to vector<8x8xf32>
    %cst_343 = arith.constant dense<0.000000e+00> : vector<8x8xf32>
    %712 = tpu.matmul %710, %711, %cst_343 {dimension_numbers = #tpu.dot_dimension_numbers<[1], [0], [0], [1], [0, 0, 1, 1], [], []>} : vector<8x8xf32>, vector<8x8xf32>, vector<8x8xf32> -> vector<8x8xf32>
    %713 = tpu.concatenate %658, %676, %694, %712 in 1 : vector<8x8xf32>, vector<8x8xf32>, vector<8x8xf32>, vector<8x8xf32> -> vector<8x32xf32>
    %cst_344 = arith.constant dense<0.000000e+00> : vector<8x32xf32>
    %714 = tpu.matmul %713, %623, %cst_344 {dimension_numbers = #tpu.dot_dimension_numbers<[1], [0], [0], [1], [0, 0, 1, 1], [], []>} : vector<8x32xf32>, vector<32x32xf32>, vector<8x32xf32> -> vector<8x32xf32>
    %715 = vector.broadcast %631 : vector<1x32xf32> to vector<8x32xf32>
    %716 = arith.addf %714, %715 : vector<8x32xf32>
    %717 = arith.addf %615, %716 : vector<8x32xf32>
    %c2_345 = arith.constant 2 : index
    %c0_346 = arith.constant 0 : index
    %c0_347 = arith.constant 0 : index
    %718 = vector.load %arg14[%c2_345, %c0_346, %c0_347] : memref<3x1x32xf32, #tpu.memory_space<vmem>>, vector<1x1x32xf32>
    %719 = vector.shape_cast %718 : vector<1x1x32xf32> to vector<1x32xf32>
    %c2_348 = arith.constant 2 : index
    %c0_349 = arith.constant 0 : index
    %c0_350 = arith.constant 0 : index
    %720 = vector.load %arg15[%c2_348, %c0_349, %c0_350] : memref<3x1x32xf32, #tpu.memory_space<vmem>>, vector<1x1x32xf32>
    %721 = vector.shape_cast %720 : vector<1x1x32xf32> to vector<1x32xf32>
    %cst_351 = arith.constant dense<0.000000e+00> : vector<8xf32>
    %722 = vector.multi_reduction <add>, %717, %cst_351 [1] : vector<8x32xf32> to vector<8xf32>
    %723 = vector.shape_cast %722 : vector<8xf32> to vector<8x1xf32>
    %cst_352 = arith.constant 3.200000e+01 : f32
    %724 = vector.broadcast %cst_352 : f32 to vector<8x1xf32>
    %725 = arith.divf %723, %724 : vector<8x1xf32>
    %726 = vector.broadcast %725 : vector<8x1xf32> to vector<8x32xf32>
    %727 = arith.subf %717, %726 : vector<8x32xf32>
    %728 = vector.broadcast %725 : vector<8x1xf32> to vector<8x32xf32>
    %729 = arith.subf %717, %728 : vector<8x32xf32>
    %730 = arith.mulf %727, %729 : vector<8x32xf32>
    %cst_353 = arith.constant dense<0.000000e+00> : vector<8xf32>
    %731 = vector.multi_reduction <add>, %730, %cst_353 [1] : vector<8x32xf32> to vector<8xf32>
    %732 = vector.shape_cast %731 : vector<8xf32> to vector<8x1xf32>
    %cst_354 = arith.constant 3.200000e+01 : f32
    %733 = vector.broadcast %cst_354 : f32 to vector<8x1xf32>
    %734 = arith.divf %732, %733 : vector<8x1xf32>
    %735 = vector.broadcast %725 : vector<8x1xf32> to vector<8x32xf32>
    %736 = arith.subf %717, %735 : vector<8x32xf32>
    %cst_355 = arith.constant 9.99999974E-6 : f32
    %737 = vector.broadcast %cst_355 : f32 to vector<8x1xf32>
    %738 = arith.addf %734, %737 : vector<8x1xf32>
    %739 = math.rsqrt %738 : vector<8x1xf32>
    %740 = vector.broadcast %739 : vector<8x1xf32> to vector<8x32xf32>
    %741 = arith.mulf %736, %740 : vector<8x32xf32>
    %742 = vector.broadcast %719 : vector<1x32xf32> to vector<8x32xf32>
    %743 = arith.mulf %741, %742 : vector<8x32xf32>
    %744 = vector.broadcast %721 : vector<1x32xf32> to vector<8x32xf32>
    %745 = arith.addf %743, %744 : vector<8x32xf32>
    %c2_356 = arith.constant 2 : index
    %c0_357 = arith.constant 0 : index
    %c0_358 = arith.constant 0 : index
    %746 = vector.load %arg16[%c2_356, %c0_357, %c0_358] : memref<3x32x32xf32, #tpu.memory_space<vmem>>, vector<1x32x32xf32>
    %747 = vector.shape_cast %746 : vector<1x32x32xf32> to vector<32x32xf32>
    %c2_359 = arith.constant 2 : index
    %c0_360 = arith.constant 0 : index
    %c0_361 = arith.constant 0 : index
    %748 = vector.load %arg17[%c2_359, %c0_360, %c0_361] : memref<3x32x32xf32, #tpu.memory_space<vmem>>, vector<1x32x32xf32>
    %749 = vector.shape_cast %748 : vector<1x32x32xf32> to vector<32x32xf32>
    %c2_362 = arith.constant 2 : index
    %c0_363 = arith.constant 0 : index
    %c0_364 = arith.constant 0 : index
    %750 = vector.load %arg18[%c2_362, %c0_363, %c0_364] : memref<3x32x32xf32, #tpu.memory_space<vmem>>, vector<1x32x32xf32>
    %751 = vector.shape_cast %750 : vector<1x32x32xf32> to vector<32x32xf32>
    %c2_365 = arith.constant 2 : index
    %c0_366 = arith.constant 0 : index
    %c0_367 = arith.constant 0 : index
    %752 = vector.load %arg19[%c2_365, %c0_366, %c0_367] : memref<3x32x32xf32, #tpu.memory_space<vmem>>, vector<1x32x32xf32>
    %753 = vector.shape_cast %752 : vector<1x32x32xf32> to vector<32x32xf32>
    %c2_368 = arith.constant 2 : index
    %c0_369 = arith.constant 0 : index
    %c0_370 = arith.constant 0 : index
    %754 = vector.load %arg20[%c2_368, %c0_369, %c0_370] : memref<3x1x32xf32, #tpu.memory_space<vmem>>, vector<1x1x32xf32>
    %755 = vector.shape_cast %754 : vector<1x1x32xf32> to vector<1x32xf32>
    %c2_371 = arith.constant 2 : index
    %c0_372 = arith.constant 0 : index
    %c0_373 = arith.constant 0 : index
    %756 = vector.load %arg21[%c2_371, %c0_372, %c0_373] : memref<3x1x32xf32, #tpu.memory_space<vmem>>, vector<1x1x32xf32>
    %757 = vector.shape_cast %756 : vector<1x1x32xf32> to vector<1x32xf32>
    %c2_374 = arith.constant 2 : index
    %c0_375 = arith.constant 0 : index
    %c0_376 = arith.constant 0 : index
    %758 = vector.load %arg22[%c2_374, %c0_375, %c0_376] : memref<3x1x32xf32, #tpu.memory_space<vmem>>, vector<1x1x32xf32>
    %759 = vector.shape_cast %758 : vector<1x1x32xf32> to vector<1x32xf32>
    %c2_377 = arith.constant 2 : index
    %c0_378 = arith.constant 0 : index
    %c0_379 = arith.constant 0 : index
    %760 = vector.load %arg23[%c2_377, %c0_378, %c0_379] : memref<3x1x32xf32, #tpu.memory_space<vmem>>, vector<1x1x32xf32>
    %761 = vector.shape_cast %760 : vector<1x1x32xf32> to vector<1x32xf32>
    %cst_380 = arith.constant dense<0.000000e+00> : vector<8x32xf32>
    %762 = tpu.matmul %745, %747, %cst_380 {dimension_numbers = #tpu.dot_dimension_numbers<[1], [0], [0], [1], [0, 0, 1, 1], [], []>} : vector<8x32xf32>, vector<32x32xf32>, vector<8x32xf32> -> vector<8x32xf32>
    %763 = vector.broadcast %755 : vector<1x32xf32> to vector<8x32xf32>
    %764 = arith.addf %762, %763 : vector<8x32xf32>
    %cst_381 = arith.constant dense<0.000000e+00> : vector<8x32xf32>
    %765 = tpu.matmul %2, %749, %cst_381 {dimension_numbers = #tpu.dot_dimension_numbers<[1], [0], [0], [1], [0, 0, 1, 1], [], []>} : vector<8x32xf32>, vector<32x32xf32>, vector<8x32xf32> -> vector<8x32xf32>
    %766 = vector.broadcast %757 : vector<1x32xf32> to vector<8x32xf32>
    %767 = arith.addf %765, %766 : vector<8x32xf32>
    %cst_382 = arith.constant dense<0.000000e+00> : vector<8x32xf32>
    %768 = tpu.matmul %2, %751, %cst_382 {dimension_numbers = #tpu.dot_dimension_numbers<[1], [0], [0], [1], [0, 0, 1, 1], [], []>} : vector<8x32xf32>, vector<32x32xf32>, vector<8x32xf32> -> vector<8x32xf32>
    %769 = vector.broadcast %759 : vector<1x32xf32> to vector<8x32xf32>
    %770 = arith.addf %768, %769 : vector<8x32xf32>
    %771 = vector.extract_strided_slice %764 {offsets = [0, 0], sizes = [8, 8], strides = [1, 1]} : vector<8x32xf32> to vector<8x8xf32>
    %772 = vector.extract_strided_slice %767 {offsets = [0, 0], sizes = [8, 8], strides = [1, 1]} : vector<8x32xf32> to vector<8x8xf32>
    %cst_383 = arith.constant dense<0.000000e+00> : vector<8x8xf32>
    %773 = tpu.matmul %771, %772, %cst_383 {dimension_numbers = #tpu.dot_dimension_numbers<[1], [1], [0], [0], [0, 0, 1, 0], [], []>} : vector<8x8xf32>, vector<8x8xf32>, vector<8x8xf32> -> vector<8x8xf32>
    %cst_384 = arith.constant 0.353553385 : f32
    %774 = vector.broadcast %cst_384 : f32 to vector<8x8xf32>
    %775 = arith.mulf %773, %774 : vector<8x8xf32>
    %cst_385 = arith.constant dense<0xFF800000> : vector<8xf32>
    %776 = vector.multi_reduction <maximumf>, %775, %cst_385 [1] : vector<8x8xf32> to vector<8xf32>
    %777 = vector.shape_cast %776 : vector<8xf32> to vector<8x1xf32>
    %778 = vector.broadcast %777 : vector<8x1xf32> to vector<8x8xf32>
    %779 = arith.subf %775, %778 : vector<8x8xf32>
    %780 = math.exp %779 : vector<8x8xf32>
    %cst_386 = arith.constant dense<0.000000e+00> : vector<8xf32>
    %781 = vector.multi_reduction <add>, %780, %cst_386 [1] : vector<8x8xf32> to vector<8xf32>
    %782 = vector.shape_cast %781 : vector<8xf32> to vector<8x1xf32>
    %783 = tpu.reciprocal %782 {approx = true} : vector<8x1xf32> -> vector<8x1xf32>
    %784 = vector.broadcast %783 : vector<8x1xf32> to vector<8x8xf32>
    %785 = arith.mulf %780, %784 : vector<8x8xf32>
    %786 = vector.extract_strided_slice %770 {offsets = [0, 0], sizes = [8, 8], strides = [1, 1]} : vector<8x32xf32> to vector<8x8xf32>
    %cst_387 = arith.constant dense<0.000000e+00> : vector<8x8xf32>
    %787 = tpu.matmul %785, %786, %cst_387 {dimension_numbers = #tpu.dot_dimension_numbers<[1], [0], [0], [1], [0, 0, 1, 1], [], []>} : vector<8x8xf32>, vector<8x8xf32>, vector<8x8xf32> -> vector<8x8xf32>
    %788 = vector.extract_strided_slice %764 {offsets = [0, 8], sizes = [8, 8], strides = [1, 1]} : vector<8x32xf32> to vector<8x8xf32>
    %789 = vector.extract_strided_slice %767 {offsets = [0, 8], sizes = [8, 8], strides = [1, 1]} : vector<8x32xf32> to vector<8x8xf32>
    %cst_388 = arith.constant dense<0.000000e+00> : vector<8x8xf32>
    %790 = tpu.matmul %788, %789, %cst_388 {dimension_numbers = #tpu.dot_dimension_numbers<[1], [1], [0], [0], [0, 0, 1, 0], [], []>} : vector<8x8xf32>, vector<8x8xf32>, vector<8x8xf32> -> vector<8x8xf32>
    %cst_389 = arith.constant 0.353553385 : f32
    %791 = vector.broadcast %cst_389 : f32 to vector<8x8xf32>
    %792 = arith.mulf %790, %791 : vector<8x8xf32>
    %cst_390 = arith.constant dense<0xFF800000> : vector<8xf32>
    %793 = vector.multi_reduction <maximumf>, %792, %cst_390 [1] : vector<8x8xf32> to vector<8xf32>
    %794 = vector.shape_cast %793 : vector<8xf32> to vector<8x1xf32>
    %795 = vector.broadcast %794 : vector<8x1xf32> to vector<8x8xf32>
    %796 = arith.subf %792, %795 : vector<8x8xf32>
    %797 = math.exp %796 : vector<8x8xf32>
    %cst_391 = arith.constant dense<0.000000e+00> : vector<8xf32>
    %798 = vector.multi_reduction <add>, %797, %cst_391 [1] : vector<8x8xf32> to vector<8xf32>
    %799 = vector.shape_cast %798 : vector<8xf32> to vector<8x1xf32>
    %800 = tpu.reciprocal %799 {approx = true} : vector<8x1xf32> -> vector<8x1xf32>
    %801 = vector.broadcast %800 : vector<8x1xf32> to vector<8x8xf32>
    %802 = arith.mulf %797, %801 : vector<8x8xf32>
    %803 = vector.extract_strided_slice %770 {offsets = [0, 8], sizes = [8, 8], strides = [1, 1]} : vector<8x32xf32> to vector<8x8xf32>
    %cst_392 = arith.constant dense<0.000000e+00> : vector<8x8xf32>
    %804 = tpu.matmul %802, %803, %cst_392 {dimension_numbers = #tpu.dot_dimension_numbers<[1], [0], [0], [1], [0, 0, 1, 1], [], []>} : vector<8x8xf32>, vector<8x8xf32>, vector<8x8xf32> -> vector<8x8xf32>
    %805 = vector.extract_strided_slice %764 {offsets = [0, 16], sizes = [8, 8], strides = [1, 1]} : vector<8x32xf32> to vector<8x8xf32>
    %806 = vector.extract_strided_slice %767 {offsets = [0, 16], sizes = [8, 8], strides = [1, 1]} : vector<8x32xf32> to vector<8x8xf32>
    %cst_393 = arith.constant dense<0.000000e+00> : vector<8x8xf32>
    %807 = tpu.matmul %805, %806, %cst_393 {dimension_numbers = #tpu.dot_dimension_numbers<[1], [1], [0], [0], [0, 0, 1, 0], [], []>} : vector<8x8xf32>, vector<8x8xf32>, vector<8x8xf32> -> vector<8x8xf32>
    %cst_394 = arith.constant 0.353553385 : f32
    %808 = vector.broadcast %cst_394 : f32 to vector<8x8xf32>
    %809 = arith.mulf %807, %808 : vector<8x8xf32>
    %cst_395 = arith.constant dense<0xFF800000> : vector<8xf32>
    %810 = vector.multi_reduction <maximumf>, %809, %cst_395 [1] : vector<8x8xf32> to vector<8xf32>
    %811 = vector.shape_cast %810 : vector<8xf32> to vector<8x1xf32>
    %812 = vector.broadcast %811 : vector<8x1xf32> to vector<8x8xf32>
    %813 = arith.subf %809, %812 : vector<8x8xf32>
    %814 = math.exp %813 : vector<8x8xf32>
    %cst_396 = arith.constant dense<0.000000e+00> : vector<8xf32>
    %815 = vector.multi_reduction <add>, %814, %cst_396 [1] : vector<8x8xf32> to vector<8xf32>
    %816 = vector.shape_cast %815 : vector<8xf32> to vector<8x1xf32>
    %817 = tpu.reciprocal %816 {approx = true} : vector<8x1xf32> -> vector<8x1xf32>
    %818 = vector.broadcast %817 : vector<8x1xf32> to vector<8x8xf32>
    %819 = arith.mulf %814, %818 : vector<8x8xf32>
    %820 = vector.extract_strided_slice %770 {offsets = [0, 16], sizes = [8, 8], strides = [1, 1]} : vector<8x32xf32> to vector<8x8xf32>
    %cst_397 = arith.constant dense<0.000000e+00> : vector<8x8xf32>
    %821 = tpu.matmul %819, %820, %cst_397 {dimension_numbers = #tpu.dot_dimension_numbers<[1], [0], [0], [1], [0, 0, 1, 1], [], []>} : vector<8x8xf32>, vector<8x8xf32>, vector<8x8xf32> -> vector<8x8xf32>
    %822 = vector.extract_strided_slice %764 {offsets = [0, 24], sizes = [8, 8], strides = [1, 1]} : vector<8x32xf32> to vector<8x8xf32>
    %823 = vector.extract_strided_slice %767 {offsets = [0, 24], sizes = [8, 8], strides = [1, 1]} : vector<8x32xf32> to vector<8x8xf32>
    %cst_398 = arith.constant dense<0.000000e+00> : vector<8x8xf32>
    %824 = tpu.matmul %822, %823, %cst_398 {dimension_numbers = #tpu.dot_dimension_numbers<[1], [1], [0], [0], [0, 0, 1, 0], [], []>} : vector<8x8xf32>, vector<8x8xf32>, vector<8x8xf32> -> vector<8x8xf32>
    %cst_399 = arith.constant 0.353553385 : f32
    %825 = vector.broadcast %cst_399 : f32 to vector<8x8xf32>
    %826 = arith.mulf %824, %825 : vector<8x8xf32>
    %cst_400 = arith.constant dense<0xFF800000> : vector<8xf32>
    %827 = vector.multi_reduction <maximumf>, %826, %cst_400 [1] : vector<8x8xf32> to vector<8xf32>
    %828 = vector.shape_cast %827 : vector<8xf32> to vector<8x1xf32>
    %829 = vector.broadcast %828 : vector<8x1xf32> to vector<8x8xf32>
    %830 = arith.subf %826, %829 : vector<8x8xf32>
    %831 = math.exp %830 : vector<8x8xf32>
    %cst_401 = arith.constant dense<0.000000e+00> : vector<8xf32>
    %832 = vector.multi_reduction <add>, %831, %cst_401 [1] : vector<8x8xf32> to vector<8xf32>
    %833 = vector.shape_cast %832 : vector<8xf32> to vector<8x1xf32>
    %834 = tpu.reciprocal %833 {approx = true} : vector<8x1xf32> -> vector<8x1xf32>
    %835 = vector.broadcast %834 : vector<8x1xf32> to vector<8x8xf32>
    %836 = arith.mulf %831, %835 : vector<8x8xf32>
    %837 = vector.extract_strided_slice %770 {offsets = [0, 24], sizes = [8, 8], strides = [1, 1]} : vector<8x32xf32> to vector<8x8xf32>
    %cst_402 = arith.constant dense<0.000000e+00> : vector<8x8xf32>
    %838 = tpu.matmul %836, %837, %cst_402 {dimension_numbers = #tpu.dot_dimension_numbers<[1], [0], [0], [1], [0, 0, 1, 1], [], []>} : vector<8x8xf32>, vector<8x8xf32>, vector<8x8xf32> -> vector<8x8xf32>
    %839 = tpu.concatenate %787, %804, %821, %838 in 1 : vector<8x8xf32>, vector<8x8xf32>, vector<8x8xf32>, vector<8x8xf32> -> vector<8x32xf32>
    %cst_403 = arith.constant dense<0.000000e+00> : vector<8x32xf32>
    %840 = tpu.matmul %839, %753, %cst_403 {dimension_numbers = #tpu.dot_dimension_numbers<[1], [0], [0], [1], [0, 0, 1, 1], [], []>} : vector<8x32xf32>, vector<32x32xf32>, vector<8x32xf32> -> vector<8x32xf32>
    %841 = vector.broadcast %761 : vector<1x32xf32> to vector<8x32xf32>
    %842 = arith.addf %840, %841 : vector<8x32xf32>
    %843 = arith.addf %745, %842 : vector<8x32xf32>
    %c2_404 = arith.constant 2 : index
    %c0_405 = arith.constant 0 : index
    %c0_406 = arith.constant 0 : index
    %844 = vector.load %arg24[%c2_404, %c0_405, %c0_406] : memref<3x1x32xf32, #tpu.memory_space<vmem>>, vector<1x1x32xf32>
    %845 = vector.shape_cast %844 : vector<1x1x32xf32> to vector<1x32xf32>
    %c2_407 = arith.constant 2 : index
    %c0_408 = arith.constant 0 : index
    %c0_409 = arith.constant 0 : index
    %846 = vector.load %arg25[%c2_407, %c0_408, %c0_409] : memref<3x1x32xf32, #tpu.memory_space<vmem>>, vector<1x1x32xf32>
    %847 = vector.shape_cast %846 : vector<1x1x32xf32> to vector<1x32xf32>
    %cst_410 = arith.constant dense<0.000000e+00> : vector<8xf32>
    %848 = vector.multi_reduction <add>, %843, %cst_410 [1] : vector<8x32xf32> to vector<8xf32>
    %849 = vector.shape_cast %848 : vector<8xf32> to vector<8x1xf32>
    %cst_411 = arith.constant 3.200000e+01 : f32
    %850 = vector.broadcast %cst_411 : f32 to vector<8x1xf32>
    %851 = arith.divf %849, %850 : vector<8x1xf32>
    %852 = vector.broadcast %851 : vector<8x1xf32> to vector<8x32xf32>
    %853 = arith.subf %843, %852 : vector<8x32xf32>
    %854 = vector.broadcast %851 : vector<8x1xf32> to vector<8x32xf32>
    %855 = arith.subf %843, %854 : vector<8x32xf32>
    %856 = arith.mulf %853, %855 : vector<8x32xf32>
    %cst_412 = arith.constant dense<0.000000e+00> : vector<8xf32>
    %857 = vector.multi_reduction <add>, %856, %cst_412 [1] : vector<8x32xf32> to vector<8xf32>
    %858 = vector.shape_cast %857 : vector<8xf32> to vector<8x1xf32>
    %cst_413 = arith.constant 3.200000e+01 : f32
    %859 = vector.broadcast %cst_413 : f32 to vector<8x1xf32>
    %860 = arith.divf %858, %859 : vector<8x1xf32>
    %861 = vector.broadcast %851 : vector<8x1xf32> to vector<8x32xf32>
    %862 = arith.subf %843, %861 : vector<8x32xf32>
    %cst_414 = arith.constant 9.99999974E-6 : f32
    %863 = vector.broadcast %cst_414 : f32 to vector<8x1xf32>
    %864 = arith.addf %860, %863 : vector<8x1xf32>
    %865 = math.rsqrt %864 : vector<8x1xf32>
    %866 = vector.broadcast %865 : vector<8x1xf32> to vector<8x32xf32>
    %867 = arith.mulf %862, %866 : vector<8x32xf32>
    %868 = vector.broadcast %845 : vector<1x32xf32> to vector<8x32xf32>
    %869 = arith.mulf %867, %868 : vector<8x32xf32>
    %870 = vector.broadcast %847 : vector<1x32xf32> to vector<8x32xf32>
    %871 = arith.addf %869, %870 : vector<8x32xf32>
    %c2_415 = arith.constant 2 : index
    %c0_416 = arith.constant 0 : index
    %c0_417 = arith.constant 0 : index
    %872 = vector.load %arg26[%c2_415, %c0_416, %c0_417] : memref<3x32x128xf32, #tpu.memory_space<vmem>>, vector<1x32x128xf32>
    %873 = vector.shape_cast %872 : vector<1x32x128xf32> to vector<32x128xf32>
    %cst_418 = arith.constant dense<0.000000e+00> : vector<8x128xf32>
    %874 = tpu.matmul %871, %873, %cst_418 {dimension_numbers = #tpu.dot_dimension_numbers<[1], [0], [0], [1], [0, 0, 1, 1], [], []>} : vector<8x32xf32>, vector<32x128xf32>, vector<8x128xf32> -> vector<8x128xf32>
    %c2_419 = arith.constant 2 : index
    %c0_420 = arith.constant 0 : index
    %c0_421 = arith.constant 0 : index
    %875 = vector.load %arg27[%c2_419, %c0_420, %c0_421] : memref<3x1x128xf32, #tpu.memory_space<vmem>>, vector<1x1x128xf32>
    %876 = vector.shape_cast %875 : vector<1x1x128xf32> to vector<1x128xf32>
    %877 = vector.broadcast %876 : vector<1x128xf32> to vector<8x128xf32>
    %878 = arith.addf %874, %877 : vector<8x128xf32>
    %cst_422 = arith.constant 0.000000e+00 : f32
    %879 = vector.broadcast %cst_422 : f32 to vector<8x128xf32>
    %880 = arith.maximumf %878, %879 : vector<8x128xf32>
    %c2_423 = arith.constant 2 : index
    %c0_424 = arith.constant 0 : index
    %c0_425 = arith.constant 0 : index
    %881 = vector.load %arg28[%c2_423, %c0_424, %c0_425] : memref<3x128x32xf32, #tpu.memory_space<vmem>>, vector<1x128x32xf32>
    %882 = vector.shape_cast %881 : vector<1x128x32xf32> to vector<128x32xf32>
    %cst_426 = arith.constant dense<0.000000e+00> : vector<8x32xf32>
    %883 = tpu.matmul %880, %882, %cst_426 {dimension_numbers = #tpu.dot_dimension_numbers<[1], [0], [0], [1], [0, 0, 1, 1], [], []>} : vector<8x128xf32>, vector<128x32xf32>, vector<8x32xf32> -> vector<8x32xf32>
    %c2_427 = arith.constant 2 : index
    %c0_428 = arith.constant 0 : index
    %c0_429 = arith.constant 0 : index
    %884 = vector.load %arg29[%c2_427, %c0_428, %c0_429] : memref<3x1x32xf32, #tpu.memory_space<vmem>>, vector<1x1x32xf32>
    %885 = vector.shape_cast %884 : vector<1x1x32xf32> to vector<1x32xf32>
    %886 = vector.broadcast %885 : vector<1x32xf32> to vector<8x32xf32>
    %887 = arith.addf %883, %886 : vector<8x32xf32>
    %888 = arith.addf %871, %887 : vector<8x32xf32>
    %c2_430 = arith.constant 2 : index
    %c0_431 = arith.constant 0 : index
    %c0_432 = arith.constant 0 : index
    %889 = vector.load %arg30[%c2_430, %c0_431, %c0_432] : memref<3x1x32xf32, #tpu.memory_space<vmem>>, vector<1x1x32xf32>
    %890 = vector.shape_cast %889 : vector<1x1x32xf32> to vector<1x32xf32>
    %c2_433 = arith.constant 2 : index
    %c0_434 = arith.constant 0 : index
    %c0_435 = arith.constant 0 : index
    %891 = vector.load %arg31[%c2_433, %c0_434, %c0_435] : memref<3x1x32xf32, #tpu.memory_space<vmem>>, vector<1x1x32xf32>
    %892 = vector.shape_cast %891 : vector<1x1x32xf32> to vector<1x32xf32>
    %cst_436 = arith.constant dense<0.000000e+00> : vector<8xf32>
    %893 = vector.multi_reduction <add>, %888, %cst_436 [1] : vector<8x32xf32> to vector<8xf32>
    %894 = vector.shape_cast %893 : vector<8xf32> to vector<8x1xf32>
    %cst_437 = arith.constant 3.200000e+01 : f32
    %895 = vector.broadcast %cst_437 : f32 to vector<8x1xf32>
    %896 = arith.divf %894, %895 : vector<8x1xf32>
    %897 = vector.broadcast %896 : vector<8x1xf32> to vector<8x32xf32>
    %898 = arith.subf %888, %897 : vector<8x32xf32>
    %899 = vector.broadcast %896 : vector<8x1xf32> to vector<8x32xf32>
    %900 = arith.subf %888, %899 : vector<8x32xf32>
    %901 = arith.mulf %898, %900 : vector<8x32xf32>
    %cst_438 = arith.constant dense<0.000000e+00> : vector<8xf32>
    %902 = vector.multi_reduction <add>, %901, %cst_438 [1] : vector<8x32xf32> to vector<8xf32>
    %903 = vector.shape_cast %902 : vector<8xf32> to vector<8x1xf32>
    %cst_439 = arith.constant 3.200000e+01 : f32
    %904 = vector.broadcast %cst_439 : f32 to vector<8x1xf32>
    %905 = arith.divf %903, %904 : vector<8x1xf32>
    %906 = vector.broadcast %896 : vector<8x1xf32> to vector<8x32xf32>
    %907 = arith.subf %888, %906 : vector<8x32xf32>
    %cst_440 = arith.constant 9.99999974E-6 : f32
    %908 = vector.broadcast %cst_440 : f32 to vector<8x1xf32>
    %909 = arith.addf %905, %908 : vector<8x1xf32>
    %910 = math.rsqrt %909 : vector<8x1xf32>
    %911 = vector.broadcast %910 : vector<8x1xf32> to vector<8x32xf32>
    %912 = arith.mulf %907, %911 : vector<8x32xf32>
    %913 = vector.broadcast %890 : vector<1x32xf32> to vector<8x32xf32>
    %914 = arith.mulf %912, %913 : vector<8x32xf32>
    %915 = vector.broadcast %892 : vector<1x32xf32> to vector<8x32xf32>
    %916 = arith.addf %914, %915 : vector<8x32xf32>
    %c0_441 = arith.constant 0 : index
    %c0_442 = arith.constant 0 : index
    %917 = vector.load %arg32[%c0_441, %c0_442] : memref<32x16xf32, #tpu.memory_space<vmem>>, vector<32x16xf32>
    %cst_443 = arith.constant dense<0.000000e+00> : vector<8x16xf32>
    %918 = tpu.matmul %916, %917, %cst_443 {dimension_numbers = #tpu.dot_dimension_numbers<[1], [0], [0], [1], [0, 0, 1, 1], [], []>} : vector<8x32xf32>, vector<32x16xf32>, vector<8x16xf32> -> vector<8x16xf32>
    %c0_444 = arith.constant 0 : index
    %c0_445 = arith.constant 0 : index
    %919 = vector.load %arg33[%c0_444, %c0_445] : memref<1x16xf32, #tpu.memory_space<vmem>>, vector<1x16xf32>
    %920 = vector.broadcast %919 : vector<1x16xf32> to vector<8x16xf32>
    %921 = arith.addf %918, %920 : vector<8x16xf32>
    %c0_446 = arith.constant 0 : index
    %c0_447 = arith.constant 0 : index
    %c0_448 = arith.constant 0 : index
    %922 = vector.load %arg34[%c0_446, %c0_447, %c0_448] : memref<1x8x16xf32, #tpu.memory_space<vmem>>, vector<1x8x16xf32>
    %923 = vector.shape_cast %922 : vector<1x8x16xf32> to vector<8x16xf32>
    %924 = vector.shape_cast %921 : vector<8x16xf32> to vector<1x8x16xf32>
    tpu.vector_store %arg34[%c0_446, %c0_447, %c0_448], %924 {strides = array<i32>} : memref<1x8x16xf32, #tpu.memory_space<vmem>>, vector<1x8x16xf32>,
    return
  }
  func.func @transform_0(%arg0: i32) -> (i32, i32, i32) {
    %c0_i32 = arith.constant 0 : i32
    %c0_i32_0 = arith.constant 0 : i32
    %c0_i32_1 = arith.constant 0 : i32
    return %arg0, %c0_i32, %c0_i32_0 : i32, i32, i32
  }
  func.func @transform_1(%arg0: i32) -> (i32, i32) {
    %c0_i32 = arith.constant 0 : i32
    %c0_i32_0 = arith.constant 0 : i32
    %c0_i32_1 = arith.constant 0 : i32
    return %c0_i32, %c0_i32_0 : i32, i32
  }
  func.func @transform_2(%arg0: i32) -> (i32, i32) {
    %c0_i32 = arith.constant 0 : i32
    %c0_i32_0 = arith.constant 0 : i32
    %c0_i32_1 = arith.constant 0 : i32
    return %c0_i32, %c0_i32_0 : i32, i32
  }
  func.func @transform_3(%arg0: i32) -> (i32, i32) {
    %c0_i32 = arith.constant 0 : i32
    %c0_i32_0 = arith.constant 0 : i32
    %c0_i32_1 = arith.constant 0 : i32
    return %c0_i32, %c0_i32_0 : i32, i32
  }
  func.func @transform_4(%arg0: i32) -> (i32, i32, i32) {
    %c0_i32 = arith.constant 0 : i32
    %c0_i32_0 = arith.constant 0 : i32
    %c0_i32_1 = arith.constant 0 : i32
    return %arg0, %c0_i32, %c0_i32_0 : i32, i32, i32
  }
  func.func @transform_5(%arg0: i32) -> (i32, i32, i32) {
    %c0_i32 = arith.constant 0 : i32
    %c0_i32_0 = arith.constant 0 : i32
    %c0_i32_1 = arith.constant 0 : i32
    %c0_i32_2 = arith.constant 0 : i32
    return %c0_i32, %c0_i32_0, %c0_i32_1 : i32, i32, i32
  }
  func.func @transform_6(%arg0: i32) -> (i32, i32, i32) {
    %c0_i32 = arith.constant 0 : i32
    %c0_i32_0 = arith.constant 0 : i32
    %c0_i32_1 = arith.constant 0 : i32
    %c0_i32_2 = arith.constant 0 : i32
    return %c0_i32, %c0_i32_0, %c0_i32_1 : i32, i32, i32
  }
  func.func @transform_7(%arg0: i32) -> (i32, i32, i32) {
    %c0_i32 = arith.constant 0 : i32
    %c0_i32_0 = arith.constant 0 : i32
    %c0_i32_1 = arith.constant 0 : i32
    %c0_i32_2 = arith.constant 0 : i32
    return %c0_i32, %c0_i32_0, %c0_i32_1 : i32, i32, i32
  }
  func.func @transform_8(%arg0: i32) -> (i32, i32, i32) {
    %c0_i32 = arith.constant 0 : i32
    %c0_i32_0 = arith.constant 0 : i32
    %c0_i32_1 = arith.constant 0 : i32
    %c0_i32_2 = arith.constant 0 : i32
    return %c0_i32, %c0_i32_0, %c0_i32_1 : i32, i32, i32
  }
  func.func @transform_9(%arg0: i32) -> (i32, i32, i32) {
    %c0_i32 = arith.constant 0 : i32
    %c0_i32_0 = arith.constant 0 : i32
    %c0_i32_1 = arith.constant 0 : i32
    %c0_i32_2 = arith.constant 0 : i32
    return %c0_i32, %c0_i32_0, %c0_i32_1 : i32, i32, i32
  }
  func.func @transform_10(%arg0: i32) -> (i32, i32, i32) {
    %c0_i32 = arith.constant 0 : i32
    %c0_i32_0 = arith.constant 0 : i32
    %c0_i32_1 = arith.constant 0 : i32
    %c0_i32_2 = arith.constant 0 : i32
    return %c0_i32, %c0_i32_0, %c0_i32_1 : i32, i32, i32
  }
  func.func @transform_11(%arg0: i32) -> (i32, i32, i32) {
    %c0_i32 = arith.constant 0 : i32
    %c0_i32_0 = arith.constant 0 : i32
    %c0_i32_1 = arith.constant 0 : i32
    %c0_i32_2 = arith.constant 0 : i32
    return %c0_i32, %c0_i32_0, %c0_i32_1 : i32, i32, i32
  }
  func.func @transform_12(%arg0: i32) -> (i32, i32, i32) {
    %c0_i32 = arith.constant 0 : i32
    %c0_i32_0 = arith.constant 0 : i32
    %c0_i32_1 = arith.constant 0 : i32
    %c0_i32_2 = arith.constant 0 : i32
    return %c0_i32, %c0_i32_0, %c0_i32_1 : i32, i32, i32
  }
  func.func @transform_13(%arg0: i32) -> (i32, i32, i32) {
    %c0_i32 = arith.constant 0 : i32
    %c0_i32_0 = arith.constant 0 : i32
    %c0_i32_1 = arith.constant 0 : i32
    %c0_i32_2 = arith.constant 0 : i32
    return %c0_i32, %c0_i32_0, %c0_i32_1 : i32, i32, i32
  }
  func.func @transform_14(%arg0: i32) -> (i32, i32, i32) {
    %c0_i32 = arith.constant 0 : i32
    %c0_i32_0 = arith.constant 0 : i32
    %c0_i32_1 = arith.constant 0 : i32
    %c0_i32_2 = arith.constant 0 : i32
    return %c0_i32, %c0_i32_0, %c0_i32_1 : i32, i32, i32
  }
  func.func @transform_15(%arg0: i32) -> (i32, i32, i32) {
    %c0_i32 = arith.constant 0 : i32
    %c0_i32_0 = arith.constant 0 : i32
    %c0_i32_1 = arith.constant 0 : i32
    %c0_i32_2 = arith.constant 0 : i32
    return %c0_i32, %c0_i32_0, %c0_i32_1 : i32, i32, i32
  }
  func.func @transform_16(%arg0: i32) -> (i32, i32, i32) {
    %c0_i32 = arith.constant 0 : i32
    %c0_i32_0 = arith.constant 0 : i32
    %c0_i32_1 = arith.constant 0 : i32
    %c0_i32_2 = arith.constant 0 : i32
    return %c0_i32, %c0_i32_0, %c0_i32_1 : i32, i32, i32
  }
  func.func @transform_17(%arg0: i32) -> (i32, i32, i32) {
    %c0_i32 = arith.constant 0 : i32
    %c0_i32_0 = arith.constant 0 : i32
    %c0_i32_1 = arith.constant 0 : i32
    %c0_i32_2 = arith.constant 0 : i32
    return %c0_i32, %c0_i32_0, %c0_i32_1 : i32, i32, i32
  }
  func.func @transform_18(%arg0: i32) -> (i32, i32, i32) {
    %c0_i32 = arith.constant 0 : i32
    %c0_i32_0 = arith.constant 0 : i32
    %c0_i32_1 = arith.constant 0 : i32
    %c0_i32_2 = arith.constant 0 : i32
    return %c0_i32, %c0_i32_0, %c0_i32_1 : i32, i32, i32
  }
  func.func @transform_19(%arg0: i32) -> (i32, i32, i32) {
    %c0_i32 = arith.constant 0 : i32
    %c0_i32_0 = arith.constant 0 : i32
    %c0_i32_1 = arith.constant 0 : i32
    %c0_i32_2 = arith.constant 0 : i32
    return %c0_i32, %c0_i32_0, %c0_i32_1 : i32, i32, i32
  }
  func.func @transform_20(%arg0: i32) -> (i32, i32, i32) {
    %c0_i32 = arith.constant 0 : i32
    %c0_i32_0 = arith.constant 0 : i32
    %c0_i32_1 = arith.constant 0 : i32
    %c0_i32_2 = arith.constant 0 : i32
    return %c0_i32, %c0_i32_0, %c0_i32_1 : i32, i32, i32
  }
  func.func @transform_21(%arg0: i32) -> (i32, i32, i32) {
    %c0_i32 = arith.constant 0 : i32
    %c0_i32_0 = arith.constant 0 : i32
    %c0_i32_1 = arith.constant 0 : i32
    %c0_i32_2 = arith.constant 0 : i32
    return %c0_i32, %c0_i32_0, %c0_i32_1 : i32, i32, i32
  }
  func.func @transform_22(%arg0: i32) -> (i32, i32, i32) {
    %c0_i32 = arith.constant 0 : i32
    %c0_i32_0 = arith.constant 0 : i32
    %c0_i32_1 = arith.constant 0 : i32
    %c0_i32_2 = arith.constant 0 : i32
    return %c0_i32, %c0_i32_0, %c0_i32_1 : i32, i32, i32
  }
  func.func @transform_23(%arg0: i32) -> (i32, i32, i32) {
    %c0_i32 = arith.constant 0 : i32
    %c0_i32_0 = arith.constant 0 : i32
    %c0_i32_1 = arith.constant 0 : i32
    %c0_i32_2 = arith.constant 0 : i32
    return %c0_i32, %c0_i32_0, %c0_i32_1 : i32, i32, i32
  }
  func.func @transform_24(%arg0: i32) -> (i32, i32, i32) {
    %c0_i32 = arith.constant 0 : i32
    %c0_i32_0 = arith.constant 0 : i32
    %c0_i32_1 = arith.constant 0 : i32
    %c0_i32_2 = arith.constant 0 : i32
    return %c0_i32, %c0_i32_0, %c0_i32_1 : i32, i32, i32
  }
  func.func @transform_25(%arg0: i32) -> (i32, i32, i32) {
    %c0_i32 = arith.constant 0 : i32
    %c0_i32_0 = arith.constant 0 : i32
    %c0_i32_1 = arith.constant 0 : i32
    %c0_i32_2 = arith.constant 0 : i32
    return %c0_i32, %c0_i32_0, %c0_i32_1 : i32, i32, i32
  }
  func.func @transform_26(%arg0: i32) -> (i32, i32, i32) {
    %c0_i32 = arith.constant 0 : i32
    %c0_i32_0 = arith.constant 0 : i32
    %c0_i32_1 = arith.constant 0 : i32
    %c0_i32_2 = arith.constant 0 : i32
    return %c0_i32, %c0_i32_0, %c0_i32_1 : i32, i32, i32
  }
  func.func @transform_27(%arg0: i32) -> (i32, i32, i32) {
    %c0_i32 = arith.constant 0 : i32
    %c0_i32_0 = arith.constant 0 : i32
    %c0_i32_1 = arith.constant 0 : i32
    %c0_i32_2 = arith.constant 0 : i32
    return %c0_i32, %c0_i32_0, %c0_i32_1 : i32, i32, i32
  }
  func.func @transform_28(%arg0: i32) -> (i32, i32, i32) {
    %c0_i32 = arith.constant 0 : i32
    %c0_i32_0 = arith.constant 0 : i32
    %c0_i32_1 = arith.constant 0 : i32
    %c0_i32_2 = arith.constant 0 : i32
    return %c0_i32, %c0_i32_0, %c0_i32_1 : i32, i32, i32
  }
  func.func @transform_29(%arg0: i32) -> (i32, i32, i32) {
    %c0_i32 = arith.constant 0 : i32
    %c0_i32_0 = arith.constant 0 : i32
    %c0_i32_1 = arith.constant 0 : i32
    %c0_i32_2 = arith.constant 0 : i32
    return %c0_i32, %c0_i32_0, %c0_i32_1 : i32, i32, i32
  }
  func.func @transform_30(%arg0: i32) -> (i32, i32, i32) {
    %c0_i32 = arith.constant 0 : i32
    %c0_i32_0 = arith.constant 0 : i32
    %c0_i32_1 = arith.constant 0 : i32
    %c0_i32_2 = arith.constant 0 : i32
    return %c0_i32, %c0_i32_0, %c0_i32_1 : i32, i32, i32
  }
  func.func @transform_31(%arg0: i32) -> (i32, i32) {
    %c0_i32 = arith.constant 0 : i32
    %c0_i32_0 = arith.constant 0 : i32
    %c0_i32_1 = arith.constant 0 : i32
    return %c0_i32, %c0_i32_0 : i32, i32
  }
  func.func @transform_32(%arg0: i32) -> (i32, i32) {
    %c0_i32 = arith.constant 0 : i32
    %c0_i32_0 = arith.constant 0 : i32
    %c0_i32_1 = arith.constant 0 : i32
    return %c0_i32, %c0_i32_0 : i32, i32
  }
  func.func @transform_33(%arg0: i32) -> (i32, i32, i32) {
    %c0_i32 = arith.constant 0 : i32
    %c0_i32_0 = arith.constant 0 : i32
    %c0_i32_1 = arith.constant 0 : i32
    return %arg0, %c0_i32, %c0_i32_0 : i32, i32, i32
  }
}

</mosaic_0001>

<bundles_post_ra>
// kernel: _decoder_forward.1
= control target key start
LH: loop header
LB: loop body
LE: loop exit
PB: predicated region body
PF: predicated region fallthrough
CT: control target
= control target key end

     0   :  { %s6005_s6 = smov 1   ;;  %s6006_s10 = smov 2   ;;  %s7111_s0 = inlined_call_operand.smem [shape: u32[34], index: -1, kind: input, shape index: {}] }
   0x1   :  { %s6078_s5 = sld [smem:[%s7111_s0]]   ;;  %s6007_s14 = smov 3  }
   0x2   :  { %s6083_s9 = sld [smem:[%s7111_s0 + %s6005_s6]]   ;;  %s6008_s18 = smov 4  }
   0x3   :  { %s6088_s13 = sld [smem:[%s7111_s0 + %s6006_s10]]   ;;  %s6009_s22 = smov 5  }
   0x4   :  { %s6093_s17 = sld [smem:[%s7111_s0 + %s6007_s14]]   ;;  %s6010_s26 = smov 6  }
   0x5   :  { %s6098_s21 = sld [smem:[%s7111_s0 + %s6008_s18]]   ;;  %s6011_s30 = smov 7  }
   0x6   :  { %s6103_s25 = sld [smem:[%s7111_s0 + %s6009_s22]]   ;;  %s6012_s4 = smov 8  }
   0x7   :  { %7167 = sst [smem:[#allocation44_spill]] %s6078_s5  ;;  %s6013_s10 = smov 9  }
   0x8   :  { %7168 = sst [smem:[#allocation45_spill]] %s6083_s9  ;;  %s6014_s15 = smov 10  }
   0x9   :  { %7169 = sst [smem:[#allocation46_spill]] %s6088_s13  ;;  %s6015_s20 = smov 11  }
   0xa   :  { %7170 = sst [smem:[#allocation47_spill]] %s6093_s17  ;;  %s6017_s1 = smov 13  }
   0xb   :  { %7171 = sst [smem:[#allocation48_spill]] %s6098_s21  ;;  %s6018_s7 = smov 14  }
   0xc   :  { %7172 = sst [smem:[#allocation49_spill]] %s6103_s25  ;;  %s6020_s22 = smov 16  }
   0xd   :  { %s6108_s29 = sld [smem:[%s7111_s0 + %s6010_s26]]   ;;  %s6016_s26 = smov 12  }
   0xe   :  { %s6113_s3 = sld [smem:[%s7111_s0 + %s6011_s30]]   ;;  %s6021_s28 = smov 17  }
   0xf   :  { %s6118_s8 = sld [smem:[%s7111_s0 + %s6012_s4]]  }
  0x10   :  { %s6123_s14 = sld [smem:[%s7111_s0 + %s6013_s10]]  }
  0x11   :  { %s6128_s19 = sld [smem:[%s7111_s0 + %s6014_s15]]   ;;  %s6019_s15 = smov 15  }
  0x12   :  { %s6133_s24 = sld [smem:[%s7111_s0 + %s6015_s20]]  }
  0x13   :  { %7173 = sst [smem:[#allocation50_spill]] %s6108_s29 }
  0x14   :  { %7174 = sst [smem:[#allocation51_spill]] %s6113_s3 }
  0x15   :  { %7175 = sst [smem:[#allocation52_spill]] %s6118_s8 }
  0x16   :  { %7176 = sst [smem:[#allocation53_spill]] %s6123_s14 }
  0x17   :  { %7177 = sst [smem:[#allocation54_spill]] %s6128_s19 }
  0x18   :  { %s6138_s30 = sld [smem:[%s7111_s0 + %s6016_s26]]  }
  0x19   :  { %s6143_s6 = sld [smem:[%s7111_s0 + %s6017_s1]]  }
  0x1a   :  { %s6148_s12 = sld [smem:[%s7111_s0 + %s6018_s7]]   ;;  %s6022_s7 = smov 18  }
  0x1b   :  { %s6153_s20 = sld [smem:[%s7111_s0 + %s6019_s15]]   ;;  %s6023_s15 = smov 19  }
  0x1c   :  { %s6158_s27 = sld [smem:[%s7111_s0 + %s6020_s22]]   ;;  %s6024_s22 = smov 20  }
  0x1d   :  { %s6163_s4 = sld [smem:[%s7111_s0 + %s6021_s28]]   ;;  %s6025_s28 = smov 21  }
  0x1e   :  { %s6168_s21 = sld [smem:[%s7111_s0 + %s6022_s7]]   ;;  %s6026_s7 = smov 22  }
  0x1f   :  { %7178 = sst [smem:[#allocation55_spill]] %s6143_s6 }
  0x20   :  { %7179 = sst [smem:[#allocation56_spill]] %s6148_s12 }
  0x21   :  { %7180 = sst [smem:[#allocation57_spill]] %s6153_s20 }
  0x22   :  { %s6173_s20 = sld [smem:[%s7111_s0 + %s6023_s15]]   ;;  %s6027_s15 = smov 23  }
  0x23   :  { %7181 = sst [smem:[#allocation58_spill]] %s6163_s4 }
  0x24   :  { %s6178_s8 = sld [smem:[%s7111_s0 + %s6024_s22]]   ;;  %s6028_s22 = smov 24  }
  0x25   :  { %s6183_s17 = sld [smem:[%s7111_s0 + %s6025_s28]]   ;;  %s6029_s28 = smov 25  }
  0x26   :  { %s6188_s19 = sld [smem:[%s7111_s0 + %s6026_s7]]   ;;  %s6030_s7 = smov 26  }
  0x27   :  { %s6193_s14 = sld [smem:[%s7111_s0 + %s6027_s15]]   ;;  %s6031_s15 = smov 27  }
  0x28   :  { %s6198_s13 = sld [smem:[%s7111_s0 + %s6028_s22]]   ;;  %s6032_s22 = smov 28  }
  0x29   :  { %s6203_s3 = sld [smem:[%s7111_s0 + %s6029_s28]]   ;;  %s6033_s28 = smov 29  }
  0x2a   :  { %7182 = sst [smem:[#allocation59_spill]] %s6178_s8 }
  0x2b   :  { %s6208_s29 = sld [smem:[%s7111_s0 + %s6030_s7]]   ;;  %s6034_s7 = smov 30  }
  0x2c   :  { %s6213_s25 = sld [smem:[%s7111_s0 + %s6031_s15]]   ;;  %s6035_s15 = smov 31  }
  0x2d   :  { %7183 = sst [smem:[#allocation60_spill]] %s6193_s14 }
  0x2e   :  { %7184 = sst [smem:[#allocation61_spill]] %s6198_s13 }
  0x2f   :  { %7185 = sst [smem:[#allocation62_spill]] %s6203_s3 }
  0x30   :  { %s6218_s9 = sld [smem:[%s7111_s0 + %s6032_s22]]   ;;  %s6036_s22 = smov 32  }
  0x31   :  { %7186 = sst [smem:[#allocation63_spill]] %s6208_s29 }
  0x32   :  { %7187 = sst [smem:[#allocation64_spill]] %s6213_s25 }
  0x33   :  { %s6223_s5 = sld [smem:[%s7111_s0 + %s6033_s28]]   ;;  %s6037_s28 = smov 33  }
  0x34   :  { %s6228_s29 = sld [smem:[%s7111_s0 + %s6034_s7]]  }
  0x35   :  { %s6233_s25 = sld [smem:[%s7111_s0 + %s6035_s15]]  }
  0x36   :  { %s6238_s13 = sld [smem:[%s7111_s0 + %s6036_s22]]  }
  0x39   :  { %7188 = sst [smem:[#allocation65_spill]] %s6223_s5 }
  0x3a   :  { %s6243_s5 = sld [smem:[%s7111_s0 + %s6037_s28]]  }
  0x40   :  { %7189 = sst [smem:[#allocation66_spill]] %s6243_s5 }
  0x41   :  { %72 = vsyncpa [#allocation3], 0 }
  0x42   :  { %73 = vsyncpa [#allocation6], 0 }
  0x43   :  { %74 = vsyncpa [#allocation9], 0 }
  0x44   :  { %75 = vsyncpa [#allocation12], 0 }
  0x45   :  { %76 = vsyncpa [#allocation15], 0 }
  0x46   :  { %77 = vsyncpa [#allocation18], 0 }
  0x47   :  { %78 = vsyncpa [#allocation21], 0 }
  0x48   :  { %79 = vsyncpa [#allocation24], 0 }
  0x49   :  { %80 = vsyncpa [#allocation27], 0 }
  0x4a   :  { %81 = vsyncpa [#allocation30], 0 }
  0x4b   :  { %82 = vsyncpa [#allocation4], 0 }
  0x4c   :  { %84 = vsyncpa [#allocation4 + $0x1], 0  ;;  %s6245_s7 = smov 0   ;;  %s6247_s10 = smov 0  }
  0x4d   :  { %s6249_s11 = smov 0   ;;  %s6251_s0 = smov 0  }
  0x4e LB: > { %s7190_s8 = sld [smem:[#allocation59_spill]]  ;;  %s6266_s15 = sadd.s32 4294967295, %s6003_s0   ;;  %s5995_s10 = sphi %s6247_s10, %s7246_s10   ;;  %s5991_s7 = sphi %s6245_s7, %s7245_s7   ;;  %s6003_s0 = sphi %s6251_s0, %s7244_s0   ;;  %s5999_s11 = sphi %s6249_s11, %s7247_s11  }
  0x4f   : > { %s7191_s6 = sld [smem:[#allocation55_spill]]  ;;  %s4660_s16 = sadd.s32 4294967294, %s6003_s0  }
  0x50   : > { %s7192_s3 = sld [smem:[#allocation62_spill]]  ;;  %s6270_s18 = sadd.s32 1, %s6003_s0  }
  0x51   : > { %s7193_s14 = sld [smem:[#allocation60_spill]]  ;;  %s800_s22 = sadd.s32 1, %s5999_s11 }
  0x52   : > { %s7194_s4 = sld [smem:[#allocation58_spill]]  ;;  %s797_s23 = ssub.s32 %s6003_s0, %s6270_s18 }
  0x53   : > { %s7195_s12 = sld [smem:[#allocation56_spill]]  ;;  %p810_p0 = scmp.ne.s32.totalorder %s5999_s11, %s5995_s10 }
  0x54   : > { %7196 = sst [smem:[#allocation67_spill]] %s5991_s7  ;;  %p798_p1 = scmp.eq.s32.totalorder %s797_s23, 0 }
  0x55   : > { %7197 = sst [smem:[#allocation68_spill]] %s5995_s10  ;;  %p811_p2 = scmp.eq.s32.totalorder %s6266_s15, 1 }
  0x56   : > { %7198 = sst [smem:[#allocation69_spill]] %s5999_s11  ;;  %p816_p3 = scmp.ne.s32.totalorder %s5995_s10, %s5991_s7 }
  0x57   : > { %7199 = sst [smem:[#allocation70_spill]] %s6003_s0  ;;  %p817_p4 = scmp.eq.s32.totalorder %s4660_s16, 1 }
  0x58   : > { %7200 = sst [smem:[#allocation71_spill]] %s6270_s18  ;;  %p6283_p5 = por %p811_p2, %p810_p0 }
  0x59   : > { %s6281_s26 = scalar_select %p798_p1, %s5999_s11, %s800_s22  }
  0x5a   : > { %s7202_s28 = scalar_select %p6283_p5, 1, 0 }
  0x5b   : > { %7201 = sst [smem:[#allocation72_spill]] %s6281_s26  ;;  %p6287_p6 = por %p817_p4, %p816_p3 }
  0x5c   : > { %7203 = sst [smem:[#allocation73_spill]] %s7202_s28  ;;  %p4661_p7 = scmp.ge.s32.totalorder %s6003_s0, 1 }
  0x5d   : > { %s7204_s1 = scalar_select %p6287_p6, 1, 0 }
  0x5e   : > { %p824_p8 = scmp.lt.s32.totalorder %s6003_s0, 3  ;;  %p5027_p9 = scmp.eq.s32.totalorder %s6266_s15, 0 }
  0x5f   : > { %7205 = sst [smem:[#allocation74_spill]] %s7204_s1  ;;  %s876_s23 = sshll.u32 %s6138_s30, 4  ;;  %s877_s23 = int_to_ptr.hbm [resolvable:$true] %s876_s23 }
  0x60   : > { %p6294_p10 = pnand %p4661_p7, %p824_p8  ;;  %s904_s16 = sshll.u32 %s7195_s12, 4  ;;  %s6308_s16 = int_to_ptr.hbm [resolvable:$true] %s904_s16 }
  0x61   : > { %s6038_s26 = smov [#allocation5]   ;;  %s5331_s18 = sshra.s32 %s877_s23, 4  ;;  %s5332_s18 = int_to_ptr.hbm [resolvable:$true] %s5331_s18 }
  0x62   : > { %p4965_p11 = pneg %p6294_p10  ;;  %s878_s11 = sshll.u32 %s6038_s26, 4  ;;  %s879_s11 = int_to_ptr.vmem [resolvable:$true] %s878_s11 }
  0x63   : > { %s5333_s1 = scalar_lea.hbm %s5332_s18, 3  ;;  %s5338_s0 = scalar_lea.hbm %s6138_s30, 3 }
  0x64   : > { %p6304_p12 = pnand %p5027_p9, %p4965_p11  ;;  %p5334_p13 = scmp.ne.s32.totalorder %s5332_s18, %s5333_s1 }
  0x65   : > { %p5339_p3 = scmp.lt.s32.totalorder %s5332_s18, %s6138_s30  ;;  %p5340_p4 = scmp.lt.s32.totalorder %s5338_s0, %s5333_s1 }
  0x66   : > { %p6312_p0 = pneg %p6304_p12 }
  0x67   : > { %p5341_p7 = por %p5340_p4, %p5339_p3 }
  0x68   : > { %p5336_p1 = pnand %p6312_p0, %p5334_p13 }
  0x6a   : > { %p5337_p2 = pneg %p5336_p1 }
  0x6c   : > { %p5342_p8 = pnand %p5341_p7, %p5337_p2 }
  0x6e   : > { %5345 = shalt.err (!%p5342_p8)
}
  0x6f   : > { %s7136_s26 = smov 16   ;;  %s7138_s28 = smov 1  }
  0x70   : > { %4971 = dma.hbm_to_vmem [thread:$0]  (!%p6304_p12), %s877_s23, 48, %s879_s11, [#allocation6], %s7136_s26, %s7136_s26, %s7138_s28  }
  0x71   : > { %s6041_s5 = smov [#allocation8]   ;;  %s5361_s18 = sshra.s32 %s6308_s16, 4  ;;  %s5362_s18 = int_to_ptr.hbm [resolvable:$true] %s5361_s18 }
  0x72   : > { %s906_s10 = sshll.u32 %s6041_s5, 4  ;;  %s5363_s0 = scalar_lea.hbm %s5362_s18, 3  ;;  %s907_s10 = int_to_ptr.vmem [resolvable:$true] %s906_s10 }
  0x73   : > { %p5364_p11 = scmp.ne.s32.totalorder %s5362_s18, %s5363_s0  ;;  %s5368_s1 = scalar_lea.hbm %s7195_s12, 3 }
  0x74   : > { %p5369_p2 = scmp.lt.s32.totalorder %s5362_s18, %s7195_s12  ;;  %p5370_p3 = scmp.lt.s32.totalorder %s5368_s1, %s5363_s0 }
  0x75   : > { %p5366_p13 = pnand %p5364_p11, %p6312_p0 }
  0x76   : > { %p5371_p4 = por %p5370_p3, %p5369_p2 }
  0x77   : > { %p5367_p1 = pneg %p5366_p13 }
  0x79   : > { %p5372_p7 = pnand %p5371_p4, %p5367_p1 }
  0x7b   : > { %5375 = shalt.err (!%p5372_p7)
}
  0x7c   : > { %4977 = dma.hbm_to_vmem [thread:$0]  (!%p6304_p12), %s6308_s16, 48, %s907_s10, [#allocation9], %s7136_s26, %s7136_s26, %s7138_s28  }
  0x7d   : > { %s935_s5 = sshll.u32 %s7194_s4, 4  ;;  %s6042_s11 = smov [#allocation11]   ;;  %s936_s5 = int_to_ptr.hbm [resolvable:$true] %s935_s5 }
  0x7e   : > { %s937_s23 = sshll.u32 %s6042_s11, 4  ;;  %s963_s18 = sshll.u32 %s6173_s20, 4  ;;  %s938_s23 = int_to_ptr.vmem [resolvable:$true] %s937_s23  ;;  %s964_s18 = int_to_ptr.hbm [resolvable:$true] %s963_s18 }
  0x7f   : > { %s5391_s0 = sshra.s32 %s936_s5, 4  ;;  %s5398_s12 = scalar_lea.hbm %s7194_s4, 96  ;;  %s5392_s0 = int_to_ptr.hbm [resolvable:$true] %s5391_s0 }
  0x80   : > { %s5393_s1 = scalar_lea.hbm %s5392_s0, 96  ;;  %p5399_p1 = scmp.lt.s32.totalorder %s5392_s0, %s7194_s4 }
  0x81   : > { %p5394_p8 = scmp.ne.s32.totalorder %s5392_s0, %s5393_s1  ;;  %p5400_p2 = scmp.lt.s32.totalorder %s5398_s12, %s5393_s1 }
  0x83   : > { %p5396_p11 = pnand %p5394_p8, %p6312_p0  ;;  %p5401_p3 = por %p5400_p2, %p5399_p1 }
  0x85   : > { %p5397_p13 = pneg %p5396_p11 }
  0x87   : > { %p5402_p4 = pnand %p5401_p3, %p5397_p13 }
  0x89   : > { %5405 = shalt.err (!%p5402_p4)
}
  0x8a   : > { %s7140_s10 = smov 128   ;;  %s7142_s16 = smov 8  }
  0x8b   : > { %4983 = dma.hbm_to_vmem [thread:$0]  (!%p6304_p12), %s936_s5, 1536, %s938_s23, [#allocation12], %s7140_s10, %s7140_s10, %s7142_s16  }
  0x8c   : > { %s6045_s11 = smov [#allocation14]   ;;  %s991_s0 = sshll.u32 %s6183_s17, 4  ;;  %s6348_s0 = int_to_ptr.hbm [resolvable:$true] %s991_s0 }
  0x8d   : > { %s965_s26 = sshll.u32 %s6045_s11, 4  ;;  %s5421_s12 = sshra.s32 %s964_s18, 4  ;;  %s966_s26 = int_to_ptr.vmem [resolvable:$true] %s965_s26  ;;  %s5422_s12 = int_to_ptr.hbm [resolvable:$true] %s5421_s12 }
  0x8e   : > { %s5423_s1 = scalar_lea.hbm %s5422_s12, 3  ;;  %s5428_s28 = scalar_lea.hbm %s6173_s20, 3 }
  0x8f   : > { %p5424_p7 = scmp.ne.s32.totalorder %s5422_s12, %s5423_s1  ;;  %p5429_p13 = scmp.lt.s32.totalorder %s5422_s12, %s6173_s20 }
  0x90   : > { %p5430_p1 = scmp.lt.s32.totalorder %s5428_s28, %s5423_s1 }
  0x91   : > { %p5426_p8 = pnand %p5424_p7, %p6312_p0 }
  0x92   : > { %p5431_p2 = por %p5430_p1, %p5429_p13 }
  0x93   : > { %p5427_p11 = pneg %p5426_p8 }
  0x95   : > { %p5432_p3 = pnand %p5431_p2, %p5427_p11 }
  0x97   : > { %5435 = shalt.err (!%p5432_p3)
}
  0x98   : > { %s7209_s5 = smov 1   ;;  %s7210_s23 = smov 16  }
  0x99   : > { %4989 = dma.hbm_to_vmem [thread:$0]  (!%p6304_p12), %s964_s18, 48, %s966_s26, [#allocation15], %s7210_s23, %s7210_s23, %s7209_s5  }
  0x9a   : > { %s1019_s11 = sshll.u32 %s7193_s14, 4  ;;  %s6046_s10 = smov [#allocation17]   ;;  %s6360_s11 = int_to_ptr.hbm [resolvable:$true] %s1019_s11 }
  0x9b   : > { %s993_s16 = sshll.u32 %s6046_s10, 4  ;;  %s5451_s28 = sshra.s32 %s6348_s0, 4  ;;  %s994_s16 = int_to_ptr.vmem [resolvable:$true] %s993_s16  ;;  %s5452_s28 = int_to_ptr.hbm [resolvable:$true] %s5451_s28 }
  0x9c   : > { %s5453_s12 = scalar_lea.hbm %s5452_s28, 3  ;;  %s5458_s1 = scalar_lea.hbm %s6183_s17, 3 }
  0x9d   : > { %p5454_p4 = scmp.ne.s32.totalorder %s5452_s28, %s5453_s12  ;;  %p5459_p11 = scmp.lt.s32.totalorder %s5452_s28, %s6183_s17 }
  0x9e   : > { %p5460_p13 = scmp.lt.s32.totalorder %s5458_s1, %s5453_s12 }
  0x9f   : > { %p5456_p7 = pnand %p5454_p4, %p6312_p0 }
  0xa0   : > { %p5461_p1 = por %p5460_p13, %p5459_p11 }
  0xa1   : > { %p5457_p8 = pneg %p5456_p7 }
  0xa3   : > { %p5462_p2 = pnand %p5461_p1, %p5457_p8 }
  0xa5   : > { %5465 = shalt.err (!%p5462_p2)
}
  0xa6   : > { %4995 = dma.hbm_to_vmem [thread:$0]  (!%p6304_p12), %s6348_s0, 48, %s994_s16, [#allocation18], %s7210_s23, %s7210_s23, %s7209_s5  }
  0xa7   : > { %s6047_s26 = smov [#allocation20]   ;;  %s1047_s10 = sshll.u32 %s7192_s3, 4  ;;  %s6374_s10 = int_to_ptr.hbm [resolvable:$true] %s1047_s10 }
  0xa8   : > { %s1021_s18 = sshll.u32 %s6047_s26, 4  ;;  %s5481_s28 = sshra.s32 %s6360_s11, 4  ;;  %s1022_s18 = int_to_ptr.vmem [resolvable:$true] %s1021_s18  ;;  %s5482_s28 = int_to_ptr.hbm [resolvable:$true] %s5481_s28 }
  0xa9   : > { %s5483_s12 = scalar_lea.hbm %s5482_s28, 3  ;;  %s5488_s1 = scalar_lea.hbm %s7193_s14, 3 }
  0xaa   : > { %p5484_p3 = scmp.ne.s32.totalorder %s5482_s28, %s5483_s12  ;;  %p5489_p8 = scmp.lt.s32.totalorder %s5482_s28, %s7193_s14 }
  0xab   : > { %p5490_p11 = scmp.lt.s32.totalorder %s5488_s1, %s5483_s12 }
  0xac   : > { %p5486_p4 = pnand %p5484_p3, %p6312_p0 }
  0xad   : > { %p5491_p13 = por %p5490_p11, %p5489_p8 }
  0xae   : > { %p5487_p7 = pneg %p5486_p4 }
  0xb0   : > { %p5492_p1 = pnand %p5491_p13, %p5487_p7 }
  0xb2   : > { %5495 = shalt.err (!%p5492_p1)
}
  0xb3   : > { %5001 = dma.hbm_to_vmem [thread:$0]  (!%p6304_p12), %s6360_s11, 48, %s1022_s18, [#allocation21], %s7210_s23, %s7210_s23, %s7209_s5  }
  0xb4   : > { %s1078_s16 = sshll.u32 %s6218_s9, 4  ;;  %s6048_s0 = smov [#allocation23]   ;;  %s6388_s16 = int_to_ptr.hbm [resolvable:$true] %s1078_s16 }
  0xb5   : > { %s1049_s26 = sshll.u32 %s6048_s0, 4  ;;  %s5511_s28 = sshra.s32 %s6374_s10, 4  ;;  %s1050_s26 = int_to_ptr.vmem [resolvable:$true] %s1049_s26  ;;  %s5512_s28 = int_to_ptr.hbm [resolvable:$true] %s5511_s28 }
  0xb6   : > { %s5513_s12 = scalar_lea.hbm %s5512_s28, 96  ;;  %s5518_s1 = scalar_lea.hbm %s7192_s3, 96 }
  0xb7   : > { %p5514_p2 = scmp.ne.s32.totalorder %s5512_s28, %s5513_s12  ;;  %p5519_p7 = scmp.lt.s32.totalorder %s5512_s28, %s7192_s3 }
  0xb8   : > { %p5520_p8 = scmp.lt.s32.totalorder %s5518_s1, %s5513_s12 }
  0xb9   : > { %p5516_p3 = pnand %p5514_p2, %p6312_p0 }
  0xba   : > { %p5521_p11 = por %p5520_p8, %p5519_p7 }
  0xbb   : > { %p5517_p4 = pneg %p5516_p3 }
  0xbd   : > { %p5522_p13 = pnand %p5521_p11, %p5517_p4 }
  0xbf   : > { %5525 = shalt.err (!%p5522_p13)
}
  0xc0   : > { %s7211_s11 = smov 8   ;;  %s7212_s18 = smov 128  }
  0xc1   : > { %5007 = dma.hbm_to_vmem [thread:$0]  (!%p6304_p12), %s6374_s10, 1536, %s1050_s26, [#allocation24], %s7212_s18, %s7212_s18, %s7211_s11  }
  0xc2   : > { %s6049_s0 = smov [#allocation26]   ;;  %s1106_s14 = sshll.u32 %s6228_s29, 4  ;;  %s6402_s14 = int_to_ptr.hbm [resolvable:$true] %s1106_s14 }
  0xc3   : > { %s1080_s4 = sshll.u32 %s6049_s0, 4  ;;  %s5541_s28 = sshra.s32 %s6388_s16, 4  ;;  %s1081_s4 = int_to_ptr.vmem [resolvable:$true] %s1080_s4  ;;  %s5542_s28 = int_to_ptr.hbm [resolvable:$true] %s5541_s28 }
  0xc4   : > { %s5543_s12 = scalar_lea.hbm %s5542_s28, 3  ;;  %s5548_s1 = scalar_lea.hbm %s6218_s9, 3 }
  0xc5   : > { %p5544_p1 = scmp.ne.s32.totalorder %s5542_s28, %s5543_s12  ;;  %p5549_p4 = scmp.lt.s32.totalorder %s5542_s28, %s6218_s9 }
  0xc6   : > { %p5550_p7 = scmp.lt.s32.totalorder %s5548_s1, %s5543_s12 }
  0xc7   : > { %p5546_p2 = pnand %p5544_p1, %p6312_p0 }
  0xc8   : > { %p5551_p8 = por %p5550_p7, %p5549_p4 }
  0xc9   : > { %p5547_p3 = pneg %p5546_p2 }
  0xcb   : > { %p5552_p11 = pnand %p5551_p8, %p5547_p3 }
  0xcd   : > { %5555 = shalt.err (!%p5552_p11)
}
  0xce   : > { %5013 = dma.hbm_to_vmem [thread:$0]  (!%p6304_p12), %s6388_s16, 48, %s1081_s4, [#allocation27], %s7210_s23, %s7210_s23, %s7209_s5  }
  0xcf   : > { %s862_s10 = sshll.u32 %s6133_s24, 4  ;;  %s6050_s26 = smov [#allocation29]   ;;  %s6416_s10 = int_to_ptr.hbm [resolvable:$true] %s862_s10 }
  0xd0   : > { %s1108_s0 = sshll.u32 %s6050_s26, 4  ;;  %s5571_s28 = sshra.s32 %s6402_s14, 4  ;;  %s1109_s0 = int_to_ptr.vmem [resolvable:$true] %s1108_s0  ;;  %s5572_s28 = int_to_ptr.hbm [resolvable:$true] %s5571_s28 }
  0xd1   : > { %s5573_s12 = scalar_lea.hbm %s5572_s28, 3  ;;  %s5578_s1 = scalar_lea.hbm %s6228_s29, 3 }
  0xd2   : > { %p5574_p13 = scmp.ne.s32.totalorder %s5572_s28, %s5573_s12  ;;  %p5579_p3 = scmp.lt.s32.totalorder %s5572_s28, %s6228_s29 }
  0xd3   : > { %p5580_p4 = scmp.lt.s32.totalorder %s5578_s1, %s5573_s12 }
  0xd4   : > { %p5576_p1 = pnand %p5574_p13, %p6312_p0 }
  0xd5   : > { %p5581_p7 = por %p5580_p4, %p5579_p3 }
  0xd6   : > { %p5577_p2 = pneg %p5576_p1 }
  0xd8   : > { %p5582_p8 = pnand %p5581_p7, %p5577_p2 }
  0xda   : > { %5585 = shalt.err (!%p5582_p8)
}
  0xdb   : > { %5019 = dma.hbm_to_vmem [thread:$0]  (!%p6304_p12), %s6402_s14, 48, %s1109_s0, [#allocation30], %s7210_s23, %s7210_s23, %s7209_s5  }
  0xdc   : > { %s6051_s4 = smov [#allocation2]   ;;  %s890_s26 = sshll.u32 %s7191_s6, 4  ;;  %s6430_s26 = int_to_ptr.hbm [resolvable:$true] %s890_s26 }
  0xdd   : > { %s864_s16 = sshll.u32 %s6051_s4, 4  ;;  %s5601_s28 = sshra.s32 %s6416_s10, 4  ;;  %s865_s16 = int_to_ptr.vmem [resolvable:$true] %s864_s16  ;;  %s5602_s28 = int_to_ptr.hbm [resolvable:$true] %s5601_s28 }
  0xde   : > { %s5603_s12 = scalar_lea.hbm %s5602_s28, 3  ;;  %s5608_s1 = scalar_lea.hbm %s6133_s24, 3 }
  0xdf   : > { %p5604_p11 = scmp.ne.s32.totalorder %s5602_s28, %s5603_s12  ;;  %p5609_p2 = scmp.lt.s32.totalorder %s5602_s28, %s6133_s24 }
  0xe0   : > { %p5610_p3 = scmp.lt.s32.totalorder %s5608_s1, %s5603_s12 }
  0xe1   : > { %p5606_p13 = pnand %p5604_p11, %p6312_p0 }
  0xe2   : > { %p5611_p4 = por %p5610_p3, %p5609_p2 }
  0xe3   : > { %p5607_p1 = pneg %p5606_p13 }
  0xe5   : > { %p5612_p7 = pnand %p5611_p4, %p5607_p1 }
  0xe7   : > { %5615 = shalt.err (!%p5612_p7)
}
  0xe8   : > { %4968 = dma.hbm_to_vmem [thread:$0]  (!%p6304_p12), %s6416_s10, 48, %s865_s16, [#allocation3], %s7210_s23, %s7210_s23, %s7209_s5  }
  0xe9   : > { %s921_s14 = sshll.u32 %s6158_s27, 4  ;;  %s6052_s0 = smov [#allocation7]   ;;  %s6444_s14 = int_to_ptr.hbm [resolvable:$true] %s921_s14 }
  0xea   : > { %s892_s4 = sshll.u32 %s6052_s0, 4  ;;  %s5631_s28 = sshra.s32 %s6430_s26, 4  ;;  %s893_s4 = int_to_ptr.vmem [resolvable:$true] %s892_s4  ;;  %s5632_s28 = int_to_ptr.hbm [resolvable:$true] %s5631_s28 }
  0xeb   : > { %s5633_s12 = scalar_lea.hbm %s5632_s28, 3  ;;  %s5638_s1 = scalar_lea.hbm %s7191_s6, 3 }
  0xec   : > { %p5634_p8 = scmp.ne.s32.totalorder %s5632_s28, %s5633_s12  ;;  %p5639_p1 = scmp.lt.s32.totalorder %s5632_s28, %s7191_s6 }
  0xed   : > { %p5640_p2 = scmp.lt.s32.totalorder %s5638_s1, %s5633_s12 }
  0xee   : > { %p5636_p11 = pnand %p5634_p8, %p6312_p0 }
  0xef   : > { %p5641_p3 = por %p5640_p2, %p5639_p1 }
  0xf0   : > { %p5637_p13 = pneg %p5636_p11 }
  0xf2   : > { %p5642_p4 = pnand %p5641_p3, %p5637_p13 }
  0xf4   : > { %5645 = shalt.err (!%p5642_p4)
}
  0xf5   : > { %4974 = dma.hbm_to_vmem [thread:$0]  (!%p6304_p12), %s6430_s26, 48, %s893_s4, [#allocation6], %s7210_s23, %s7210_s23, %s7209_s5  }
  0xf6   : > { %s6053_s10 = smov [#allocation10]   ;;  %s949_s0 = sshll.u32 %s6168_s21, 4  ;;  %s6458_s0 = int_to_ptr.hbm [resolvable:$true] %s949_s0 }
  0xf7   : > { %s923_s16 = sshll.u32 %s6053_s10, 4  ;;  %s5661_s28 = sshra.s32 %s6444_s14, 4  ;;  %s924_s16 = int_to_ptr.vmem [resolvable:$true] %s923_s16  ;;  %s5662_s28 = int_to_ptr.hbm [resolvable:$true] %s5661_s28 }
  0xf8   : > { %s5663_s12 = scalar_lea.hbm %s5662_s28, 96  ;;  %s5668_s1 = scalar_lea.hbm %s6158_s27, 96 }
  0xf9   : > { %p5664_p7 = scmp.ne.s32.totalorder %s5662_s28, %s5663_s12  ;;  %p5669_p13 = scmp.lt.s32.totalorder %s5662_s28, %s6158_s27 }
  0xfa   : > { %p5670_p1 = scmp.lt.s32.totalorder %s5668_s1, %s5663_s12 }
  0xfb   : > { %p5666_p8 = pnand %p5664_p7, %p6312_p0 }
  0xfc   : > { %p5671_p2 = por %p5670_p1, %p5669_p13 }
  0xfd   : > { %p5667_p11 = pneg %p5666_p8 }
  0xff   : > { %p5672_p3 = pnand %p5671_p2, %p5667_p11 }
 0x101   : > { %5675 = shalt.err (!%p5672_p3)
}
 0x102   : > { %4980 = dma.hbm_to_vmem [thread:$0]  (!%p6304_p12), %s6444_s14, 1536, %s924_s16, [#allocation9], %s7212_s18, %s7212_s18, %s7211_s11  }
 0x103   : > { %s977_s26 = sshll.u32 %s7190_s8, 4  ;;  %s6054_s4 = smov [#allocation13]   ;;  %s6472_s26 = int_to_ptr.hbm [resolvable:$true] %s977_s26 }
 0x104   : > { %s951_s10 = sshll.u32 %s6054_s4, 4  ;;  %s5691_s28 = sshra.s32 %s6458_s0, 4  ;;  %s952_s10 = int_to_ptr.vmem [resolvable:$true] %s951_s10  ;;  %s5692_s28 = int_to_ptr.hbm [resolvable:$true] %s5691_s28 }
 0x105   : > { %s5693_s12 = scalar_lea.hbm %s5692_s28, 96  ;;  %s5698_s1 = scalar_lea.hbm %s6168_s21, 96 }
 0x106   : > { %p5694_p4 = scmp.ne.s32.totalorder %s5692_s28, %s5693_s12  ;;  %p5699_p11 = scmp.lt.s32.totalorder %s5692_s28, %s6168_s21 }
 0x107   : > { %p5700_p13 = scmp.lt.s32.totalorder %s5698_s1, %s5693_s12 }
 0x108   : > { %p5696_p7 = pnand %p5694_p4, %p6312_p0 }
 0x109   : > { %p5701_p1 = por %p5700_p13, %p5699_p11 }
 0x10a   : > { %p5697_p8 = pneg %p5696_p7 }
 0x10c   : > { %p5702_p2 = pnand %p5701_p1, %p5697_p8 }
 0x10e   : > { %5705 = shalt.err (!%p5702_p2)
}
 0x10f   : > { %4986 = dma.hbm_to_vmem [thread:$0]  (!%p6304_p12), %s6458_s0, 1536, %s952_s10, [#allocation12], %s7212_s18, %s7212_s18, %s7211_s11  }
 0x110   : > { %s6055_s14 = smov [#allocation16]   ;;  %s1005_s4 = sshll.u32 %s6188_s19, 4  ;;  %s6486_s4 = int_to_ptr.hbm [resolvable:$true] %s1005_s4 }
 0x111   : > { %s979_s16 = sshll.u32 %s6055_s14, 4  ;;  %s5721_s28 = sshra.s32 %s6472_s26, 4  ;;  %s980_s16 = int_to_ptr.vmem [resolvable:$true] %s979_s16  ;;  %s5722_s28 = int_to_ptr.hbm [resolvable:$true] %s5721_s28 }
 0x112   : > { %s5723_s12 = scalar_lea.hbm %s5722_s28, 3  ;;  %s5728_s1 = scalar_lea.hbm %s7190_s8, 3 }
 0x113   : > { %p5724_p3 = scmp.ne.s32.totalorder %s5722_s28, %s5723_s12  ;;  %p5729_p8 = scmp.lt.s32.totalorder %s5722_s28, %s7190_s8 }
 0x114   : > { %p5730_p11 = scmp.lt.s32.totalorder %s5728_s1, %s5723_s12 }
 0x115   : > { %p5726_p4 = pnand %p5724_p3, %p6312_p0 }
 0x116   : > { %p5731_p13 = por %p5730_p11, %p5729_p8 }
 0x117   : > { %p5727_p7 = pneg %p5726_p4 }
 0x119   : > { %p5732_p1 = pnand %p5731_p13, %p5727_p7 }
 0x11b   : > { %5735 = shalt.err (!%p5732_p1)
}
 0x11c   : > { %s7213_s11 = sld [smem:[#allocation61_spill]]  ;;  %s6056_s10 = smov [#allocation19]  }
 0x11d   : > { %4992 = dma.hbm_to_vmem [thread:$0]  (!%p6304_p12), %s6472_s26, 48, %s980_s16, [#allocation15], %s7210_s23, %s7210_s23, %s7209_s5  }
 0x11e   : > { %s1007_s14 = sshll.u32 %s6056_s10, 4  ;;  %s5751_s28 = sshra.s32 %s6486_s4, 4  ;;  %s1008_s14 = int_to_ptr.vmem [resolvable:$true] %s1007_s14  ;;  %s5752_s28 = int_to_ptr.hbm [resolvable:$true] %s5751_s28 }
 0x11f   : > { %s5753_s12 = scalar_lea.hbm %s5752_s28, 3  ;;  %s5758_s1 = scalar_lea.hbm %s6188_s19, 3 }
 0x120   : > { %p5754_p2 = scmp.ne.s32.totalorder %s5752_s28, %s5753_s12  ;;  %p5759_p7 = scmp.lt.s32.totalorder %s5752_s28, %s6188_s19 }
 0x121   : > { %p5760_p8 = scmp.lt.s32.totalorder %s5758_s1, %s5753_s12 }
 0x122   : > { %s7214_s18 = smov %s7213_s11  ;;  %s1033_s0 = sshll.u32 %s7213_s11, 4  ;;  %s6500_s0 = int_to_ptr.hbm [resolvable:$true] %s1033_s0 }
 0x123   : > { %p5756_p3 = pnand %p5754_p2, %p6312_p0  ;;  %p5761_p11 = por %p5760_p8, %p5759_p7 }
 0x125   : > { %p5757_p4 = pneg %p5756_p3 }
 0x127   : > { %p5762_p13 = pnand %p5761_p11, %p5757_p4 }
 0x129   : > { %5765 = shalt.err (!%p5762_p13)
}
 0x12a   : > { %s7215_s26 = sld [smem:[#allocation63_spill]]  ;;  %s6057_s16 = smov [#allocation22]  }
 0x12b   : > { %4998 = dma.hbm_to_vmem [thread:$0]  (!%p6304_p12), %s6486_s4, 48, %s1008_s14, [#allocation18], %s7210_s23, %s7210_s23, %s7209_s5  }
 0x12c   : > { %s1035_s11 = sshll.u32 %s6057_s16, 4  ;;  %s5781_s28 = sshra.s32 %s6500_s0, 4  ;;  %s1036_s11 = int_to_ptr.vmem [resolvable:$true] %s1035_s11  ;;  %s5782_s28 = int_to_ptr.hbm [resolvable:$true] %s5781_s28 }
 0x12d   : > { %s5783_s12 = scalar_lea.hbm %s5782_s28, 3  ;;  %s5788_s1 = scalar_lea.hbm %s7214_s18, 3 }
 0x12e   : > { %p5784_p1 = scmp.ne.s32.totalorder %s5782_s28, %s5783_s12  ;;  %p5789_p4 = scmp.lt.s32.totalorder %s5782_s28, %s7214_s18 }
 0x12f   : > { %p5790_p7 = scmp.lt.s32.totalorder %s5788_s1, %s5783_s12 }
 0x130   : > { %s1061_s10 = sshll.u32 %s7215_s26, 4  ;;  %p5786_p2 = pnand %p5784_p1, %p6312_p0  ;;  %s6514_s10 = int_to_ptr.hbm [resolvable:$true] %s1061_s10 }
 0x131   : > { %p5791_p8 = por %p5790_p7, %p5789_p4 }
 0x132   : > { %p5787_p3 = pneg %p5786_p2 }
 0x134   : > { %p5792_p11 = pnand %p5791_p8, %p5787_p3 }
 0x136   : > { %5795 = shalt.err (!%p5792_p11)
}
 0x137   : > { %s7216_s4 = sld [smem:[#allocation65_spill]]  ;;  %s6058_s16 = smov [#allocation25]  }
 0x138   : > { %5004 = dma.hbm_to_vmem [thread:$0]  (!%p6304_p12), %s6500_s0, 48, %s1036_s11, [#allocation21], %s7210_s23, %s7210_s23, %s7209_s5  }
 0x139   : > { %s1063_s3 = sshll.u32 %s6058_s16, 4  ;;  %s5811_s28 = sshra.s32 %s6514_s10, 4  ;;  %s1064_s3 = int_to_ptr.vmem [resolvable:$true] %s1063_s3  ;;  %s5812_s28 = int_to_ptr.hbm [resolvable:$true] %s5811_s28 }
 0x13a   : > { %s5813_s12 = scalar_lea.hbm %s5812_s28, 3  ;;  %s5818_s1 = scalar_lea.hbm %s7215_s26, 3 }
 0x13b   : > { %p5814_p13 = scmp.ne.s32.totalorder %s5812_s28, %s5813_s12  ;;  %p5819_p3 = scmp.lt.s32.totalorder %s5812_s28, %s7215_s26 }
 0x13c   : > { %p5820_p4 = scmp.lt.s32.totalorder %s5818_s1, %s5813_s12 }
 0x13d   : > { %s1092_s14 = sshll.u32 %s7216_s4, 4  ;;  %p5816_p1 = pnand %p5814_p13, %p6312_p0  ;;  %s6528_s14 = int_to_ptr.hbm [resolvable:$true] %s1092_s14 }
 0x13e   : > { %p5821_p7 = por %p5820_p4, %p5819_p3 }
 0x13f   : > { %p5817_p2 = pneg %p5816_p1 }
 0x141   : > { %p5822_p8 = pnand %p5821_p7, %p5817_p2 }
 0x143   : > { %5825 = shalt.err (!%p5822_p8)
}
 0x144   : > { %5010 = dma.hbm_to_vmem [thread:$0]  (!%p6304_p12), %s6514_s10, 48, %s1064_s3, [#allocation24], %s7210_s23, %s7210_s23, %s7209_s5  }
 0x145   : > { %s6059_s0 = smov [#allocation28]   ;;  %s1124_s16 = sshll.u32 %s6238_s13, 4  ;;  %s1125_s16 = int_to_ptr.hbm [resolvable:$true] %s1124_s16 }
 0x146   : > { %s1094_s11 = sshll.u32 %s6059_s0, 4  ;;  %s5841_s28 = sshra.s32 %s6528_s14, 4  ;;  %s1095_s11 = int_to_ptr.vmem [resolvable:$true] %s1094_s11  ;;  %s5842_s28 = int_to_ptr.hbm [resolvable:$true] %s5841_s28 }
 0x147   : > { %s5843_s12 = scalar_lea.hbm %s5842_s28, 3  ;;  %s5848_s1 = scalar_lea.hbm %s7216_s4, 3 }
 0x148   : > { %p5844_p11 = scmp.ne.s32.totalorder %s5842_s28, %s5843_s12  ;;  %p5849_p2 = scmp.lt.s32.totalorder %s5842_s28, %s7216_s4 }
 0x149   : > { %p5850_p3 = scmp.lt.s32.totalorder %s5848_s1, %s5843_s12 }
 0x14a   : > { %p5846_p13 = pnand %p5844_p11, %p6312_p0 }
 0x14b   : > { %p5851_p4 = por %p5850_p3, %p5849_p2 }
 0x14c   : > { %p5847_p1 = pneg %p5846_p13 }
 0x14e   : > { %p5852_p7 = pnand %p5851_p4, %p5847_p1 }
 0x150   : > { %5855 = shalt.err (!%p5852_p7)
}
 0x151   : > { %5016 = dma.hbm_to_vmem [thread:$0]  (!%p6304_p12), %s6528_s14, 48, %s1095_s11, [#allocation27], %s7210_s23, %s7210_s23, %s7209_s5  }
 0x152   : > { %s6060_s3 = smov [#allocation31]   ;;  %s5871_s0 = sshra.s32 %s1125_s16, 4  ;;  %s5872_s0 = int_to_ptr.hbm [resolvable:$true] %s5871_s0 }
 0x153   : > { %s1126_s10 = sshll.u32 %s6060_s3, 4  ;;  %s5873_s28 = scalar_lea.hbm %s5872_s0, 1  ;;  %s1127_s10 = int_to_ptr.vmem [resolvable:$true] %s1126_s10 }
 0x154   : > { %p5874_p8 = scmp.ne.s32.totalorder %s5872_s0, %s5873_s28  ;;  %s5878_s12 = scalar_lea.hbm %s6238_s13, 1 }
 0x155   : > { %p5879_p1 = scmp.lt.s32.totalorder %s5872_s0, %s6238_s13  ;;  %p5880_p2 = scmp.lt.s32.totalorder %s5878_s12, %s5873_s28 }
 0x156   : > { %p5876_p11 = pnand %p5874_p8, %p6312_p0 }
 0x157   : > { %p5881_p3 = por %p5880_p2, %p5879_p1 }
 0x158   : > { %p5877_p13 = pneg %p5876_p11 }
 0x15a   : > { %p5882_p4 = pnand %p5881_p3, %p5877_p13 }
 0x15c   : > { %5885 = shalt.err (!%p5882_p4)
}
 0x15d   : > { %5022 = dma.hbm_to_vmem [thread:$0]  (!%p6304_p12), %s1125_s16, 16, %s1127_s10, [#allocation30]  }
 0x15e   : > { %1153 = sbr.rel (%p6294_p10) target bundleno = 10988 (0x2aec), region = 152 }
 0x163   : > { %5946 = dma.done.wait (%p5027_p9), [#allocation3], 48  }
 0x164   : > { %5948 = vsyncadd (%p5027_p9), [#allocation3], 4294967248 }
 0x165   : > { %5950 = dma.done.wait (%p5027_p9), [#allocation6], 96  }
 0x166   : > { %5952 = vsyncadd (%p5027_p9), [#allocation6], 4294967200 }
 0x167   : > { %5954 = dma.done.wait (%p5027_p9), [#allocation9], 1584  }
 0x168   : > { %5956 = vsyncadd (%p5027_p9), [#allocation9], 4294965712 }
 0x169   : > { %5958 = dma.done.wait (%p5027_p9), [#allocation12], 3072  }
 0x16a   : > { %5960 = vsyncadd (%p5027_p9), [#allocation12], 4294964224 }
 0x16b   : > { %5962 = dma.done.wait (%p5027_p9), [#allocation15], 96  }
 0x16c   : > { %5964 = vsyncadd (%p5027_p9), [#allocation15], 4294967200 }
 0x16d   : > { %5966 = dma.done.wait (%p5027_p9), [#allocation18], 96  }
 0x16e   : > { %5968 = vsyncadd (%p5027_p9), [#allocation18], 4294967200 }
 0x16f   : > { %5970 = dma.done.wait (%p5027_p9), [#allocation21], 96  }
 0x170   : > { %5972 = vsyncadd (%p5027_p9), [#allocation21], 4294967200 }
 0x171   : > { %5974 = dma.done.wait (%p5027_p9), [#allocation24], 1584  }
 0x172   : > { %5976 = vsyncadd (%p5027_p9), [#allocation24], 4294965712 }
 0x173   : > { %5978 = dma.done.wait (%p5027_p9), [#allocation27], 96  }
 0x174   : > { %5980 = vsyncadd (%p5027_p9), [#allocation27], 4294967200 }
 0x175   : > { %5982 = dma.done.wait (%p5027_p9), [#allocation30], 64  }
 0x176   : > { %5984 = vsyncadd (%p5027_p9), [#allocation30], 4294967232  ;;  %s7217_s7 = sld [smem:[#allocation44_spill]]  ;;  %p1331_p10 = scmp.lt.s32.totalorder %s6266_s15, 1  ;;  %v6061_v0 = vmov 0   ;;  %v1342_v10 = vlaneseq  ;;  %vm1353_vm0 = vcmask 130048  }
 0x177   : > { %s7218_s2 = sld [smem:[#allocation45_spill]]  ;;  %5163 = vset.pattern.permute.xlu0 %v6061_v0  ;;  %v6062_v13 = vmov 0.0   ;;  %vm1400_vm2 = vcmask 261120   ;;  %s7149_s0 = smov 104   ;;  %v5166_v28 = vld [vmem:[#allocation2] ss:$0 sm:$0xff] }
 0x178   : > { %s7219_s22 = sld [smem:[#allocation49_spill]]  ;;  %v1343_v11 = vand.u32 127, %v1342_v10  ;;  %s7157_s12 = smov 120   ;;  %vm1470_vm3 = vcmask 64512   ;;  %vm1749_vm4 = vcmask 195584  }
 0x179   : > { %s7220_s5 = sld [smem:[#allocation50_spill]]  ;;  %s7236_s4 = smov 24  }
 0x17a   : > { %s7221_s23 = sld [smem:[#allocation51_spill]] }
 0x17b   : > { %s6603_s14 = scalar_select %p1331_p10, %s6266_s15, 1 }
 0x17c   : > { %s7222_s1 = sld [smem:[#allocation46_spill]] }
 0x17d   : > { %s4703_s11 = sshll.u32 %s6603_s14, 3  ;;  %v1351_v2 = vld [vmem:[%s7218_s2 + $0x8] sm:$0xff]  ;;  %v1350_v3 = vld [vmem:[%s7218_s2] sm:$0xff]  ;;  %s7223_s3 = sld [smem:[#allocation53_spill]] }
 0x17e   : > { %s1334_s16 = scalar_lea.vmem %s7217_s7, %s4703_s11  ;;  %1371 = vmatpush.msra.mxu2 %v1351_v2  ;;  %v1380_v4 = vld [vmem:[%s7219_s22 + $0x18] sm:$0xff]  ;;  %v1379_v7 = vld [vmem:[%s7219_s22 + $0x10] sm:$0xff]  ;;  %v1378_v15 = vld [vmem:[%s7219_s22 + $0x8] sm:$0xff]  ;;  %s7224_s10 = sld [smem:[#allocation54_spill]] }
 0x17f   : > { %v1341_v1 = vld [vmem:[%s1334_s16] sm:$0xff]  ;;  %v1384_v5 = vld [vmem:[%s7220_s5 + $0x18] sm:$0xff]  ;;  %1416 = vmatpush.msra.mxu1 %v1380_v4  ;;  %v1383_v8 = vld [vmem:[%s7220_s5 + $0x10] sm:$0xff]  ;;  %s7147_s7 = smov 112   ;;  %s7226_s16 = sld [smem:[#allocation47_spill]] }
 0x180   : > { %1345 = vperm.xlu0 %5163, %v1341_v1   ;;  %1372 = vmatpush.msra.mxu2 %v1350_v3  ;;  %v1388_v6 = vld [vmem:[%s7221_s23 + $0x18] sm:$0xff]  ;;  %v1387_v9 = vld [vmem:[%s7221_s23 + $0x10] sm:$0xff]  ;;  %v1382_v16 = vld [vmem:[%s7220_s5 + $0x8] sm:$0xff]  ;;  %s7231_s14 = smov 120   ;;  %s7235_s2 = smov 16  }
 0x181   : > { %1462 = vmatpush.msra.mxu3 %v1388_v6  ;;  %1417 = vmatpush.msra.mxu1 %v1379_v7  ;;  %v1386_v17 = vld [vmem:[%s7221_s23 + $0x8] sm:$0xff]  ;;  %v1377_v18 = vld [vmem:[%s7219_s22] sm:$0xff]  ;;  %s7237_s6 = sld [smem:[#allocation64_spill]] }
 0x182   : > { %1439 = vmatpush.msrb.mxu2 %v1384_v5  ;;  %v1381_v19 = vld [vmem:[%s7220_s5] sm:$0xff] }
 0x183   : > { %1463 = vmatpush.msra.mxu3 %v1387_v9  ;;  %1418 = vmatpush.msra.mxu1 %v1378_v15  ;;  %v1385_v20 = vld [vmem:[%s7221_s23] sm:$0xff] }
 0x184   : > { %1440 = vmatpush.msrb.mxu2 %v1383_v8  ;;  %s7225_s28 = smov %s7224_s10  ;;  %v1352_v21 = vld [vmem:[%s7222_s1] sm:$0xff]  ;;  %s7227_s1 = sld [smem:[#allocation52_spill]] }
 0x185   : > { %1464 = vmatpush.msra.mxu3 %v1386_v17  ;;  %1419 = vmatpush.msra.mxu1 %v1377_v18  ;;  %v5164_v24 = vld [vmem:[%s7223_s3] ss:$0 sm:$0xff] }
 0x186   : > { %1441 = vmatpush.msrb.mxu2 %v1382_v16  ;;  %v5165_v27 = vld [vmem:[%s7224_s10] ss:$0 sm:$0xff]  ;;  %s7151_s10 = smov 16  }
 0x187   : > { %1465 = vmatpush.msra.mxu3 %v1385_v20  ;;  %v6653_v40 = vld [vmem:[%s7226_s16] sm:$0xff] }
 0x188   : > { %1442 = vmatpush.msrb.mxu2 %v1381_v19 }
 0x1f2   : > { %v1346_v12 = vpop.permute.xlu0 %1345 }
 0x1f3   : > { %vm1347_vm1 = vcmp.eq.s32.totalorder %v1343_v11, %v1346_v12 }
 0x1f4   : > { %v4705_v14 = vsel %vm1347_vm1, 1.0, %v6062_v13 }
 0x1f5   : > { %4706 = vmatmul.msk.f32.vlgmr.msra.gmra.mxu2 %vm1353_vm0, %v4705_v14 }
 0x278   : > { %v1374_v22 = vpop.f32.mrf.mxu2 }
 0x279   : > { %v6625_v23 = vadd.f32 %v1374_v22, %v1352_v21 }
 0x27b   : > { %4707 = vmatmul.msk.f32.vlgmr.msra.gmra.mxu1 %vm1400_vm2, %v6625_v23  ;;  %4708 = vmatmul.msk.f32.vlgmr.msrb.gmra.mxu2 %vm1400_vm2, %v6625_v23 }
 0x27c   : > { %4709 = vmatmul.msk.f32.vlgmr.msra.gmra.mxu3 %vm1400_vm2, %v6625_v23 }
 0x2f8   : > { %v1421_v25 = vpop.f32.mrf.mxu1 }
 0x2f9   : > { %v1422_v26 = vadd.f32 %v5164_v24, %v1421_v25 }
 0x2fb   : > { %1668 = vrot.lane.b32.xlu2 %v1422_v26, %s7149_s0  ;;  %1533 = vrot.lane.b32.xlu1 %v1422_v26, %s7157_s12 }
 0x2fe   : > { %v1444_v29 = vpop.f32.mrf.mxu2 }
 0x2ff   : > { %v1445_v30 = vadd.f32 %v5165_v27, %v1444_v29  ;;  %v1467_v31 = vpop.f32.mrf.mxu3 }
 0x300   : > { %v6637_v32 = vadd.f32 %v5166_v28, %v1467_v31 }
 0x301   : > { %1535 = vrot.lane.b32.xlu0 %v1445_v30, %s7157_s12  ;;  %4710 = vmatpush.xpose.msk.msrb.mxu3 %vm1470_vm3, %v1445_v30 }
 0x302   : > { %1528 = vmatpush.msrb.mxu1 %v6637_v32 }
 0x303   : > { %1603 = vrot.lane.b32.xlu2 %v1445_v30, %s7147_s7  ;;  %1670 = vrot.lane.b32.xlu1 %v1445_v30, %s7149_s0 }
 0x304   : > { %4711 = vmatmul.msk.f32.vlgmr.msrb.gmra.mxu3 %vm1470_vm3, %v1422_v26 }
 0x309   : > { %1601 = vrot.lane.b32.xlu0 %v1422_v26, %s7147_s7 }
 0x355   : > { %v1669_v33 = vpop.permute.xlu2 %1668 }
 0x35d   : > { %v1604_v34 = vpop.permute.xlu2 %1603 }
 0x35e   : > { %4716 = vmatpush.xpose.msk.msra.mxu0 %vm1470_vm3, %v1604_v34  ;;  %v1390_v34 = vld [vmem:[%s7227_s1 + $0x8] sm:$0xff] }
 0x36d   : > { %v1534_v35 = vpop.permute.xlu1 %1533 }
 0x373   : > { %v1536_v36 = vpop.permute.xlu0 %1535 }
 0x374   : > { %4713 = vmatpush.xpose.msk.msra.mxu2 %vm1470_vm3, %v1536_v36 }
 0x375   : > { %v1671_v37 = vpop.permute.xlu1 %1670 }
 0x377   : > { %4714 = vmatmul.msk.f32.vlgmr.msra.gmra.mxu2 %vm1470_vm3, %v1534_v35  ;;  %v1389_v35 = vld [vmem:[%s7227_s1] sm:$0xff] }
 0x378   : > { %4719 = vmatpush.xpose.msk.msrb.mxu2 %vm1470_vm3, %v1671_v37 }
 0x37b   : > { %v1602_v38 = vpop.permute.xlu0 %1601 }
 0x37c   : > { %4717 = vmatmul.msk.f32.vlgmr.msra.gmra.mxu0 %vm1470_vm3, %v1602_v38 }
 0x37f   : > { %4720 = vmatmul.msk.f32.vlgmr.msrb.gmra.mxu2 %vm1470_vm3, %v1669_v33  ;;  %v1391_v33 = vld [vmem:[%s7227_s1 + $0x10] sm:$0xff] }
 0x387   : > { %v1494_v39 = vpop.f32.mrf.mxu3 }
 0x388   : > { %v1497_v41 = vmul.f32 0.35355338, %v1494_v39 }
 0x38a   : > { %v1498_v42 = vadd.f32 %v1497_v41, %v6653_v40 }
 0x38c   : > { %v1499_v43 = vsel %vm1470_vm3, %v1498_v42, -inf }
 0x38d   : > { %1500 = vmax.xlane.f32.xlu2 %v1499_v43  ;;  %v5167_v43 = vld [vmem:[#allocation5] ss:$0 sm:$0xff] }
 0x3f9   : > { %v1626_v44 = vpop.f32.mrf.mxu0 }
 0x3fa   : > { %v1629_v45 = vmul.f32 0.35355338, %v1626_v44  ;;  %v1558_v46 = vpop.f32.mrf.mxu2 }
 0x3fb   : > { %v1561_v47 = vmul.f32 0.35355338, %v1558_v46 }
 0x3fc   : > { %v1630_v48 = vadd.f32 %v1629_v45, %v6653_v40 }
 0x3fd   : > { %v1562_v49 = vadd.f32 %v1561_v47, %v6653_v40 }
 0x3fe   : > { %v1631_v50 = vsel %vm1470_vm3, %v1630_v48, -inf }
 0x3ff   : > { %1632 = vmax.xlane.f32.xlu2 %v1631_v50  ;;  %v1563_v51 = vsel %vm1470_vm3, %v1562_v49, -inf  ;;  %v1823_v50 = vld [vmem:[#allocation10 + $0x10] sm:$0xff] }
 0x400   : > { %1564 = vmax.xlane.f32.xlu1 %v1563_v51  ;;  %v1501_v52 = vpop.xlane.xlu2 %1500  ;;  %v1822_v51 = vld [vmem:[#allocation10 + $0x8] sm:$0xff] }
 0x401   : > { %v1502_v53 = vsub.f32 %v1498_v42, %v1501_v52 }
 0x402   : > { %v1693_v54 = vpop.f32.mrf.mxu2 }
 0x403   : > { %v1503_v55 = vmul.f32 1.442695, %v1502_v53  ;;  %v1696_v56 = vmul.f32 0.35355338, %v1693_v54  ;;  %v1821_v53 = vld [vmem:[#allocation10] sm:$0xff] }
 0x405   : > { %5213 = vpow2.f32 %v1503_v55  ;;  %v1697_v57 = vadd.f32 %v1696_v56, %v6653_v40 }
 0x407   : > { %v1698_v58 = vsel %vm1470_vm3, %v1697_v57, -inf }
 0x408   : > { %1699 = vmax.xlane.f32.xlu0 %v1698_v58 }
 0x40b   : > { %v5214_v59 = vpop.eup %5213 }
 0x40c   : > { %v1505_v60 = vsel %vm1470_vm3, %v5214_v59, 0.0 }
 0x40d   : > { %1506 = vadd.xlane.f32.xlu2 %v1505_v60 }
 0x472   : > { %v1633_v61 = vpop.xlane.xlu2 %1632 }
 0x473   : > { %v1634_v62 = vsub.f32 %v1630_v48, %v1633_v61  ;;  %v1565_v63 = vpop.xlane.xlu1 %1564  ;;  %v6069_v48 = vmov 32.0  }
 0x474   : > { %v1566_v0 = vsub.f32 %v1562_v49, %v1565_v63  ;;  %v1824_v49 = vld [vmem:[#allocation10 + $0x18] sm:$0xff] }
 0x475   : > { %v1635_v1 = vmul.f32 1.442695, %v1634_v62  ;;  %1881 = vmatpush.msra.mxu2 %v1824_v49 }
 0x476   : > { %v1567_v2 = vmul.f32 1.442695, %v1566_v0 }
 0x477   : > { %5215 = vpow2.f32 %v1635_v1  ;;  %1882 = vmatpush.msra.mxu2 %v1823_v50 }
 0x478   : > { %5217 = vpow2.f32 %v1567_v2 }
 0x479   : > { %1883 = vmatpush.msra.mxu2 %v1822_v51 }
 0x47b   : > { %v1700_v3 = vpop.xlane.xlu0 %1699  ;;  %1884 = vmatpush.msra.mxu2 %v1821_v53 }
 0x47c   : > { %v1701_v4 = vsub.f32 %v1697_v57, %v1700_v3 }
 0x47d   : > { %v5216_v5 = vpop.eup %5215 }
 0x47e   : > { %v5218_v6 = vpop.eup %5217  ;;  %v1702_v7 = vmul.f32 1.442695, %v1701_v4  ;;  %v1637_v8 = vsel %vm1470_vm3, %v5216_v5, 0.0  ;;  %v5170_v4 = vld [vmem:[#allocation16] ss:$0 sm:$0xff] }
 0x47f   : > { %1638 = vadd.xlane.f32.xlu2 %v1637_v8  ;;  %v1569_v9 = vsel %vm1470_vm3, %v5218_v6, 0.0 }
 0x480   : > { %5219 = vpow2.f32 %v1702_v7  ;;  %1570 = vadd.xlane.f32.xlu1 %v1569_v9  ;;  %v1507_v10 = vpop.xlane.xlu2 %1506 }
 0x481   : > { %5221 = vrcp.f32 %v1507_v10 }
 0x486   : > { %v5220_v11 = vpop.eup %5219 }
 0x487   : > { %v5222_v12 = vpop.eup %5221  ;;  %v1704_v13 = vsel %vm1470_vm3, %v5220_v11, 0.0 }
 0x488   : > { %1705 = vadd.xlane.f32.xlu0 %v1704_v13  ;;  %v1509_v14 = vmul.f32 %v5222_v12, %v5214_v59 }
 0x48a   : > { %4712 = vmatmul.msk.f32.vlgmr.msrb.gmra.mxu1 %vm1470_vm3, %v1509_v14 }
 0x497   : > { %1642 = vrot.lane.b32.xlu2 %v6637_v32, %s7147_s7  ;;  %s7155_s7 = smov 8  }
 0x499   : > { %1575 = vrot.lane.b32.xlu1 %v6637_v32, %s7157_s12 }
 0x49c   : > { %1709 = vrot.lane.b32.xlu0 %v6637_v32, %s7149_s0  ;;  %s7153_s0 = smov 24   ;;  %v1392_v32 = vld [vmem:[%s7227_s1 + $0x18] sm:$0xff] }
 0x49d   : > { %1769 = vmatpush.msrb.mxu0 %v1392_v32 }
 0x49f   : > { %1770 = vmatpush.msrb.mxu0 %v1391_v33 }
 0x4a1   : > { %1771 = vmatpush.msrb.mxu0 %v1390_v34 }
 0x4a3   : > { %1772 = vmatpush.msrb.mxu0 %v1389_v35  ;;  %v1828_v35 = vld [vmem:[#allocation11 + $0x18] sm:$0xff] }
 0x4f2   : > { %v1639_v15 = vpop.xlane.xlu2 %1638 }
 0x4f3   : > { %5223 = vrcp.f32 %v1639_v15  ;;  %v1571_v19 = vpop.xlane.xlu1 %1570 }
 0x4f4   : > { %5225 = vrcp.f32 %v1571_v19  ;;  %v5169_v19 = vld [vmem:[#allocation8] ss:$0 sm:$0xff] }
 0x4f9   : > { %v5224_v16 = vpop.eup %5223 }
 0x4fa   : > { %v1641_v17 = vmul.f32 %v5224_v16, %v5216_v5  ;;  %v1643_v18 = vpop.permute.xlu2 %1642  ;;  %v5226_v21 = vpop.eup %5225  ;;  %v5168_v16 = vld [vmem:[#allocation7] ss:$0 sm:$0xff] }
 0x4fb   : > { %1663 = vmatpush.msra.mxu1 %v1643_v18  ;;  %v1706_v20 = vpop.xlane.xlu0 %1705  ;;  %v1573_v22 = vmul.f32 %v5226_v21, %v5218_v6 }
 0x4fc   : > { %4718 = vmatmul.msk.f32.vlgmr.msra.gmra.mxu1 %vm1470_vm3, %v1641_v17  ;;  %5227 = vrcp.f32 %v1706_v20 }
 0x4fd   : > { %5229 = vrcp.f32 %v6069_v48 }
 0x502   : > { %v5228_v26 = vpop.eup %5227 }
 0x503   : > { %v1708_v27 = vmul.f32 %v5228_v26, %v5220_v11  ;;  %v5230_v52 = vpop.eup %5229 }
 0x504   : > { %vm1788_vm5 = vweird.f32 %v5230_v52 }
 0x507   : > { %v1530_v28 = vpop.f32.mrf.mxu1 }
 0x50b   : > { %v1576_v24 = vpop.permute.xlu1 %1575 }
 0x50c   : > { %1596 = vmatpush.msra.mxu3 %v1576_v24 }
 0x50d   : > { %4715 = vmatmul.msk.f32.vlgmr.msra.gmra.mxu3 %vm1470_vm3, %v1573_v22 }
 0x50e   : > { %v1710_v25 = vpop.permute.xlu0 %1709 }
 0x50f   : > { %1730 = vmatpush.msrb.mxu3 %v1710_v25  ;;  %v5171_v25 = vld [vmem:[#allocation14] ss:$0 sm:$0xff] }
 0x511   : > { %1904 = vmatpush.msra.mxu3 %v1828_v35 }
 0x515   : > { %4721 = vmatmul.msk.f32.vlgmr.msrb.gmra.mxu3 %vm1470_vm3, %v1708_v27 }
 0x579   : > { %v1665_v29 = vpop.f32.mrf.mxu1 }
 0x57a   : > { %1740 = vrot.lane.b32.xlu0 %v1665_v29, %s7151_s10  ;;  %s7228_s10 = sld [smem:[#allocation48_spill]] }
 0x590   : > { %v1598_v30 = vpop.f32.mrf.mxu3 }
 0x591   : > { %1736 = vrot.lane.b32.xlu1 %v1598_v30, %s7155_s7  ;;  %s7229_s7 = sld [smem:[#allocation57_spill]] }
 0x597   : > { %s7230_s12 = smov %s7229_s7  ;;  %v1820_v0 = vld [vmem:[%s7229_s7 + $0x18] sm:$0xff]  ;;  %s7233_s7 = smov 112  }
 0x598   : > { %v1732_v31 = vpop.f32.mrf.mxu3  ;;  %1855 = vmatpush.msrb.mxu1 %v1820_v0  ;;  %v1819_v1 = vld [vmem:[%s7230_s12 + $0x10] sm:$0xff]  ;;  %v1818_v2 = vld [vmem:[%s7230_s12 + $0x8] sm:$0xff]  ;;  %v1817_v3 = vld [vmem:[%s7230_s12] sm:$0xff] }
 0x599   : > { %1744 = vrot.lane.b32.xlu1 %v1732_v31, %s7153_s0  ;;  %s6693_s0 = scalar_lea.vmem %s7228_s10, %s4703_s11  ;;  %s7232_s11 = smov 104  }
 0x59a   : > { %v6696_v54 = vld [vmem:[%s6693_s0] sm:$0xff]  ;;  %1856 = vmatpush.msrb.mxu1 %v1819_v1  ;;  %s7234_s10 = smov 8  }
 0x59b   : > { %4724 = vmatmul.msk.f32.vlgmr.msra.gmra.mxu2 %vm1400_vm2, %v6696_v54 }
 0x59c   : > { %1857 = vmatpush.msrb.mxu1 %v1818_v2 }
 0x59e   : > { %1858 = vmatpush.msrb.mxu1 %v1817_v3 }
 0x5ec   : > { %v1741_v38 = vpop.permute.xlu0 %1740 }
 0x603   : > { %v1737_v36 = vpop.permute.xlu1 %1736 }
 0x604   : > { %v1747_v37 = vsel %vm1470_vm3, %v1530_v28, %v1737_v36  ;;  %v1827_v36 = vld [vmem:[#allocation11 + $0x10] sm:$0xff] }
 0x605   : > { %v1748_v41 = vsel %vm1353_vm0, %v1747_v37, %v1741_v38  ;;  %v1826_v37 = vld [vmem:[#allocation11 + $0x8] sm:$0xff]  ;;  %1905 = vmatpush.msra.mxu3 %v1827_v36  ;;  %v1825_v38 = vld [vmem:[#allocation11] sm:$0xff] }
 0x607   : > { %1906 = vmatpush.msra.mxu3 %v1826_v37 }
 0x609   : > { %1907 = vmatpush.msra.mxu3 %v1825_v38 }
 0x60a   : > { %4725 = vmatmul.msk.f32.vlgmr.msra.gmra.mxu3 %vm1400_vm2, %v6696_v54 }
 0x60b   : > { %v1745_v39 = vpop.permute.xlu1 %1744 }
 0x60c   : > { %v1750_v42 = vsel %vm1749_vm4, %v1748_v41, %v1745_v39 }
 0x60d   : > { %4722 = vmatmul.msk.f32.vlgmr.msrb.gmra.mxu0 %vm1400_vm2, %v1750_v42 }
 0x61e   : > { %v1886_v5 = vpop.f32.mrf.mxu2 }
 0x61f   : > { %v1887_v6 = vadd.f32 %v5170_v4, %v1886_v5 }
 0x621   : > { %1975 = vrot.lane.b32.xlu1 %v1887_v6, %s7231_s14  ;;  %4726 = vmatpush.xpose.msk.msra.mxu0 %vm1470_vm3, %v1887_v6 }
 0x629   : > { %2108 = vrot.lane.b32.xlu1 %v1887_v6, %s7232_s11 }
 0x68a   : > { %v1774_v44 = vpop.f32.mrf.mxu0 }
 0x68b   : > { %v1775_v45 = vadd.f32 %v5167_v43, %v1774_v44 }
 0x68d   : > { %v1777_v46 = vadd.f32 %v1775_v45, %v6625_v23  ;;  %v1784_v23 = vmul.f32 32.0, %v5230_v52 }
 0x68f   : > { %v1780_v47 = vsel %vm1400_vm2, %v1777_v46, 0.0  ;;  %v1785_v55 = vsub.f32 1.0, %v1784_v23  ;;  %v5172_v23 = vld [vmem:[#allocation17] ss:$0 sm:$0xff] }
 0x690   : > { %1781 = vadd.xlane.f32.xlu0 %v1780_v47 }
 0x691   : > { %v1786_v56 = vmul.f32 %v5230_v52, %v1785_v55  ;;  %v1909_v55 = vpop.f32.mrf.mxu3 }
 0x693   : > { %v1787_v57 = vadd.f32 %v5230_v52, %v1786_v56  ;;  %v1976_v22 = vpop.permute.xlu1 %1975 }
 0x694   : > { %4729 = vmatpush.xpose.msk.msrb.mxu2 %vm1470_vm3, %v1976_v22 }
 0x695   : > { %v6700_v58 = vsel %vm1788_vm5, %v5230_v52, %v1787_v57  ;;  %v1910_v57 = vadd.f32 %v5172_v23, %v1909_v55  ;;  %v2293_v23 = vld [vmem:[%s7237_s6 + $0x78] sm:$0xff]  ;;  %v2292_v55 = vld [vmem:[%s7237_s6 + $0x70] sm:$0xff] }
 0x697   : > { %1968 = vmatpush.msra.mxu1 %v1910_v57 }
 0x69b   : > { %v2109_v24 = vpop.permute.xlu1 %2108 }
 0x69c   : > { %4735 = vmatpush.xpose.msk.msra.mxu2 %vm1470_vm3, %v2109_v24 }
 0x703   : > { %v1782_v59 = vpop.xlane.xlu0 %1781 }
 0x704   : > { %v1790_v60 = vmul.f32 %v6700_v58, %v1782_v59 }
 0x706   : > { %v1791_v61 = vsub.f32 %v1777_v46, %v1790_v60 }
 0x708   : > { %v1792_v62 = vmul.f32 %v1791_v61, %v1791_v61 }
 0x70a   : > { %v1793_v63 = vsel %vm1400_vm2, %v1792_v62, 0.0 }
 0x70b   : > { %1794 = vadd.xlane.f32.xlu2 %v1793_v63 }
 0x77e   : > { %v1795_v7 = vpop.xlane.xlu2 %1794 }
 0x77f   : > { %v1796_v8 = vmul.f32 %v1795_v7, %v6700_v58 }
 0x781   : > { %v1797_v9 = vadd.f32 1e-05, %v1796_v8 }
 0x783   : > { %5231 = vrsqrt.f32 %v1797_v9  ;;  %vm1804_vm7 = vweird.f32 %v1797_v9 }
 0x789   : > { %v5232_v10 = vpop.eup %5231 }
 0x78a   : > { %v1799_v11 = vmul.f32 %v5232_v10, %v1797_v9  ;;  %vm1805_vm6 = vweird.f32 %v5232_v10 }
 0x78b   : > { %vm1806_vm8 = vmor %vm1804_vm7, %vm1805_vm6 }
 0x78c   : > { %v1800_v12 = vmul.f32 %v5232_v10, %v1799_v11 }
 0x78e   : > { %v1801_v13 = vmul.f32 0.5, %v1800_v12 }
 0x790   : > { %v1802_v14 = vsub.f32 1.5, %v1801_v13 }
 0x792   : > { %v1803_v15 = vmul.f32 %v5232_v10, %v1802_v14 }
 0x794   : > { %v1807_v17 = vsel %vm1806_vm8, %v5232_v10, %v1803_v15 }
 0x795   : > { %v1808_v18 = vmul.f32 %v1807_v17, %v1791_v61 }
 0x797   : > { %v1812_v20 = vmul.f32 %v5168_v16, %v1808_v18 }
 0x799   : > { %v6712_v21 = vadd.f32 %v5169_v19, %v1812_v20 }
 0x79b   : > { %4723 = vmatmul.msk.f32.vlgmr.msrb.gmra.mxu1 %vm1400_vm2, %v6712_v21 }
 0x818   : > { %v1860_v26 = vpop.f32.mrf.mxu1 }
 0x819   : > { %v1861_v27 = vadd.f32 %v5171_v25, %v1860_v26 }
 0x81b   : > { %2040 = vrot.lane.b32.xlu0 %v1861_v27, %s7233_s7  ;;  %1973 = vrot.lane.b32.xlu1 %v1861_v27, %s7231_s14 }
 0x81c   : > { %4727 = vmatmul.msk.f32.vlgmr.msra.gmra.mxu0 %vm1470_vm3, %v1861_v27 }
 0x823   : > { %2106 = vrot.lane.b32.xlu1 %v1861_v27, %s7232_s11 }
 0x82b   : > { %2042 = vrot.lane.b32.xlu1 %v1887_v6, %s7233_s7 }
 0x88d   : > { %v1974_v28 = vpop.permute.xlu1 %1973  ;;  %v2041_v34 = vpop.permute.xlu0 %2040 }
 0x88e   : > { %4730 = vmatmul.msk.f32.vlgmr.msrb.gmra.mxu2 %vm1470_vm3, %v1974_v28 }
 0x88f   : > { %2298 = vmatpush.msrb.mxu2 %v2293_v23 }
 0x891   : > { %2299 = vmatpush.msrb.mxu2 %v2292_v55 }
 0x895   : > { %v2107_v29 = vpop.permute.xlu1 %2106 }
 0x896   : > { %4736 = vmatmul.msk.f32.vlgmr.msra.gmra.mxu2 %vm1470_vm3, %v2107_v29 }
 0x899   : > { %v1935_v30 = vpop.f32.mrf.mxu0 }
 0x89a   : > { %v1938_v31 = vmul.f32 0.35355338, %v1935_v30  ;;  %v1832_v30 = vld [vmem:[#allocation13 + $0x18] sm:$0xff] }
 0x89c   : > { %v1939_v32 = vsel %vm1470_vm3, %v1938_v31, -inf }
 0x89d   : > { %1940 = vmax.xlane.f32.xlu1 %v1939_v32  ;;  %v2043_v33 = vpop.permute.xlu1 %2042  ;;  %v1830_v32 = vld [vmem:[#allocation13 + $0x8] sm:$0xff] }
 0x89e   : > { %4732 = vmatpush.xpose.msk.msrb.mxu0 %vm1470_vm3, %v2043_v33  ;;  %v1829_v33 = vld [vmem:[#allocation13] sm:$0xff] }
 0x8a1   : > { %4733 = vmatmul.msk.f32.vlgmr.msrb.gmra.mxu0 %vm1470_vm3, %v2041_v34 }
 0x8a2   : > { %2205 = vmatpush.msra.mxu0 %v1832_v30 }
 0x910   : > { %v1941_v44 = vpop.xlane.xlu1 %1940 }
 0x911   : > { %v1998_v42 = vpop.f32.mrf.mxu2  ;;  %v1942_v46 = vsub.f32 %v1938_v31, %v1941_v44  ;;  %v1831_v31 = vld [vmem:[#allocation13 + $0x10] sm:$0xff] }
 0x912   : > { %v2001_v45 = vmul.f32 0.35355338, %v1998_v42  ;;  %2206 = vmatpush.msra.mxu0 %v1831_v31 }
 0x913   : > { %v1943_v49 = vmul.f32 1.442695, %v1942_v46 }
 0x914   : > { %v2002_v47 = vsel %vm1470_vm3, %v2001_v45, -inf  ;;  %2207 = vmatpush.msra.mxu0 %v1830_v32 }
 0x915   : > { %5233 = vpow2.f32 %v1943_v49 }
 0x916   : > { %2208 = vmatpush.msra.mxu0 %v1829_v33 }
 0x919   : > { %v2131_v48 = vpop.f32.mrf.mxu2 }
 0x91a   : > { %v2134_v50 = vmul.f32 0.35355338, %v2131_v48 }
 0x91b   : > { %v5234_v52 = vpop.eup %5233 }
 0x91c   : > { %v2135_v51 = vsel %vm1470_vm3, %v2134_v50, -inf  ;;  %v1945_v53 = vsel %vm1470_vm3, %v5234_v52, 0.0 }
 0x91e   : > { %v2065_v39 = vpop.f32.mrf.mxu0 }
 0x91f   : > { %v2068_v41 = vmul.f32 0.35355338, %v2065_v39 }
 0x921   : > { %v2069_v43 = vsel %vm1470_vm3, %v2068_v41, -inf }
 0x922   : > { %2070 = vmax.xlane.f32.xlu2 %v2069_v43 }
 0x92a   : > { %2003 = vmax.xlane.f32.xlu2 %v2002_v47 }
 0x932   : > { %2136 = vmax.xlane.f32.xlu2 %v2135_v51  ;;  %v2249_v51 = vld [vmem:[#allocation23 + $0x18] sm:$0xff] }
 0x93a   : > { %1946 = vadd.xlane.f32.xlu2 %v1945_v53  ;;  %v2246_v53 = vld [vmem:[#allocation23] sm:$0xff] }
 0x995   : > { %v2071_v56 = vpop.xlane.xlu2 %2070 }
 0x996   : > { %v2072_v59 = vsub.f32 %v2068_v41, %v2071_v56  ;;  %v5173_v41 = vld [vmem:[#allocation19] ss:$0 sm:$0xff]  ;;  %v2291_v56 = vld [vmem:[%s7237_s6 + $0x68] sm:$0xff] }
 0x997   : > { %2300 = vmatpush.msrb.mxu2 %v2291_v56 }
 0x998   : > { %v2073_v60 = vmul.f32 1.442695, %v2072_v59 }
 0x99a   : > { %5235 = vpow2.f32 %v2073_v60  ;;  %v2290_v60 = vld [vmem:[%s7237_s6 + $0x60] sm:$0xff] }
 0x99b   : > { %2301 = vmatpush.msrb.mxu2 %v2290_v60  ;;  %v5178_v60 = vld [vmem:[#allocation28] ss:$0 sm:$0xff] }
 0x99d   : > { %v2004_v61 = vpop.xlane.xlu2 %2003 }
 0x99e   : > { %v2005_v62 = vsub.f32 %v2001_v45, %v2004_v61 }
 0x9a0   : > { %v5236_v63 = vpop.eup %5235  ;;  %v2006_v0 = vmul.f32 1.442695, %v2005_v62  ;;  %v2289_v62 = vld [vmem:[%s7237_s6 + $0x58] sm:$0xff] }
 0x9a1   : > { %v2075_v1 = vsel %vm1470_vm3, %v5236_v63, 0.0  ;;  %2302 = vmatpush.msrb.mxu2 %v2289_v62 }
 0x9a2   : > { %5237 = vpow2.f32 %v2006_v0  ;;  %2076 = vadd.xlane.f32.xlu1 %v2075_v1  ;;  %v2287_v0 = vld [vmem:[%s7237_s6 + $0x48] sm:$0xff]  ;;  %v2286_v1 = vld [vmem:[%s7237_s6 + $0x40] sm:$0xff] }
 0x9a5   : > { %v2137_v2 = vpop.xlane.xlu2 %2136 }
 0x9a6   : > { %v2138_v3 = vsub.f32 %v2134_v50, %v2137_v2 }
 0x9a8   : > { %v5238_v4 = vpop.eup %5237  ;;  %v2139_v5 = vmul.f32 1.442695, %v2138_v3  ;;  %v2285_v3 = vld [vmem:[%s7237_s6 + $0x38] sm:$0xff] }
 0x9a9   : > { %v2008_v6 = vsel %vm1470_vm3, %v5238_v4, 0.0 }
 0x9aa   : > { %5239 = vpow2.f32 %v2139_v5  ;;  %2009 = vadd.xlane.f32.xlu0 %v2008_v6  ;;  %v2284_v5 = vld [vmem:[%s7237_s6 + $0x30] sm:$0xff] }
 0x9ad   : > { %v1947_v7 = vpop.xlane.xlu2 %1946 }
 0x9ae   : > { %5241 = vrcp.f32 %v1947_v7  ;;  %v2283_v7 = vld [vmem:[%s7237_s6 + $0x28] sm:$0xff] }
 0x9b0   : > { %v5240_v8 = vpop.eup %5239 }
 0x9b1   : > { %v2141_v9 = vsel %vm1470_vm3, %v5240_v8, 0.0 }
 0x9b2   : > { %2142 = vadd.xlane.f32.xlu2 %v2141_v9  ;;  %v2282_v9 = vld [vmem:[%s7237_s6 + $0x20] sm:$0xff] }
 0x9b4   : > { %v5242_v10 = vpop.eup %5241 }
 0x9b5   : > { %v1949_v11 = vmul.f32 %v5242_v10, %v5234_v52  ;;  %v2248_v52 = vld [vmem:[#allocation23 + $0x10] sm:$0xff] }
 0x9b7   : > { %4728 = vmatmul.msk.f32.vlgmr.msra.gmra.mxu1 %vm1470_vm3, %v1949_v11  ;;  %v2281_v11 = vld [vmem:[%s7237_s6 + $0x18] sm:$0xff] }
 0x9bb   : > { %2146 = vrot.lane.b32.xlu1 %v1910_v57, %s7232_s11 }
 0x9be   : > { %2080 = vrot.lane.b32.xlu0 %v1910_v57, %s7233_s7 }
 0x9ca   : > { %2014 = vrot.lane.b32.xlu2 %v1910_v57, %s7231_s14 }
 0xa15   : > { %v2077_v13 = vpop.xlane.xlu1 %2076 }
 0xa1d   : > { %v2010_v12 = vpop.xlane.xlu0 %2009 }
 0xa1e   : > { %5243 = vrcp.f32 %v2010_v12 }
 0xa1f   : > { %5245 = vrcp.f32 %v2077_v13  ;;  %v5174_v13 = vld [vmem:[#allocation20] ss:$0 sm:$0xff] }
 0xa24   : > { %v5244_v15 = vpop.eup %5243 }
 0xa25   : > { %v2143_v14 = vpop.xlane.xlu2 %2142  ;;  %v5246_v16 = vpop.eup %5245  ;;  %v2012_v17 = vmul.f32 %v5244_v15, %v5238_v4 }
 0xa26   : > { %5247 = vrcp.f32 %v2143_v14  ;;  %v2079_v20 = vmul.f32 %v5246_v16, %v5236_v63  ;;  %v2288_v63 = vld [vmem:[%s7237_s6 + $0x50] sm:$0xff]  ;;  %v5175_v16 = vld [vmem:[#allocation22] ss:$0 sm:$0xff] }
 0xa27   : > { %2303 = vmatpush.msrb.mxu2 %v2288_v63  ;;  %v5179_v63 = vld [vmem:[#allocation29] ss:$0 sm:$0xff] }
 0xa29   : > { %2304 = vmatpush.msrb.mxu2 %v2287_v0 }
 0xa2b   : > { %2305 = vmatpush.msrb.mxu2 %v2286_v1 }
 0xa2c   : > { %v5248_v24 = vpop.eup %5247 }
 0xa2d   : > { %v2015_v18 = vpop.permute.xlu2 %2014  ;;  %v2147_v19 = vpop.permute.xlu1 %2146  ;;  %v2145_v25 = vmul.f32 %v5248_v24, %v5240_v8  ;;  %2306 = vmatpush.msrb.mxu2 %v2285_v3  ;;  %v5176_v24 = vld [vmem:[#allocation25] ss:$0 sm:$0xff]  ;;  %v5181_v3 = vld [vmem:[#allocation2 + $0x1] ss:$0 sm:$0xff] }
 0xa2e   : > { %2035 = vmatpush.msrb.mxu3 %v2015_v18 }
 0xa2f   : > { %4731 = vmatmul.msk.f32.vlgmr.msrb.gmra.mxu3 %vm1470_vm3, %v2012_v17  ;;  %2307 = vmatpush.msrb.mxu2 %v2284_v5 }
 0xa30   : > { %v2081_v22 = vpop.permute.xlu0 %2080  ;;  %2167 = vmatpush.msra.mxu3 %v2147_v19  ;;  %v2280_v19 = vld [vmem:[%s7237_s6 + $0x10] sm:$0xff] }
 0xa31   : > { %2101 = vmatpush.msrb.mxu1 %v2081_v22  ;;  %2308 = vmatpush.msrb.mxu2 %v2283_v7  ;;  %v2278_v22 = vld [vmem:[%s7237_s6] sm:$0xff] }
 0xa32   : > { %4734 = vmatmul.msk.f32.vlgmr.msrb.gmra.mxu1 %vm1470_vm3, %v2079_v20  ;;  %v2279_v20 = vld [vmem:[%s7237_s6 + $0x8] sm:$0xff] }
 0xa33   : > { %2269 = vmatpush.msra.mxu1 %v2249_v51  ;;  %2309 = vmatpush.msrb.mxu2 %v2282_v9 }
 0xa34   : > { %v1970_v26 = vpop.f32.mrf.mxu1 }
 0xa35   : > { %2270 = vmatpush.msra.mxu1 %v2248_v52  ;;  %2310 = vmatpush.msrb.mxu2 %v2281_v11 }
 0xa37   : > { %4737 = vmatmul.msk.f32.vlgmr.msra.gmra.mxu3 %vm1470_vm3, %v2145_v25  ;;  %2311 = vmatpush.msrb.mxu2 %v2280_v19 }
 0xa39   : > { %2312 = vmatpush.msrb.mxu2 %v2279_v20 }
 0xa3b   : > { %2313 = vmatpush.msrb.mxu2 %v2278_v22 }
 0xaaf   : > { %v2103_v28 = vpop.f32.mrf.mxu1 }
 0xab2   : > { %v2037_v27 = vpop.f32.mrf.mxu3 }
 0xab3   : > { %2173 = vrot.lane.b32.xlu2 %v2037_v27, %s7234_s10 }
 0xaba   : > { %v2169_v29 = vpop.f32.mrf.mxu3 }
 0xabb   : > { %2177 = vrot.lane.b32.xlu2 %v2103_v28, %s7235_s2  ;;  %2181 = vrot.lane.b32.xlu1 %v2169_v29, %s7236_s4  ;;  %v5177_v28 = vld [vmem:[#allocation26] ss:$0 sm:$0xff] }
 0xb0d   : > { %v2174_v34 = vpop.permute.xlu2 %2173 }
 0xb0e   : > { %v2184_v36 = vsel %vm1470_vm3, %v1970_v26, %v2174_v34 }
 0xb15   : > { %v2178_v35 = vpop.permute.xlu2 %2177 }
 0xb16   : > { %v2185_v37 = vsel %vm1353_vm0, %v2184_v36, %v2178_v35 }
 0xb2d   : > { %v2182_v38 = vpop.permute.xlu1 %2181 }
 0xb2e   : > { %v2186_v39 = vsel %vm1749_vm4, %v2185_v37, %v2182_v38  ;;  %v4743_v38 = vld [vmem:[%s7219_s22 + $0x38] sm:$0xff] }
 0xb2f   : > { %4738 = vmatmul.msk.f32.vlgmr.msra.gmra.mxu0 %vm1400_vm2, %v2186_v39  ;;  %v4747_v39 = vld [vmem:[%s7220_s5 + $0x38] sm:$0xff]  ;;  %2397 = vmatpush.msrb.mxu3 %v4743_v38 }
 0xb30   : > { %2420 = vmatpush.msrb.mxu0 %v4747_v39 }
 0xbac   : > { %v2210_v42 = vpop.f32.mrf.mxu0 }
 0xbad   : > { %v2211_v43 = vadd.f32 %v5173_v41, %v2210_v42  ;;  %v4751_v41 = vld [vmem:[%s7221_s23 + $0x38] sm:$0xff]  ;;  %v4742_v42 = vld [vmem:[%s7219_s22 + $0x30] sm:$0xff] }
 0xbae   : > { %2398 = vmatpush.msrb.mxu3 %v4742_v42 }
 0xbaf   : > { %v2213_v44 = vadd.f32 %v2211_v43, %v6712_v21  ;;  %v2247_v21 = vld [vmem:[#allocation23 + $0x8] sm:$0xff] }
 0xbb0   : > { %2271 = vmatpush.msra.mxu1 %v2247_v21  ;;  %v4746_v43 = vld [vmem:[%s7220_s5 + $0x30] sm:$0xff] }
 0xbb1   : > { %v2216_v45 = vsel %vm1400_vm2, %v2213_v44, 0.0  ;;  %2421 = vmatpush.msrb.mxu0 %v4746_v43 }
 0xbb2   : > { %2217 = vadd.xlane.f32.xlu0 %v2216_v45  ;;  %2272 = vmatpush.msra.mxu1 %v2246_v53  ;;  %v4741_v45 = vld [vmem:[%s7219_s22 + $0x28] sm:$0xff] }
 0xbb3   : > { %2399 = vmatpush.msrb.mxu3 %v4741_v45 }
 0xbb4   : > { %2443 = vmatpush.msrb.mxu1 %v4751_v41 }
 0xc25   : > { %v2218_v46 = vpop.xlane.xlu0 %2217 }
 0xc26   : > { %v2219_v47 = vmul.f32 %v2218_v46, %v6700_v58  ;;  %v4745_v46 = vld [vmem:[%s7220_s5 + $0x28] sm:$0xff] }
 0xc27   : > { %2422 = vmatpush.msrb.mxu0 %v4745_v46 }
 0xc28   : > { %v2220_v48 = vsub.f32 %v2213_v44, %v2219_v47  ;;  %v4750_v44 = vld [vmem:[%s7221_s23 + $0x30] sm:$0xff]  ;;  %v4749_v47 = vld [vmem:[%s7221_s23 + $0x28] sm:$0xff] }
 0xc29   : > { %2444 = vmatpush.msrb.mxu1 %v4750_v44 }
 0xc2a   : > { %v2221_v49 = vmul.f32 %v2220_v48, %v2220_v48 }
 0xc2b   : > { %2445 = vmatpush.msrb.mxu1 %v4749_v47 }
 0xc2c   : > { %v2222_v50 = vsel %vm1400_vm2, %v2221_v49, 0.0  ;;  %v4744_v49 = vld [vmem:[%s7220_s5 + $0x20] sm:$0xff] }
 0xc2d   : > { %2223 = vadd.xlane.f32.xlu2 %v2222_v50  ;;  %v4748_v50 = vld [vmem:[%s7221_s23 + $0x20] sm:$0xff]  ;;  %2423 = vmatpush.msrb.mxu0 %v4744_v49 }
 0xc2e   : > { %2446 = vmatpush.msrb.mxu1 %v4748_v50 }
 0xca0   : > { %v2224_v57 = vpop.xlane.xlu2 %2223 }
 0xca1   : > { %v2225_v59 = vmul.f32 %v2224_v57, %v6700_v58 }
 0xca3   : > { %v2226_v61 = vadd.f32 1e-05, %v2225_v59 }
 0xca5   : > { %5249 = vrsqrt.f32 %v2226_v61  ;;  %vm2233_vm10 = vweird.f32 %v2226_v61 }
 0xcab   : > { %v5250_v2 = vpop.eup %5249 }
 0xcac   : > { %v2228_v4 = vmul.f32 %v5250_v2, %v2226_v61  ;;  %vm2234_vm9 = vweird.f32 %v5250_v2 }
 0xcad   : > { %vm2235_vm11 = vmor %vm2233_vm10, %vm2234_vm9 }
 0xcae   : > { %v2229_v6 = vmul.f32 %v5250_v2, %v2228_v4 }
 0xcb0   : > { %v2230_v8 = vmul.f32 0.5, %v2229_v6 }
 0xcb2   : > { %v2231_v10 = vsub.f32 1.5, %v2230_v8  ;;  %v5182_v8 = vld [vmem:[%s7223_s3 + $0x1] ss:$0 sm:$0xff] }
 0xcb4   : > { %v2232_v12 = vmul.f32 %v5250_v2, %v2231_v10 }
 0xcb6   : > { %v2236_v14 = vsel %vm2235_vm11, %v5250_v2, %v2232_v12  ;;  %v5180_v2 = vld [vmem:[%s7225_s28 + $0x1] ss:$0 sm:$0xff] }
 0xcb7   : > { %v2237_v15 = vmul.f32 %v2236_v14, %v2220_v48  ;;  %v4740_v48 = vld [vmem:[%s7219_s22 + $0x20] sm:$0xff] }
 0xcb8   : > { %2400 = vmatpush.msrb.mxu3 %v4740_v48 }
 0xcb9   : > { %v2241_v17 = vmul.f32 %v5174_v13, %v2237_v15 }
 0xcbb   : > { %v2245_v18 = vadd.f32 %v5175_v16, %v2241_v17 }
 0xcbd   : > { %4739 = vmatmul.msk.f32.vlgmr.msra.gmra.mxu1 %vm1400_vm2, %v2245_v18 }
 0xd3a   : > { %v2274_v25 = vpop.f32.mrf.mxu1 }
 0xd3b   : > { %v2275_v26 = vadd.f32 %v5176_v24, %v2274_v25 }
 0xd3d   : > { %v2277_v27 = vmax.f32 %v2275_v26, 0.0 }
 0xd3f   : > { %2314 = vmatmul.f32.vlgmr.msrb.gmra.mxu2 %v2277_v27 }
 0xdc2   : > { %v2315_v29 = vpop.f32.mrf.mxu2 }
 0xdc3   : > { %v2316_v30 = vadd.f32 %v5177_v28, %v2315_v29 }
 0xdc5   : > { %v2318_v31 = vadd.f32 %v2316_v30, %v2245_v18 }
 0xdc7   : > { %v2321_v32 = vsel %vm1400_vm2, %v2318_v31, 0.0 }
 0xdc8   : > { %2322 = vadd.xlane.f32.xlu1 %v2321_v32 }
 0xe3b   : > { %v2323_v33 = vpop.xlane.xlu1 %2322 }
 0xe3c   : > { %v2324_v34 = vmul.f32 %v2323_v33, %v6700_v58 }
 0xe3e   : > { %v2325_v35 = vsub.f32 %v2318_v31, %v2324_v34 }
 0xe40   : > { %v2326_v36 = vmul.f32 %v2325_v35, %v2325_v35 }
 0xe42   : > { %v2327_v37 = vsel %vm1400_vm2, %v2326_v36, 0.0 }
 0xe43   : > { %2328 = vadd.xlane.f32.xlu2 %v2327_v37 }
 0xeb6   : > { %v2329_v51 = vpop.xlane.xlu2 %2328 }
 0xeb7   : > { %v2330_v52 = vmul.f32 %v2329_v51, %v6700_v58 }
 0xeb9   : > { %v2331_v21 = vadd.f32 1e-05, %v2330_v52 }
 0xebb   : > { %5251 = vrsqrt.f32 %v2331_v21  ;;  %vm2338_vm13 = vweird.f32 %v2331_v21 }
 0xec1   : > { %v5252_v53 = vpop.eup %5251 }
 0xec2   : > { %v2333_v23 = vmul.f32 %v5252_v53, %v2331_v21  ;;  %vm2339_vm12 = vweird.f32 %v5252_v53 }
 0xec3   : > { %vm2340_vm14 = vmor %vm2338_vm13, %vm2339_vm12 }
 0xec4   : > { %v2334_v55 = vmul.f32 %v5252_v53, %v2333_v23 }
 0xec6   : > { %v2335_v56 = vmul.f32 0.5, %v2334_v55 }
 0xec8   : > { %v2336_v57 = vsub.f32 1.5, %v2335_v56 }
 0xeca   : > { %v2337_v59 = vmul.f32 %v5252_v53, %v2336_v57 }
 0xecc   : > { %v2341_v61 = vsel %vm2340_vm14, %v5252_v53, %v2337_v59 }
 0xecd   : > { %v2342_v62 = vmul.f32 %v2341_v61, %v2325_v35 }
 0xecf   : > { %v2346_v0 = vmul.f32 %v5178_v60, %v2342_v62 }
 0xed1   : > { %v6789_v1 = vadd.f32 %v5179_v63, %v2346_v0 }
 0xed3   : > { %4758 = vmatmul.msk.f32.vlgmr.msrb.gmra.mxu3 %vm1400_vm2, %v6789_v1  ;;  %4759 = vmatmul.msk.f32.vlgmr.msrb.gmra.mxu0 %vm1400_vm2, %v6789_v1 }
 0xed4   : > { %4760 = vmatmul.msk.f32.vlgmr.msrb.gmra.mxu1 %vm1400_vm2, %v6789_v1 }
 0xf50   : > { %v2425_v4 = vpop.f32.mrf.mxu0 }
 0xf51   : > { %v2426_v5 = vadd.f32 %v5180_v2, %v2425_v4  ;;  %v2448_v6 = vpop.f32.mrf.mxu1 }
 0xf52   : > { %v6798_v7 = vadd.f32 %v5181_v3, %v2448_v6 }
 0xf53   : > { %2515 = vrot.lane.b32.xlu0 %v2426_v5, %s7231_s14  ;;  %4761 = vmatpush.xpose.msk.msra.mxu3 %vm1470_vm3, %v2426_v5 }
 0xf54   : > { %2508 = vmatpush.msra.mxu0 %v6798_v7 }
 0xf56   : > { %v2402_v9 = vpop.f32.mrf.mxu3 }
 0xf57   : > { %v2403_v10 = vadd.f32 %v5182_v8, %v2402_v9 }
 0xf59   : > { %2513 = vrot.lane.b32.xlu1 %v2403_v10, %s7231_s14  ;;  %4762 = vmatmul.msk.f32.vlgmr.msra.gmra.mxu3 %vm1470_vm3, %v2403_v10 }
 0xf61   : > { %2555 = vrot.lane.b32.xlu1 %v6798_v7, %s7231_s14 }
 0xf69   : > { %2648 = vrot.lane.b32.xlu1 %v2403_v10, %s7232_s11 }
 0xf71   : > { %2583 = vrot.lane.b32.xlu1 %v2426_v5, %s7233_s7 }
 0xf79   : > { %2581 = vrot.lane.b32.xlu1 %v2403_v10, %s7233_s7 }
 0xfc5   : > { %v2516_v11 = vpop.permute.xlu0 %2515 }
 0xfc6   : > { %4764 = vmatpush.xpose.msk.msra.mxu1 %vm1470_vm3, %v2516_v11  ;;  %v4755_v11 = vld [vmem:[%s7227_s1 + $0x38] sm:$0xff] }
 0xfcb   : > { %v2514_v12 = vpop.permute.xlu1 %2513 }
 0xfcc   : > { %4765 = vmatmul.msk.f32.vlgmr.msra.gmra.mxu1 %vm1470_vm3, %v2514_v12  ;;  %v4754_v12 = vld [vmem:[%s7227_s1 + $0x30] sm:$0xff] }
 0xfd3   : > { %v2556_v13 = vpop.permute.xlu1 %2555 }
 0xfd4   : > { %2576 = vmatpush.msrb.mxu3 %v2556_v13  ;;  %v4753_v13 = vld [vmem:[%s7227_s1 + $0x28] sm:$0xff] }
 0xfdb   : > { %v2649_v14 = vpop.permute.xlu1 %2648 }
 0xfdc   : > { %v2474_v18 = vpop.f32.mrf.mxu3 }
 0xfdd   : > { %v2477_v20 = vmul.f32 0.35355338, %v2474_v18 }
 0xfdf   : > { %v2478_v24 = vadd.f32 %v2477_v20, %v6653_v40 }
 0xfe1   : > { %v2479_v25 = vsel %vm1470_vm3, %v2478_v24, -inf }
 0xfe3   : > { %v2584_v15 = vpop.permute.xlu1 %2583 }
 0xfe4   : > { %4767 = vmatpush.xpose.msk.msrb.mxu0 %vm1470_vm3, %v2584_v15 }
 0xfeb   : > { %v2582_v44 = vpop.permute.xlu1 %2581 }
0x1049   : > { %v2538_v16 = vpop.f32.mrf.mxu1 }
0x104a   : > { %v2541_v17 = vmul.f32 0.35355338, %v2538_v16 }
0x104c   : > { %v2542_v19 = vadd.f32 %v2541_v17, %v6653_v40 }
0x104e   : > { %v2543_v22 = vsel %vm1470_vm3, %v2542_v19, -inf }
0x104f   : > { %2544 = vmax.xlane.f32.xlu2 %v2543_v22  ;;  %v5183_v22 = vld [vmem:[#allocation5 + $0x1] ss:$0 sm:$0xff] }
0x1057   : > { %2480 = vmax.xlane.f32.xlu2 %v2479_v25 }
0x10c2   : > { %v2545_v26 = vpop.xlane.xlu2 %2544 }
0x10c3   : > { %v2546_v27 = vsub.f32 %v2542_v19, %v2545_v26 }
0x10c5   : > { %v2547_v28 = vmul.f32 1.442695, %v2546_v27 }
0x10c7   : > { %5253 = vpow2.f32 %v2547_v28  ;;  %v2800_v28 = vld [vmem:[#allocation10 + $0x38] sm:$0xff] }
0x10ca   : > { %v2481_v29 = vpop.xlane.xlu2 %2480 }
0x10cb   : > { %v2482_v30 = vsub.f32 %v2478_v24, %v2481_v29  ;;  %v2799_v29 = vld [vmem:[#allocation10 + $0x30] sm:$0xff] }
0x10cd   : > { %v5254_v31 = vpop.eup %5253  ;;  %v2483_v32 = vmul.f32 1.442695, %v2482_v30  ;;  %v2798_v30 = vld [vmem:[#allocation10 + $0x28] sm:$0xff] }
0x10ce   : > { %v2549_v33 = vsel %vm1470_vm3, %v5254_v31, 0.0 }
0x10cf   : > { %5255 = vpow2.f32 %v2483_v32  ;;  %2550 = vadd.xlane.f32.xlu0 %v2549_v33 }
0x10d5   : > { %v5256_v34 = vpop.eup %5255 }
0x10d6   : > { %v2485_v35 = vsel %vm1470_vm3, %v5256_v34, 0.0 }
0x10d7   : > { %2486 = vadd.xlane.f32.xlu2 %v2485_v35 }
0x10ef   : > { %2650 = vrot.lane.b32.xlu2 %v2426_v5, %s7232_s11 }
0x1142   : > { %v2551_v36 = vpop.xlane.xlu0 %2550 }
0x1143   : > { %5257 = vrcp.f32 %v2551_v36  ;;  %v4777_v36 = vld [vmem:[%s7230_s12 + $0x38] sm:$0xff] }
0x1144   : > { %2837 = vmatpush.msra.mxu2 %v4777_v36 }
0x1149   : > { %v5258_v37 = vpop.eup %5257 }
0x114a   : > { %v2553_v38 = vmul.f32 %v5258_v37, %v5254_v31  ;;  %v2487_v39 = vpop.xlane.xlu2 %2486  ;;  %v2797_v31 = vld [vmem:[#allocation10 + $0x20] sm:$0xff] }
0x114b   : > { %5259 = vrcp.f32 %v2487_v39  ;;  %v4776_v37 = vld [vmem:[%s7230_s12 + $0x30] sm:$0xff]  ;;  %v4774_v39 = vld [vmem:[%s7230_s12 + $0x20] sm:$0xff] }
0x114c   : > { %4766 = vmatmul.msk.f32.vlgmr.msrb.gmra.mxu3 %vm1470_vm3, %v2553_v38  ;;  %2838 = vmatpush.msra.mxu2 %v4776_v37  ;;  %v4775_v38 = vld [vmem:[%s7230_s12 + $0x28] sm:$0xff] }
0x114e   : > { %2839 = vmatpush.msra.mxu2 %v4775_v38 }
0x1150   : > { %2840 = vmatpush.msra.mxu2 %v4774_v39 }
0x1151   : > { %v5260_v41 = vpop.eup %5259 }
0x1152   : > { %v2489_v42 = vmul.f32 %v5260_v41, %v5256_v34  ;;  %v2651_v43 = vpop.permute.xlu2 %2650  ;;  %v5186_v41 = vld [vmem:[#allocation16 + $0x1] ss:$0 sm:$0xff] }
0x1153   : > { %4770 = vmatpush.xpose.msk.msra.mxu3 %vm1470_vm3, %v2651_v43 }
0x1154   : > { %4763 = vmatmul.msk.f32.vlgmr.msra.gmra.mxu0 %vm1470_vm3, %v2489_v42 }
0x1156   : > { %4771 = vmatmul.msk.f32.vlgmr.msra.gmra.mxu3 %vm1470_vm3, %v2649_v14  ;;  %v4752_v14 = vld [vmem:[%s7227_s1 + $0x20] sm:$0xff] }
0x1157   : > { %2860 = vmatpush.msrb.mxu3 %v2800_v28 }
0x1159   : > { %2861 = vmatpush.msrb.mxu3 %v2799_v29 }
0x115b   : > { %2862 = vmatpush.msrb.mxu3 %v2798_v30 }
0x115c   : > { %4768 = vmatmul.msk.f32.vlgmr.msrb.gmra.mxu0 %vm1470_vm3, %v2582_v44 }
0x115d   : > { %2863 = vmatpush.msrb.mxu3 %v2797_v31 }
0x115e   : > { %4779 = vmatmul.msk.f32.vlgmr.msrb.gmra.mxu3 %vm1400_vm2, %v6696_v54 }
0x11cf   : > { %v2578_v45 = vpop.f32.mrf.mxu3 }
0x11d1   : > { %v2510_v46 = vpop.f32.mrf.mxu0 }
0x11d9   : > { %v2606_v47 = vpop.f32.mrf.mxu0  ;;  %v2673_v48 = vpop.f32.mrf.mxu3 }
0x11da   : > { %v2609_v49 = vmul.f32 0.35355338, %v2606_v47  ;;  %v2676_v50 = vmul.f32 0.35355338, %v2673_v48 }
0x11dc   : > { %v2610_v51 = vadd.f32 %v2609_v49, %v6653_v40  ;;  %v2677_v52 = vadd.f32 %v2676_v50, %v6653_v40 }
0x11de   : > { %v2611_v21 = vsel %vm1470_vm3, %v2610_v51, -inf  ;;  %v2678_v53 = vsel %vm1470_vm3, %v2677_v52, -inf }
0x11df   : > { %2612 = vmax.xlane.f32.xlu2 %v2611_v21  ;;  %2679 = vmax.xlane.f32.xlu1 %v2678_v53 }
0x11e1   : > { %v2865_v42 = vpop.f32.mrf.mxu3 }
0x11e2   : > { %v2866_v43 = vadd.f32 %v5186_v41, %v2865_v42 }
0x11f7   : > { %2689 = vrot.lane.b32.xlu2 %v6798_v7, %s7232_s11 }
0x1252   : > { %v2613_v23 = vpop.xlane.xlu2 %2612  ;;  %v2680_v55 = vpop.xlane.xlu1 %2679 }
0x1253   : > { %v2614_v56 = vsub.f32 %v2610_v51, %v2613_v23  ;;  %v2681_v59 = vsub.f32 %v2677_v52, %v2680_v55  ;;  %v5184_v52 = vld [vmem:[#allocation7 + $0x1] ss:$0 sm:$0xff]  ;;  %v5185_v23 = vld [vmem:[#allocation8 + $0x1] ss:$0 sm:$0xff] }
0x1255   : > { %v2615_v57 = vmul.f32 1.442695, %v2614_v56  ;;  %v2682_v60 = vmul.f32 1.442695, %v2681_v59 }
0x1257   : > { %5261 = vpow2.f32 %v2615_v57 }
0x1258   : > { %5263 = vpow2.f32 %v2682_v60 }
0x125a   : > { %v2690_v61 = vpop.permute.xlu2 %2689 }
0x125b   : > { %2710 = vmatpush.msra.mxu0 %v2690_v61  ;;  %v5187_v61 = vld [vmem:[#allocation14 + $0x1] ss:$0 sm:$0xff] }
0x125d   : > { %v5262_v62 = vpop.eup %5261 }
0x125e   : > { %v2617_v40 = vsel %vm1470_vm3, %v5262_v62, 0.0  ;;  %v5264_v63 = vpop.eup %5263 }
0x125f   : > { %2618 = vadd.xlane.f32.xlu0 %v2617_v40  ;;  %v2684_v0 = vsel %vm1470_vm3, %v5264_v63, 0.0 }
0x1267   : > { %2685 = vadd.xlane.f32.xlu0 %v2684_v0 }
0x127b   : > { %2622 = vrot.lane.b32.xlu0 %v6798_v7, %s7233_s7 }
0x1283   : > { %2716 = vrot.lane.b32.xlu0 %v2578_v45, %s7234_s10 }
0x12d2   : > { %v2619_v2 = vpop.xlane.xlu0 %2618 }
0x12da   : > { %v2686_v3 = vpop.xlane.xlu0 %2685 }
0x12db   : > { %5265 = vrcp.f32 %v2686_v3 }
0x12dc   : > { %5267 = vrcp.f32 %v2619_v2 }
0x12e1   : > { %v5266_v4 = vpop.eup %5265 }
0x12e2   : > { %v2688_v5 = vmul.f32 %v5266_v4, %v5264_v63  ;;  %v5268_v6 = vpop.eup %5267 }
0x12e3   : > { %v2621_v8 = vmul.f32 %v5268_v6, %v5262_v62  ;;  %v2805_v6 = vld [vmem:[#allocation11 + $0x38] sm:$0xff] }
0x12e4   : > { %4772 = vmatmul.msk.f32.vlgmr.msra.gmra.mxu0 %vm1470_vm3, %v2688_v5 }
0x12e5   : > { %2883 = vmatpush.msrb.mxu0 %v2805_v6 }
0x12ed   : > { %v2623_v9 = vpop.permute.xlu0 %2622 }
0x12ee   : > { %2643 = vmatpush.msrb.mxu1 %v2623_v9  ;;  %v2803_v9 = vld [vmem:[#allocation11 + $0x28] sm:$0xff] }
0x12ef   : > { %4769 = vmatmul.msk.f32.vlgmr.msrb.gmra.mxu1 %vm1470_vm3, %v2621_v8  ;;  %v2804_v8 = vld [vmem:[#allocation11 + $0x30] sm:$0xff] }
0x12f0   : > { %2748 = vmatpush.msra.mxu1 %v4755_v11  ;;  %2884 = vmatpush.msrb.mxu0 %v2804_v8 }
0x12f2   : > { %2749 = vmatpush.msra.mxu1 %v4754_v12  ;;  %2885 = vmatpush.msrb.mxu0 %v2803_v9 }
0x12f4   : > { %2750 = vmatpush.msra.mxu1 %v4753_v13 }
0x12f5   : > { %v2717_v15 = vpop.permute.xlu0 %2716 }
0x12f6   : > { %2751 = vmatpush.msra.mxu1 %v4752_v14  ;;  %v2727_v16 = vsel %vm1470_vm3, %v2510_v46, %v2717_v15 }
0x12f8   : > { %4781 = vmatpush.xpose.msk.msrb.mxu1 %vm1470_vm3, %v2866_v43 }
0x1361   : > { %v2712_v7 = vpop.f32.mrf.mxu0 }
0x1362   : > { %2724 = vrot.lane.b32.xlu0 %v2712_v7, %s7236_s4  ;;  %v2802_v7 = vld [vmem:[#allocation11 + $0x20] sm:$0xff] }
0x1363   : > { %2886 = vmatpush.msrb.mxu0 %v2802_v7 }
0x136c   : > { %v2645_v10 = vpop.f32.mrf.mxu1 }
0x136d   : > { %2720 = vrot.lane.b32.xlu1 %v2645_v10, %s7235_s2  ;;  %v6880_v10 = vld [vmem:[%s6693_s0] sm:$0xff] }
0x136e   : > { %4780 = vmatmul.msk.f32.vlgmr.msrb.gmra.mxu0 %vm1400_vm2, %v6880_v10 }
0x1375   : > { %2954 = vrot.lane.b32.xlu1 %v2866_v43, %s7231_s14 }
0x137d   : > { %3021 = vrot.lane.b32.xlu1 %v2866_v43, %s7233_s7 }
0x1385   : > { %3087 = vrot.lane.b32.xlu1 %v2866_v43, %s7232_s11 }
0x13d4   : > { %v2725_v18 = vpop.permute.xlu0 %2724 }
0x13df   : > { %v2721_v17 = vpop.permute.xlu1 %2720 }
0x13e0   : > { %v2728_v19 = vsel %vm1353_vm0, %v2727_v16, %v2721_v17 }
0x13e1   : > { %v2729_v20 = vsel %vm1749_vm4, %v2728_v19, %v2725_v18 }
0x13e2   : > { %4773 = vmatmul.msk.f32.vlgmr.msra.gmra.mxu1 %vm1400_vm2, %v2729_v20 }
0x13e7   : > { %v2955_v57 = vpop.permute.xlu1 %2954 }
0x13e8   : > { %4784 = vmatpush.xpose.msk.msra.mxu3 %vm1470_vm3, %v2955_v57 }
0x13eb   : > { %v2888_v28 = vpop.f32.mrf.mxu0 }
0x13ef   : > { %v3022_v59 = vpop.permute.xlu1 %3021 }
0x13f0   : > { %4787 = vmatpush.xpose.msk.msra.mxu1 %vm1470_vm3, %v3022_v59 }
0x13f7   : > { %v3088_v60 = vpop.permute.xlu1 %3087 }
0x13f8   : > { %4790 = vmatpush.xpose.msk.msrb.mxu3 %vm1470_vm3, %v3088_v60 }
0x145f   : > { %v2753_v24 = vpop.f32.mrf.mxu1 }
0x1460   : > { %v2754_v25 = vadd.f32 %v5183_v22, %v2753_v24 }
0x1462   : > { %v2756_v26 = vadd.f32 %v2754_v25, %v6789_v1 }
0x1464   : > { %v2761_v27 = vsel %vm1400_vm2, %v2756_v26, 0.0 }
0x1465   : > { %2762 = vadd.xlane.f32.xlu0 %v2761_v27  ;;  %v5188_v27 = vld [vmem:[#allocation17 + $0x1] ss:$0 sm:$0xff] }
0x1466   : > { %v2889_v29 = vadd.f32 %v5188_v27, %v2888_v28  ;;  %v4809_v27 = vld [vmem:[%s7237_s6 + $0xf0] sm:$0xff]  ;;  %v4808_v28 = vld [vmem:[%s7237_s6 + $0xe8] sm:$0xff] }
0x1468   : > { %2947 = vmatpush.msrb.mxu2 %v2889_v29 }
0x14d8   : > { %v2763_v32 = vpop.xlane.xlu0 %2762 }
0x14d9   : > { %v2764_v1 = vmul.f32 %v2763_v32, %v6700_v58 }
0x14db   : > { %v2765_v33 = vsub.f32 %v2756_v26, %v2764_v1 }
0x14dd   : > { %v2766_v34 = vmul.f32 %v2765_v33, %v2765_v33 }
0x14df   : > { %v2767_v35 = vsel %vm1400_vm2, %v2766_v34, 0.0 }
0x14e0   : > { %2768 = vadd.xlane.f32.xlu2 %v2767_v35 }
0x1553   : > { %v2769_v54 = vpop.xlane.xlu2 %2768 }
0x1554   : > { %v2770_v44 = vmul.f32 %v2769_v54, %v6700_v58 }
0x1556   : > { %v2771_v45 = vadd.f32 1e-05, %v2770_v44 }
0x1558   : > { %5269 = vrsqrt.f32 %v2771_v45  ;;  %vm2778_vm1 = vweird.f32 %v2771_v45 }
0x155e   : > { %v5270_v46 = vpop.eup %5269 }
0x155f   : > { %v2773_v47 = vmul.f32 %v5270_v46, %v2771_v45  ;;  %vm2779_vm15 = vweird.f32 %v5270_v46 }
0x1560   : > { %vm2780_vm5 = vmor %vm2778_vm1, %vm2779_vm15 }
0x1561   : > { %v2774_v48 = vmul.f32 %v5270_v46, %v2773_v47 }
0x1563   : > { %v2775_v49 = vmul.f32 0.5, %v2774_v48 }
0x1565   : > { %v2776_v50 = vsub.f32 1.5, %v2775_v49 }
0x1567   : > { %v2777_v51 = vmul.f32 %v5270_v46, %v2776_v50 }
0x1569   : > { %v2781_v21 = vsel %vm2780_vm5, %v5270_v46, %v2777_v51 }
0x156a   : > { %v2782_v53 = vmul.f32 %v2781_v21, %v2765_v33 }
0x156c   : > { %v2786_v55 = vmul.f32 %v5184_v52, %v2782_v53 }
0x156e   : > { %v6864_v56 = vadd.f32 %v5185_v23, %v2786_v55 }
0x1570   : > { %4778 = vmatmul.msk.f32.vlgmr.msra.gmra.mxu2 %vm1400_vm2, %v6864_v56 }
0x15f3   : > { %v2842_v62 = vpop.f32.mrf.mxu2 }
0x15f4   : > { %v2843_v40 = vadd.f32 %v5187_v61, %v2842_v62 }
0x15f6   : > { %3019 = vrot.lane.b32.xlu0 %v2843_v40, %s7233_s7  ;;  %2952 = vrot.lane.b32.xlu1 %v2843_v40, %s7231_s14 }
0x15f7   : > { %4782 = vmatmul.msk.f32.vlgmr.msrb.gmra.mxu1 %vm1470_vm3, %v2843_v40 }
0x15fe   : > { %3085 = vrot.lane.b32.xlu1 %v2843_v40, %s7232_s11 }
0x1668   : > { %v3020_v63 = vpop.permute.xlu0 %3019  ;;  %v2953_v0 = vpop.permute.xlu1 %2952 }
0x1669   : > { %4785 = vmatmul.msk.f32.vlgmr.msra.gmra.mxu3 %vm1470_vm3, %v2953_v0  ;;  %4788 = vmatmul.msk.f32.vlgmr.msra.gmra.mxu1 %vm1470_vm3, %v3020_v63  ;;  %v2810_v63 = vld [vmem:[#allocation13 + $0x38] sm:$0xff]  ;;  %v2809_v0 = vld [vmem:[#allocation13 + $0x30] sm:$0xff] }
0x166a   : > { %3184 = vmatpush.msrb.mxu1 %v2810_v63 }
0x166c   : > { %3185 = vmatpush.msrb.mxu1 %v2809_v0 }
0x1670   : > { %v3086_v2 = vpop.permute.xlu1 %3085 }
0x1671   : > { %4791 = vmatmul.msk.f32.vlgmr.msrb.gmra.mxu3 %vm1470_vm3, %v3086_v2  ;;  %v2808_v2 = vld [vmem:[#allocation13 + $0x28] sm:$0xff] }
0x1672   : > { %3186 = vmatpush.msrb.mxu1 %v2808_v2 }
0x1674   : > { %v2914_v3 = vpop.f32.mrf.mxu1 }
0x1675   : > { %v2917_v4 = vmul.f32 0.35355338, %v2914_v3  ;;  %v2807_v3 = vld [vmem:[#allocation13 + $0x20] sm:$0xff] }
0x1676   : > { %3187 = vmatpush.msrb.mxu1 %v2807_v3 }
0x1677   : > { %v2918_v5 = vsel %vm1470_vm3, %v2917_v4, -inf }
0x1678   : > { %2919 = vmax.xlane.f32.xlu2 %v2918_v5 }
0x16e6   : > { %v3044_v11 = vpop.f32.mrf.mxu1 }
0x16e7   : > { %v3047_v12 = vmul.f32 0.35355338, %v3044_v11  ;;  %v5189_v11 = vld [vmem:[#allocation19 + $0x1] ss:$0 sm:$0xff] }
0x16e9   : > { %v3048_v13 = vsel %vm1470_vm3, %v3047_v12, -inf }
0x16ea   : > { %3049 = vmax.xlane.f32.xlu2 %v3048_v13 }
0x16eb   : > { %v2920_v14 = vpop.xlane.xlu2 %2919 }
0x16ec   : > { %v2921_v15 = vsub.f32 %v2917_v4, %v2920_v14  ;;  %v2977_v16 = vpop.f32.mrf.mxu3 }
0x16ed   : > { %v2980_v17 = vmul.f32 0.35355338, %v2977_v16 }
0x16ee   : > { %v2922_v18 = vmul.f32 1.442695, %v2921_v15 }
0x16ef   : > { %v2981_v19 = vsel %vm1470_vm3, %v2980_v17, -inf }
0x16f0   : > { %5271 = vpow2.f32 %v2922_v18  ;;  %2982 = vmax.xlane.f32.xlu1 %v2981_v19 }
0x16f4   : > { %v3110_v20 = vpop.f32.mrf.mxu3 }
0x16f5   : > { %v3113_v22 = vmul.f32 0.35355338, %v3110_v20 }
0x16f6   : > { %v5272_v24 = vpop.eup %5271 }
0x16f7   : > { %v2924_v25 = vsel %vm1470_vm3, %v5272_v24, 0.0  ;;  %v3114_v26 = vsel %vm1470_vm3, %v3113_v22, -inf }
0x16f8   : > { %2925 = vadd.xlane.f32.xlu2 %v2924_v25  ;;  %3115 = vmax.xlane.f32.xlu0 %v3114_v26  ;;  %v3228_v25 = vld [vmem:[#allocation23 + $0x20] sm:$0xff]  ;;  %v4810_v26 = vld [vmem:[%s7237_s6 + $0xf8] sm:$0xff] }
0x16f9   : > { %3283 = vmatpush.msra.mxu3 %v4810_v26 }
0x16fb   : > { %3284 = vmatpush.msra.mxu3 %v4809_v27 }
0x16fd   : > { %3285 = vmatpush.msra.mxu3 %v4808_v28 }
0x1709   : > { %3059 = vrot.lane.b32.xlu1 %v2889_v29, %s7233_s7 }
0x170c   : > { %3125 = vrot.lane.b32.xlu0 %v2889_v29, %s7232_s11 }
0x175d   : > { %v3050_v30 = vpop.xlane.xlu2 %3049 }
0x175e   : > { %v3051_v31 = vsub.f32 %v3047_v12, %v3050_v30 }
0x1760   : > { %v3052_v32 = vmul.f32 1.442695, %v3051_v31  ;;  %v4807_v31 = vld [vmem:[%s7237_s6 + $0xe0] sm:$0xff] }
0x1761   : > { %3286 = vmatpush.msra.mxu3 %v4807_v31 }
0x1762   : > { %5273 = vpow2.f32 %v3052_v32 }
0x1763   : > { %v2983_v1 = vpop.xlane.xlu1 %2982 }
0x1764   : > { %v2984_v33 = vsub.f32 %v2980_v17, %v2983_v1  ;;  %v4806_v1 = vld [vmem:[%s7237_s6 + $0xd8] sm:$0xff] }
0x1765   : > { %3287 = vmatpush.msra.mxu3 %v4806_v1  ;;  %v5195_v1 = vld [vmem:[#allocation29 + $0x1] ss:$0 sm:$0xff] }
0x1766   : > { %v2985_v34 = vmul.f32 1.442695, %v2984_v33  ;;  %v4805_v33 = vld [vmem:[%s7237_s6 + $0xd0] sm:$0xff] }
0x1767   : > { %3288 = vmatpush.msra.mxu3 %v4805_v33 }
0x1768   : > { %v5274_v35 = vpop.eup %5273  ;;  %5275 = vpow2.f32 %v2985_v34  ;;  %v4804_v34 = vld [vmem:[%s7237_s6 + $0xc8] sm:$0xff] }
0x1769   : > { %v3054_v36 = vsel %vm1470_vm3, %v5274_v35, 0.0  ;;  %3289 = vmatpush.msra.mxu3 %v4804_v34 }
0x176a   : > { %3055 = vadd.xlane.f32.xlu2 %v3054_v36 }
0x176b   : > { %v2926_v37 = vpop.xlane.xlu2 %2925  ;;  %v3116_v38 = vpop.xlane.xlu0 %3115 }
0x176c   : > { %5277 = vrcp.f32 %v2926_v37  ;;  %v3117_v39 = vsub.f32 %v3113_v22, %v3116_v38  ;;  %v3231_v22 = vld [vmem:[#allocation23 + $0x38] sm:$0xff]  ;;  %v4802_v37 = vld [vmem:[%s7237_s6 + $0xb8] sm:$0xff] }
0x176e   : > { %v5276_v41 = vpop.eup %5275  ;;  %v3118_v42 = vmul.f32 1.442695, %v3117_v39  ;;  %v4801_v39 = vld [vmem:[%s7237_s6 + $0xb0] sm:$0xff] }
0x176f   : > { %v2987_v43 = vsel %vm1470_vm3, %v5276_v41, 0.0 }
0x1770   : > { %5279 = vpow2.f32 %v3118_v42  ;;  %v4800_v42 = vld [vmem:[%s7237_s6 + $0xa8] sm:$0xff] }
0x1772   : > { %v5278_v54 = vpop.eup %5277  ;;  %2988 = vadd.xlane.f32.xlu2 %v2987_v43 }
0x1773   : > { %v2928_v44 = vmul.f32 %v5278_v54, %v5272_v24  ;;  %v3230_v24 = vld [vmem:[#allocation23 + $0x30] sm:$0xff]  ;;  %v4799_v54 = vld [vmem:[%s7237_s6 + $0xa0] sm:$0xff] }
0x1775   : > { %4783 = vmatmul.msk.f32.vlgmr.msrb.gmra.mxu2 %vm1470_vm3, %v2928_v44 }
0x1776   : > { %v5280_v45 = vpop.eup %5279 }
0x1777   : > { %v3120_v46 = vsel %vm1470_vm3, %v5280_v45, 0.0 }
0x177a   : > { %3121 = vadd.xlane.f32.xlu2 %v3120_v46 }
0x177b   : > { %v3060_v47 = vpop.permute.xlu1 %3059 }
0x177c   : > { %3080 = vmatpush.msra.mxu2 %v3060_v47  ;;  %v5190_v47 = vld [vmem:[#allocation20 + $0x1] ss:$0 sm:$0xff] }
0x177e   : > { %v3126_v55 = vpop.permute.xlu0 %3125  ;;  %3252 = vmatpush.msrb.mxu2 %v3231_v22 }
0x1780   : > { %3253 = vmatpush.msrb.mxu2 %v3230_v24 }
0x1792   : > { %2993 = vrot.lane.b32.xlu2 %v2889_v29, %s7231_s14 }
0x17dd   : > { %v3056_v48 = vpop.xlane.xlu2 %3055 }
0x17de   : > { %5281 = vrcp.f32 %v3056_v48 }
0x17e4   : > { %v5282_v49 = vpop.eup %5281 }
0x17e5   : > { %v3058_v50 = vmul.f32 %v5282_v49, %v5274_v35  ;;  %v2989_v51 = vpop.xlane.xlu2 %2988  ;;  %v4803_v35 = vld [vmem:[%s7237_s6 + $0xc0] sm:$0xff] }
0x17e6   : > { %5283 = vrcp.f32 %v2989_v51  ;;  %3290 = vmatpush.msra.mxu3 %v4803_v35  ;;  %v5196_v35 = vld [vmem:[%s7223_s3 + $0x2] ss:$0 sm:$0xff] }
0x17e7   : > { %4789 = vmatmul.msk.f32.vlgmr.msra.gmra.mxu2 %vm1470_vm3, %v3058_v50  ;;  %v5191_v50 = vld [vmem:[#allocation22 + $0x1] ss:$0 sm:$0xff] }
0x17e8   : > { %3291 = vmatpush.msra.mxu3 %v4802_v37 }
0x17ea   : > { %3292 = vmatpush.msra.mxu3 %v4801_v39 }
0x17ec   : > { %v5284_v21 = vpop.eup %5283  ;;  %3293 = vmatpush.msra.mxu3 %v4800_v42  ;;  %v5198_v42 = vld [vmem:[#allocation2 + $0x2] ss:$0 sm:$0xff] }
0x17ed   : > { %v3122_v52 = vpop.xlane.xlu2 %3121  ;;  %v2991_v53 = vmul.f32 %v5284_v21, %v5276_v41  ;;  %v4797_v21 = vld [vmem:[%s7237_s6 + $0x90] sm:$0xff] }
0x17ee   : > { %5285 = vrcp.f32 %v3122_v52  ;;  %3294 = vmatpush.msra.mxu3 %v4799_v54 }
0x17f4   : > { %v5286_v57 = vpop.eup %5285 }
0x17f5   : > { %v2994_v23 = vpop.permute.xlu2 %2993  ;;  %v3124_v59 = vmul.f32 %v5286_v57, %v5280_v45  ;;  %v4798_v45 = vld [vmem:[%s7237_s6 + $0x98] sm:$0xff] }
0x17f6   : > { %3014 = vmatpush.msra.mxu0 %v2994_v23  ;;  %3295 = vmatpush.msra.mxu3 %v4798_v45  ;;  %v4795_v23 = vld [vmem:[%s7237_s6 + $0x80] sm:$0xff] }
0x17f7   : > { %4786 = vmatmul.msk.f32.vlgmr.msra.gmra.mxu0 %vm1470_vm3, %v2991_v53  ;;  %v4796_v53 = vld [vmem:[%s7237_s6 + $0x88] sm:$0xff] }
0x17f8   : > { %3146 = vmatpush.msrb.mxu0 %v3126_v55  ;;  %v2949_v60 = vpop.f32.mrf.mxu2  ;;  %3296 = vmatpush.msra.mxu3 %v4797_v21  ;;  %v5192_v55 = vld [vmem:[#allocation25 + $0x1] ss:$0 sm:$0xff] }
0x17fa   : > { %3297 = vmatpush.msra.mxu3 %v4796_v53 }
0x17fc   : > { %3298 = vmatpush.msra.mxu3 %v4795_v23 }
0x17ff   : > { %4792 = vmatmul.msk.f32.vlgmr.msrb.gmra.mxu0 %vm1470_vm3, %v3124_v59 }
0x186a   : > { %v3082_v61 = vpop.f32.mrf.mxu2 }
0x186b   : > { %3156 = vrot.lane.b32.xlu1 %v3082_v61, %s7235_s2  ;;  %v5193_v61 = vld [vmem:[#allocation26 + $0x1] ss:$0 sm:$0xff] }
0x1874   : > { %v3016_v62 = vpop.f32.mrf.mxu0 }
0x1875   : > { %3152 = vrot.lane.b32.xlu2 %v3016_v62, %s7234_s10 }
0x187c   : > { %v3148_v40 = vpop.f32.mrf.mxu0 }
0x187d   : > { %3160 = vrot.lane.b32.xlu0 %v3148_v40, %s7236_s4 }
0x18cf   : > { %v3153_v4 = vpop.permute.xlu2 %3152 }
0x18d0   : > { %v3163_v6 = vsel %vm1470_vm3, %v2949_v60, %v3153_v4 }
0x18dd   : > { %v3157_v5 = vpop.permute.xlu1 %3156 }
0x18de   : > { %v3164_v8 = vsel %vm1353_vm0, %v3163_v6, %v3157_v5 }
0x18ef   : > { %v3161_v9 = vpop.permute.xlu0 %3160 }
0x18f0   : > { %v3165_v7 = vsel %vm1749_vm4, %v3164_v8, %v3161_v9  ;;  %v4814_v8 = vld [vmem:[%s7219_s22 + $0x58] sm:$0xff] }
0x18f1   : > { %4793 = vmatmul.msk.f32.vlgmr.msrb.gmra.mxu1 %vm1400_vm2, %v3165_v7  ;;  %v4818_v9 = vld [vmem:[%s7220_s5 + $0x58] sm:$0xff]  ;;  %3384 = vmatpush.msra.mxu0 %v4814_v8 }
0x18f2   : > { %v4822_v7 = vld [vmem:[%s7221_s23 + $0x58] sm:$0xff]  ;;  %3407 = vmatpush.msra.mxu1 %v4818_v9 }
0x196e   : > { %v3189_v12 = vpop.f32.mrf.mxu1 }
0x196f   : > { %v3190_v13 = vadd.f32 %v5189_v11, %v3189_v12  ;;  %v4813_v11 = vld [vmem:[%s7219_s22 + $0x50] sm:$0xff] }
0x1970   : > { %v4817_v12 = vld [vmem:[%s7220_s5 + $0x50] sm:$0xff]  ;;  %3385 = vmatpush.msra.mxu0 %v4813_v11 }
0x1971   : > { %v3192_v14 = vadd.f32 %v3190_v13, %v6864_v56  ;;  %v3229_v56 = vld [vmem:[#allocation23 + $0x28] sm:$0xff]  ;;  %3408 = vmatpush.msra.mxu1 %v4817_v12 }
0x1972   : > { %3254 = vmatpush.msrb.mxu2 %v3229_v56  ;;  %v4821_v13 = vld [vmem:[%s7221_s23 + $0x50] sm:$0xff] }
0x1973   : > { %v3197_v15 = vsel %vm1400_vm2, %v3192_v14, 0.0 }
0x1974   : > { %3198 = vadd.xlane.f32.xlu2 %v3197_v15  ;;  %3255 = vmatpush.msrb.mxu2 %v3228_v25  ;;  %v4816_v15 = vld [vmem:[%s7220_s5 + $0x48] sm:$0xff] }
0x1975   : > { %3409 = vmatpush.msra.mxu1 %v4816_v15 }
0x1976   : > { %3430 = vmatpush.msra.mxu2 %v4822_v7 }
0x1978   : > { %3431 = vmatpush.msra.mxu2 %v4821_v13 }
0x19e7   : > { %v3199_v16 = vpop.xlane.xlu2 %3198 }
0x19e8   : > { %v3200_v17 = vmul.f32 %v3199_v16, %v6700_v58  ;;  %v4820_v16 = vld [vmem:[%s7221_s23 + $0x48] sm:$0xff] }
0x19e9   : > { %3432 = vmatpush.msra.mxu2 %v4820_v16 }
0x19ea   : > { %v3201_v18 = vsub.f32 %v3192_v14, %v3200_v17  ;;  %v4812_v14 = vld [vmem:[%s7219_s22 + $0x48] sm:$0xff]  ;;  %v4811_v17 = vld [vmem:[%s7219_s22 + $0x40] sm:$0xff] }
0x19eb   : > { %3386 = vmatpush.msra.mxu0 %v4812_v14 }
0x19ec   : > { %v3202_v19 = vmul.f32 %v3201_v18, %v3201_v18 }
0x19ed   : > { %3387 = vmatpush.msra.mxu0 %v4811_v17 }
0x19ee   : > { %v3203_v20 = vsel %vm1400_vm2, %v3202_v19, 0.0  ;;  %v4819_v19 = vld [vmem:[%s7221_s23 + $0x40] sm:$0xff] }
0x19ef   : > { %3204 = vadd.xlane.f32.xlu1 %v3203_v20  ;;  %3433 = vmatpush.msra.mxu2 %v4819_v19 }
0x1a62   : > { %v3205_v29 = vpop.xlane.xlu1 %3204 }
0x1a63   : > { %v3206_v30 = vmul.f32 %v3205_v29, %v6700_v58 }
0x1a65   : > { %v3207_v32 = vadd.f32 1e-05, %v3206_v30  ;;  %v5194_v30 = vld [vmem:[#allocation28 + $0x1] ss:$0 sm:$0xff] }
0x1a67   : > { %5287 = vrsqrt.f32 %v3207_v32  ;;  %vm3214_vm7 = vweird.f32 %v3207_v32 }
0x1a6d   : > { %v5288_v36 = vpop.eup %5287 }
0x1a6e   : > { %v3209_v38 = vmul.f32 %v5288_v36, %v3207_v32  ;;  %vm3215_vm6 = vweird.f32 %v5288_v36 }
0x1a6f   : > { %vm3216_vm8 = vmor %vm3214_vm7, %vm3215_vm6 }
0x1a70   : > { %v3210_v41 = vmul.f32 %v5288_v36, %v3209_v38 }
0x1a72   : > { %v3211_v43 = vmul.f32 0.5, %v3210_v41 }
0x1a74   : > { %v3212_v44 = vsub.f32 1.5, %v3211_v43 }
0x1a76   : > { %v3213_v46 = vmul.f32 %v5288_v36, %v3212_v44 }
0x1a78   : > { %v3217_v48 = vsel %vm3216_vm8, %v5288_v36, %v3213_v46  ;;  %v5197_v36 = vld [vmem:[%s7225_s28 + $0x2] ss:$0 sm:$0xff] }
0x1a79   : > { %v3218_v49 = vmul.f32 %v3217_v48, %v3201_v18  ;;  %v4815_v18 = vld [vmem:[%s7220_s5 + $0x40] sm:$0xff] }
0x1a7a   : > { %3410 = vmatpush.msra.mxu1 %v4815_v18 }
0x1a7b   : > { %v3222_v51 = vmul.f32 %v5190_v47, %v3218_v49  ;;  %v5330_v49 = vld [vmem:[%s7226_s16] sm:$0xff] }
0x1a7d   : > { %v3226_v52 = vadd.f32 %v5191_v50, %v3222_v51 }
0x1a7f   : > { %4794 = vmatmul.msk.f32.vlgmr.msrb.gmra.mxu2 %vm1400_vm2, %v3226_v52 }
0x1b02   : > { %v3257_v57 = vpop.f32.mrf.mxu2 }
0x1b03   : > { %v3258_v59 = vadd.f32 %v5192_v55, %v3257_v57 }
0x1b05   : > { %v3260_v60 = vmax.f32 %v3258_v59, 0.0 }
0x1b07   : > { %3299 = vmatmul.f32.vlgmr.msra.gmra.mxu3 %v3260_v60 }
0x1b8a   : > { %v3300_v62 = vpop.f32.mrf.mxu3 }
0x1b8b   : > { %v3301_v40 = vadd.f32 %v5193_v61, %v3300_v62 }
0x1b8d   : > { %v3303_v63 = vadd.f32 %v3301_v40, %v3226_v52 }
0x1b8f   : > { %v3308_v0 = vsel %vm1400_vm2, %v3303_v63, 0.0 }
0x1b90   : > { %3309 = vadd.xlane.f32.xlu0 %v3308_v0 }
0x1c03   : > { %v3310_v2 = vpop.xlane.xlu0 %3309 }
0x1c04   : > { %v3311_v3 = vmul.f32 %v3310_v2, %v6700_v58 }
0x1c06   : > { %v3312_v4 = vsub.f32 %v3303_v63, %v3311_v3 }
0x1c08   : > { %v3313_v5 = vmul.f32 %v3312_v4, %v3312_v4 }
0x1c0a   : > { %v3314_v6 = vsel %vm1400_vm2, %v3313_v5, 0.0 }
0x1c0b   : > { %3315 = vadd.xlane.f32.xlu2 %v3314_v6 }
0x1c7e   : > { %v3316_v20 = vpop.xlane.xlu2 %3315 }
0x1c7f   : > { %v3317_v22 = vmul.f32 %v3316_v20, %v6700_v58 }
0x1c81   : > { %v3318_v24 = vadd.f32 1e-05, %v3317_v22 }
0x1c83   : > { %5289 = vrsqrt.f32 %v3318_v24  ;;  %vm3325_vm10 = vweird.f32 %v3318_v24 }
0x1c89   : > { %v5290_v56 = vpop.eup %5289 }
0x1c8a   : > { %v3320_v25 = vmul.f32 %v5290_v56, %v3318_v24  ;;  %vm3326_vm9 = vweird.f32 %v5290_v56 }
0x1c8b   : > { %vm3327_vm11 = vmor %vm3325_vm10, %vm3326_vm9 }
0x1c8c   : > { %v3321_v26 = vmul.f32 %v5290_v56, %v3320_v25 }
0x1c8e   : > { %v3322_v27 = vmul.f32 0.5, %v3321_v26 }
0x1c90   : > { %v3323_v28 = vsub.f32 1.5, %v3322_v27 }
0x1c92   : > { %v3324_v29 = vmul.f32 %v5290_v56, %v3323_v28 }
0x1c94   : > { %v3328_v31 = vsel %vm3327_vm11, %v5290_v56, %v3324_v29 }
0x1c95   : > { %v3329_v32 = vmul.f32 %v3328_v31, %v3312_v4 }
0x1c97   : > { %v3333_v33 = vmul.f32 %v5194_v30, %v3329_v32 }
0x1c99   : > { %v6943_v34 = vadd.f32 %v5195_v1, %v3333_v33 }
0x1c9b   : > { %4829 = vmatmul.msk.f32.vlgmr.msra.gmra.mxu0 %vm1400_vm2, %v6943_v34  ;;  %4830 = vmatmul.msk.f32.vlgmr.msra.gmra.mxu1 %vm1400_vm2, %v6943_v34 }
0x1c9c   : > { %4831 = vmatmul.msk.f32.vlgmr.msra.gmra.mxu2 %vm1400_vm2, %v6943_v34 }
0x1d18   : > { %v3389_v37 = vpop.f32.mrf.mxu0  ;;  %v3412_v38 = vpop.f32.mrf.mxu1 }
0x1d19   : > { %v3390_v39 = vadd.f32 %v5196_v35, %v3389_v37  ;;  %v3413_v41 = vadd.f32 %v5197_v36, %v3412_v38 }
0x1d1b   : > { %3502 = vrot.lane.b32.xlu1 %v3413_v41, %s7231_s14  ;;  %4832 = vmatpush.xpose.msk.msrb.mxu0 %vm1470_vm3, %v3413_v41 }
0x1d1c   : > { %3500 = vrot.lane.b32.xlu0 %v3390_v39, %s7231_s14 }
0x1d1e   : > { %4833 = vmatmul.msk.f32.vlgmr.msrb.gmra.mxu0 %vm1470_vm3, %v3390_v39 }
0x1d1f   : > { %v3435_v43 = vpop.f32.mrf.mxu2 }
0x1d20   : > { %v6957_v54 = vadd.f32 %v5198_v42, %v3435_v43 }
0x1d22   : > { %3495 = vmatpush.msrb.mxu1 %v6957_v54 }
0x1d23   : > { %3570 = vrot.lane.b32.xlu1 %v3413_v41, %s7233_s7 }
0x1d2b   : > { %3568 = vrot.lane.b32.xlu1 %v3390_v39, %s7233_s7 }
0x1d33   : > { %3637 = vrot.lane.b32.xlu1 %v3413_v41, %s7232_s11 }
0x1d3b   : > { %3635 = vrot.lane.b32.xlu1 %v3390_v39, %s7232_s11 }
0x1d8d   : > { %v3503_v44 = vpop.permute.xlu1 %3502 }
0x1d8e   : > { %4835 = vmatpush.xpose.msk.msrb.mxu2 %vm1470_vm3, %v3503_v44  ;;  %v3501_v45 = vpop.permute.xlu0 %3500 }
0x1d91   : > { %4836 = vmatmul.msk.f32.vlgmr.msrb.gmra.mxu2 %vm1470_vm3, %v3501_v45  ;;  %v4826_v45 = vld [vmem:[%s7227_s1 + $0x58] sm:$0xff] }
0x1d95   : > { %v3571_v46 = vpop.permute.xlu1 %3570 }
0x1d96   : > { %4838 = vmatpush.xpose.msk.msra.mxu1 %vm1470_vm3, %v3571_v46  ;;  %v4825_v46 = vld [vmem:[%s7227_s1 + $0x50] sm:$0xff] }
0x1d9b   : > { %v3461_v47 = vpop.f32.mrf.mxu0 }
0x1d9c   : > { %v3464_v48 = vmul.f32 0.35355338, %v3461_v47  ;;  %v4824_v47 = vld [vmem:[%s7227_s1 + $0x48] sm:$0xff] }
0x1d9d   : > { %v3569_v0 = vpop.permute.xlu1 %3568 }
0x1d9e   : > { %v3465_v50 = vadd.f32 %v5330_v49, %v3464_v48  ;;  %v4823_v48 = vld [vmem:[%s7227_s1 + $0x40] sm:$0xff] }
0x1da0   : > { %v3466_v51 = vsel %vm1470_vm3, %v3465_v50, -inf }
0x1da1   : > { %3467 = vmax.xlane.f32.xlu2 %v3466_v51 }
0x1da5   : > { %v3638_v9 = vpop.permute.xlu1 %3637 }
0x1dad   : > { %v3636_v14 = vpop.permute.xlu1 %3635 }
0x1e14   : > { %v3525_v52 = vpop.f32.mrf.mxu2  ;;  %v3468_v21 = vpop.xlane.xlu2 %3467 }
0x1e15   : > { %v3528_v53 = vmul.f32 0.35355338, %v3525_v52  ;;  %v3469_v23 = vsub.f32 %v3465_v50, %v3468_v21 }
0x1e17   : > { %v3470_v55 = vmul.f32 1.442695, %v3469_v23  ;;  %v3529_v57 = vadd.f32 %v5330_v49, %v3528_v53  ;;  %v5199_v23 = vld [vmem:[#allocation5 + $0x2] ss:$0 sm:$0xff] }
0x1e19   : > { %5291 = vpow2.f32 %v3470_v55  ;;  %v3530_v59 = vsel %vm1470_vm3, %v3529_v57, -inf }
0x1e1a   : > { %3531 = vmax.xlane.f32.xlu2 %v3530_v59 }
0x1e1f   : > { %v5292_v60 = vpop.eup %5291 }
0x1e20   : > { %v3472_v61 = vsel %vm1470_vm3, %v5292_v60, 0.0 }
0x1e22   : > { %3473 = vadd.xlane.f32.xlu2 %v3472_v61 }
0x1e3a   : > { %3542 = vrot.lane.b32.xlu2 %v6957_v54, %s7231_s14 }
0x1e8d   : > { %v3532_v62 = vpop.xlane.xlu2 %3531 }
0x1e8e   : > { %v3533_v40 = vsub.f32 %v3529_v57, %v3532_v62 }
0x1e90   : > { %v3534_v63 = vmul.f32 1.442695, %v3533_v40 }
0x1e92   : > { %5293 = vpow2.f32 %v3534_v63 }
0x1e95   : > { %v3474_v2 = vpop.xlane.xlu2 %3473 }
0x1e96   : > { %5295 = vrcp.f32 %v3474_v2  ;;  %v3787_v2 = vld [vmem:[#allocation10 + $0x58] sm:$0xff] }
0x1e98   : > { %v5294_v3 = vpop.eup %5293 }
0x1e99   : > { %v3536_v4 = vsel %vm1470_vm3, %v5294_v3, 0.0 }
0x1e9a   : > { %3537 = vadd.xlane.f32.xlu0 %v3536_v4  ;;  %v3784_v4 = vld [vmem:[#allocation10 + $0x40] sm:$0xff] }
0x1e9c   : > { %v5296_v5 = vpop.eup %5295 }
0x1e9d   : > { %v3476_v6 = vmul.f32 %v5296_v5, %v5292_v60  ;;  %v3543_v8 = vpop.permute.xlu2 %3542  ;;  %v4848_v5 = vld [vmem:[%s7230_s12 + $0x58] sm:$0xff] }
0x1e9e   : > { %3563 = vmatpush.msra.mxu0 %v3543_v8  ;;  %3824 = vmatpush.msrb.mxu3 %v4848_v5  ;;  %v4846_v8 = vld [vmem:[%s7230_s12 + $0x48] sm:$0xff] }
0x1e9f   : > { %4834 = vmatmul.msk.f32.vlgmr.msrb.gmra.mxu1 %vm1470_vm3, %v3476_v6  ;;  %v4847_v6 = vld [vmem:[%s7230_s12 + $0x50] sm:$0xff] }
0x1ea0   : > { %4841 = vmatpush.xpose.msk.msrb.mxu0 %vm1470_vm3, %v3638_v9  ;;  %3825 = vmatpush.msrb.mxu3 %v4847_v6  ;;  %v4845_v9 = vld [vmem:[%s7230_s12 + $0x40] sm:$0xff] }
0x1ea2   : > { %3826 = vmatpush.msrb.mxu3 %v4846_v8 }
0x1ea4   : > { %3827 = vmatpush.msrb.mxu3 %v4845_v9 }
0x1ea7   : > { %4839 = vmatmul.msk.f32.vlgmr.msra.gmra.mxu1 %vm1470_vm3, %v3569_v0 }
0x1f0d   : > { %v3538_v7 = vpop.xlane.xlu0 %3537 }
0x1f0e   : > { %5297 = vrcp.f32 %v3538_v7 }
0x1f14   : > { %v5298_v11 = vpop.eup %5297 }
0x1f15   : > { %v3540_v12 = vmul.f32 %v5298_v11, %v5294_v3  ;;  %v3786_v3 = vld [vmem:[#allocation10 + $0x50] sm:$0xff] }
0x1f17   : > { %4837 = vmatmul.msk.f32.vlgmr.msra.gmra.mxu0 %vm1470_vm3, %v3540_v12 }
0x1f18   : > { %3847 = vmatpush.msra.mxu0 %v3787_v2 }
0x1f1a   : > { %3848 = vmatpush.msra.mxu0 %v3786_v3 }
0x1f1c   : > { %v3497_v13 = vpop.f32.mrf.mxu1 }
0x1f1f   : > { %4842 = vmatmul.msk.f32.vlgmr.msrb.gmra.mxu0 %vm1470_vm3, %v3636_v14 }
0x1f24   : > { %v3593_v15 = vpop.f32.mrf.mxu1 }
0x1f25   : > { %v3596_v16 = vmul.f32 0.35355338, %v3593_v15 }
0x1f27   : > { %v3597_v17 = vadd.f32 %v5330_v49, %v3596_v16 }
0x1f29   : > { %v3598_v18 = vsel %vm1470_vm3, %v3597_v17, -inf }
0x1f2a   : > { %3599 = vmax.xlane.f32.xlu2 %v3598_v18 }
0x1f42   : > { %3676 = vrot.lane.b32.xlu2 %v6957_v54, %s7232_s11 }
0x1f94   : > { %v3565_v19 = vpop.f32.mrf.mxu0 }
0x1f9c   : > { %v3660_v20 = vpop.f32.mrf.mxu0 }
0x1f9d   : > { %v3663_v22 = vmul.f32 0.35355338, %v3660_v20  ;;  %v3600_v24 = vpop.xlane.xlu2 %3599 }
0x1f9e   : > { %v3601_v56 = vsub.f32 %v3597_v17, %v3600_v24  ;;  %v5201_v24 = vld [vmem:[#allocation8 + $0x2] ss:$0 sm:$0xff] }
0x1f9f   : > { %v3664_v25 = vadd.f32 %v5330_v49, %v3663_v22 }
0x1fa0   : > { %v3602_v26 = vmul.f32 1.442695, %v3601_v56 }
0x1fa1   : > { %v3665_v27 = vsel %vm1470_vm3, %v3664_v25, -inf }
0x1fa2   : > { %5299 = vpow2.f32 %v3602_v26  ;;  %3666 = vmax.xlane.f32.xlu1 %v3665_v27  ;;  %v5202_v26 = vld [vmem:[#allocation16 + $0x2] ss:$0 sm:$0xff] }
0x1fa5   : > { %v3677_v28 = vpop.permute.xlu2 %3676 }
0x1fa6   : > { %3697 = vmatpush.msrb.mxu1 %v3677_v28 }
0x1fa8   : > { %v5300_v29 = vpop.eup %5299 }
0x1fa9   : > { %v3604_v30 = vsel %vm1470_vm3, %v5300_v29, 0.0 }
0x1faa   : > { %3605 = vadd.xlane.f32.xlu0 %v3604_v30 }
0x1fbb   : > { %3703 = vrot.lane.b32.xlu1 %v3565_v19, %s7234_s10  ;;  %v5200_v19 = vld [vmem:[#allocation7 + $0x2] ss:$0 sm:$0xff] }
0x2015   : > { %v3667_v31 = vpop.xlane.xlu1 %3666 }
0x2016   : > { %v3668_v32 = vsub.f32 %v3664_v25, %v3667_v31 }
0x2018   : > { %v3669_v1 = vmul.f32 1.442695, %v3668_v32 }
0x201a   : > { %5301 = vpow2.f32 %v3669_v1 }
0x201d   : > { %v3606_v36 = vpop.xlane.xlu0 %3605 }
0x2020   : > { %v5302_v33 = vpop.eup %5301 }
0x2021   : > { %v3671_v35 = vsel %vm1470_vm3, %v5302_v33, 0.0 }
0x2022   : > { %3672 = vadd.xlane.f32.xlu0 %v3671_v35 }
0x202d   : > { %v3704_v50 = vpop.permute.xlu1 %3703 }
0x202e   : > { %v3714_v51 = vsel %vm1470_vm3, %v3497_v13, %v3704_v50 }
0x2036   : > { %3609 = vrot.lane.b32.xlu0 %v6957_v54, %s7233_s7 }
0x2095   : > { %v3673_v37 = vpop.xlane.xlu0 %3672 }
0x2096   : > { %5303 = vrcp.f32 %v3673_v37 }
0x2097   : > { %5305 = vrcp.f32 %v3606_v36 }
0x209c   : > { %v5304_v38 = vpop.eup %5303 }
0x209d   : > { %v3675_v39 = vmul.f32 %v5304_v38, %v5302_v33  ;;  %v5306_v41 = vpop.eup %5305 }
0x209e   : > { %v3608_v42 = vmul.f32 %v5306_v41, %v5300_v29  ;;  %v5203_v29 = vld [vmem:[#allocation14 + $0x2] ss:$0 sm:$0xff] }
0x209f   : > { %4843 = vmatmul.msk.f32.vlgmr.msrb.gmra.mxu1 %vm1470_vm3, %v3675_v39 }
0x20a8   : > { %v3610_v43 = vpop.permute.xlu0 %3609 }
0x20a9   : > { %3630 = vmatpush.msra.mxu2 %v3610_v43  ;;  %v3791_v43 = vld [vmem:[#allocation11 + $0x50] sm:$0xff] }
0x20aa   : > { %4840 = vmatmul.msk.f32.vlgmr.msra.gmra.mxu2 %vm1470_vm3, %v3608_v42  ;;  %v3792_v42 = vld [vmem:[#allocation11 + $0x58] sm:$0xff] }
0x20ab   : > { %3735 = vmatpush.msrb.mxu2 %v4826_v45  ;;  %3870 = vmatpush.msra.mxu1 %v3792_v42 }
0x20ad   : > { %3736 = vmatpush.msrb.mxu2 %v4825_v46  ;;  %3871 = vmatpush.msra.mxu1 %v3791_v43 }
0x20af   : > { %3737 = vmatpush.msrb.mxu2 %v4824_v47 }
0x20b1   : > { %3738 = vmatpush.msrb.mxu2 %v4823_v48 }
0x211c   : > { %v3699_v54 = vpop.f32.mrf.mxu1 }
0x212d   : > { %v3632_v44 = vpop.f32.mrf.mxu2 }
0x212e   : > { %3707 = vrot.lane.b32.xlu0 %v3632_v44, %s7235_s2  ;;  %v3790_v44 = vld [vmem:[#allocation11 + $0x48] sm:$0xff] }
0x212f   : > { %3872 = vmatpush.msra.mxu1 %v3790_v44 }
0x2136   : > { %3711 = vrot.lane.b32.xlu0 %v3699_v54, %s7236_s4  ;;  %v3789_v54 = vld [vmem:[#allocation11 + $0x40] sm:$0xff] }
0x2137   : > { %3873 = vmatpush.msra.mxu1 %v3789_v54  ;;  %v5205_v54 = vld [vmem:[#allocation19 + $0x2] ss:$0 sm:$0xff] }
0x2138   : > { %4851 = vmatmul.msk.f32.vlgmr.msra.gmra.mxu1 %vm1400_vm2, %v6880_v10 }
0x21a0   : > { %v3708_v49 = vpop.permute.xlu0 %3707 }
0x21a1   : > { %v3715_v52 = vsel %vm1353_vm0, %v3714_v51, %v3708_v49 }
0x21a8   : > { %v3712_v21 = vpop.permute.xlu0 %3711 }
0x21a9   : > { %v3716_v53 = vsel %vm1749_vm4, %v3715_v52, %v3712_v21 }
0x21aa   : > { %4844 = vmatmul.msk.f32.vlgmr.msrb.gmra.mxu2 %vm1400_vm2, %v3716_v53 }
0x222d   : > { %v3740_v55 = vpop.f32.mrf.mxu2 }
0x222e   : > { %v3741_v57 = vadd.f32 %v5199_v23, %v3740_v55 }
0x2230   : > { %v3743_v59 = vadd.f32 %v3741_v57, %v6943_v34  ;;  %v3785_v34 = vld [vmem:[#allocation10 + $0x48] sm:$0xff] }
0x2231   : > { %3849 = vmatpush.msra.mxu0 %v3785_v34 }
0x2232   : > { %v3748_v60 = vsel %vm1400_vm2, %v3743_v59, 0.0 }
0x2233   : > { %3749 = vadd.xlane.f32.xlu0 %v3748_v60  ;;  %3850 = vmatpush.msra.mxu0 %v3784_v4  ;;  %v3875_v60 = vpop.f32.mrf.mxu1 }
0x2234   : > { %4850 = vmatmul.msk.f32.vlgmr.msra.gmra.mxu0 %vm1400_vm2, %v6880_v10 }
0x22a6   : > { %v3750_v61 = vpop.xlane.xlu0 %3749 }
0x22a7   : > { %v3751_v62 = vmul.f32 %v3750_v61, %v6700_v58 }
0x22a9   : > { %v3752_v40 = vsub.f32 %v3743_v59, %v3751_v62  ;;  %v5204_v59 = vld [vmem:[#allocation17 + $0x2] ss:$0 sm:$0xff] }
0x22aa   : > { %v3876_v61 = vadd.f32 %v5204_v59, %v3875_v60  ;;  %v4879_v59 = vld [vmem:[%s7237_s6 + $0x168] sm:$0xff] }
0x22ab   : > { %v3753_v63 = vmul.f32 %v3752_v40, %v3752_v40 }
0x22ac   : > { %3934 = vmatpush.msra.mxu3 %v3876_v61 }
0x22ad   : > { %v3754_v0 = vsel %vm1400_vm2, %v3753_v63, 0.0 }
0x22ae   : > { %3755 = vadd.xlane.f32.xlu2 %v3754_v0 }
0x22b1   : > { %v3852_v27 = vpop.f32.mrf.mxu0 }
0x22b2   : > { %v3853_v28 = vadd.f32 %v5202_v26, %v3852_v27 }
0x22b4   : > { %4008 = vrot.lane.b32.xlu1 %v3853_v28, %s7233_s7  ;;  %4852 = vmatpush.xpose.msk.msra.mxu2 %vm1470_vm3, %v3853_v28 }
0x22bc   : > { %3941 = vrot.lane.b32.xlu1 %v3853_v28, %s7231_s14 }
0x2321   : > { %v3756_v7 = vpop.xlane.xlu2 %3755 }
0x2322   : > { %v3757_v11 = vmul.f32 %v3756_v7, %v6700_v58 }
0x2324   : > { %v3758_v12 = vadd.f32 1e-05, %v3757_v11 }
0x2326   : > { %5307 = vrsqrt.f32 %v3758_v12  ;;  %vm3765_vm13 = vweird.f32 %v3758_v12  ;;  %v4009_v32 = vpop.permute.xlu1 %4008 }
0x2327   : > { %4858 = vmatpush.xpose.msk.msrb.mxu2 %vm1470_vm3, %v4009_v32 }
0x232c   : > { %v5308_v13 = vpop.eup %5307 }
0x232d   : > { %v3760_v14 = vmul.f32 %v5308_v13, %v3758_v12  ;;  %vm3766_vm12 = vweird.f32 %v5308_v13 }
0x232e   : > { %vm3767_vm14 = vmor %vm3765_vm13, %vm3766_vm12  ;;  %v3942_v1 = vpop.permute.xlu1 %3941 }
0x232f   : > { %v3761_v15 = vmul.f32 %v5308_v13, %v3760_v14  ;;  %4855 = vmatpush.xpose.msk.msrb.mxu0 %vm1470_vm3, %v3942_v1 }
0x2331   : > { %v3762_v16 = vmul.f32 0.5, %v3761_v15 }
0x2333   : > { %v3763_v17 = vsub.f32 1.5, %v3762_v16 }
0x2335   : > { %v3764_v18 = vmul.f32 %v5308_v13, %v3763_v17 }
0x2337   : > { %v3768_v20 = vsel %vm3767_vm14, %v5308_v13, %v3764_v18 }
0x2338   : > { %v3769_v22 = vmul.f32 %v3768_v20, %v3752_v40 }
0x233a   : > { %v3773_v56 = vmul.f32 %v5200_v19, %v3769_v22 }
0x233c   : > { %v7011_v25 = vadd.f32 %v5201_v24, %v3773_v56 }
0x233e   : > { %4849 = vmatmul.msk.f32.vlgmr.msrb.gmra.mxu3 %vm1400_vm2, %v7011_v25 }
0x23c1   : > { %v3829_v30 = vpop.f32.mrf.mxu3 }
0x23c2   : > { %v3830_v31 = vadd.f32 %v5203_v29, %v3829_v30 }
0x23c4   : > { %4072 = vrot.lane.b32.xlu0 %v3830_v31, %s7232_s11  ;;  %4006 = vrot.lane.b32.xlu1 %v3830_v31, %s7233_s7 }
0x23c5   : > { %4853 = vmatmul.msk.f32.vlgmr.msra.gmra.mxu2 %vm1470_vm3, %v3830_v31 }
0x23cc   : > { %3939 = vrot.lane.b32.xlu1 %v3830_v31, %s7231_s14 }
0x23d4   : > { %4074 = vrot.lane.b32.xlu1 %v3853_v28, %s7232_s11 }
0x2436   : > { %v4007_v33 = vpop.permute.xlu1 %4006  ;;  %v4073_v38 = vpop.permute.xlu0 %4072 }
0x2437   : > { %4859 = vmatmul.msk.f32.vlgmr.msrb.gmra.mxu2 %vm1470_vm3, %v4007_v33  ;;  %v3797_v33 = vld [vmem:[#allocation13 + $0x58] sm:$0xff] }
0x2438   : > { %4171 = vmatpush.msra.mxu2 %v3797_v33 }
0x243e   : > { %v3940_v35 = vpop.permute.xlu1 %3939 }
0x243f   : > { %4856 = vmatmul.msk.f32.vlgmr.msrb.gmra.mxu0 %vm1470_vm3, %v3940_v35  ;;  %v3796_v35 = vld [vmem:[#allocation13 + $0x50] sm:$0xff] }
0x2440   : > { %4172 = vmatpush.msra.mxu2 %v3796_v35 }
0x2446   : > { %v4075_v36 = vpop.permute.xlu1 %4074 }
0x2447   : > { %4861 = vmatpush.xpose.msk.msra.mxu0 %vm1470_vm3, %v4075_v36  ;;  %v3795_v36 = vld [vmem:[#allocation13 + $0x48] sm:$0xff] }
0x2448   : > { %v3901_v37 = vpop.f32.mrf.mxu2  ;;  %4173 = vmatpush.msra.mxu2 %v3795_v36 }
0x2449   : > { %v3904_v39 = vmul.f32 0.35355338, %v3901_v37  ;;  %v3794_v37 = vld [vmem:[#allocation13 + $0x40] sm:$0xff] }
0x244a   : > { %4862 = vmatmul.msk.f32.vlgmr.msra.gmra.mxu0 %vm1470_vm3, %v4073_v38  ;;  %4174 = vmatpush.msra.mxu2 %v3794_v37 }
0x244b   : > { %v3905_v41 = vsel %vm1470_vm3, %v3904_v39, -inf }
0x244c   : > { %3906 = vmax.xlane.f32.xlu2 %v3905_v41 }
0x24ba   : > { %v4031_v45 = vpop.f32.mrf.mxu2 }
0x24bb   : > { %v4034_v46 = vmul.f32 0.35355338, %v4031_v45 }
0x24bc   : > { %v3964_v47 = vpop.f32.mrf.mxu0 }
0x24bd   : > { %v3967_v48 = vmul.f32 0.35355338, %v3964_v47  ;;  %v4035_v49 = vsel %vm1470_vm3, %v4034_v46, -inf }
0x24be   : > { %4036 = vmax.xlane.f32.xlu2 %v4035_v49 }
0x24bf   : > { %v3907_v50 = vpop.xlane.xlu2 %3906  ;;  %v3968_v51 = vsel %vm1470_vm3, %v3967_v48, -inf }
0x24c0   : > { %v3908_v52 = vsub.f32 %v3904_v39, %v3907_v50  ;;  %3969 = vmax.xlane.f32.xlu1 %v3968_v51 }
0x24c2   : > { %v3909_v21 = vmul.f32 1.442695, %v3908_v52 }
0x24c4   : > { %5309 = vpow2.f32 %v3909_v21 }
0x24c7   : > { %v4097_v53 = vpop.f32.mrf.mxu0 }
0x24c8   : > { %v4100_v23 = vmul.f32 0.35355338, %v4097_v53  ;;  %v4218_v53 = vld [vmem:[#allocation23 + $0x58] sm:$0xff] }
0x24ca   : > { %v5310_v55 = vpop.eup %5309  ;;  %v4101_v57 = vsel %vm1470_vm3, %v4100_v23, -inf }
0x24cb   : > { %4102 = vmax.xlane.f32.xlu2 %v4101_v57  ;;  %v3911_v10 = vsel %vm1470_vm3, %v5310_v55, 0.0  ;;  %v4881_v57 = vld [vmem:[%s7237_s6 + $0x178] sm:$0xff] }
0x24cc   : > { %3912 = vadd.xlane.f32.xlu0 %v3911_v10  ;;  %v4880_v10 = vld [vmem:[%s7237_s6 + $0x170] sm:$0xff]  ;;  %4270 = vmatpush.msrb.mxu0 %v4881_v57  ;;  %v5212_v57 = vld [vmem:[#allocation31] ss:$0 sm:$0xff] }
0x24ce   : > { %4271 = vmatpush.msrb.mxu0 %v4880_v10 }
0x24d0   : > { %4272 = vmatpush.msrb.mxu0 %v4879_v59 }
0x24d9   : > { %3980 = vrot.lane.b32.xlu1 %v3876_v61, %s7231_s14 }
0x24e0   : > { %4112 = vrot.lane.b32.xlu0 %v3876_v61, %s7232_s11  ;;  %s4884_s11 = sshll.u32 %s6266_s15, 3 }
0x2531   : > { %v4037_v62 = vpop.xlane.xlu2 %4036 }
0x2532   : > { %v4038_v0 = vsub.f32 %v4034_v46, %v4037_v62  ;;  %v4878_v62 = vld [vmem:[%s7237_s6 + $0x160] sm:$0xff] }
0x2533   : > { %v3970_v40 = vpop.xlane.xlu1 %3969  ;;  %4273 = vmatpush.msrb.mxu0 %v4878_v62 }
0x2534   : > { %v3971_v63 = vsub.f32 %v3967_v48, %v3970_v40  ;;  %v4039_v3 = vmul.f32 1.442695, %v4038_v0  ;;  %v4876_v0 = vld [vmem:[%s7237_s6 + $0x150] sm:$0xff] }
0x2536   : > { %v3972_v2 = vmul.f32 1.442695, %v3971_v63  ;;  %v4877_v63 = vld [vmem:[%s7237_s6 + $0x158] sm:$0xff] }
0x2537   : > { %4274 = vmatpush.msrb.mxu0 %v4877_v63 }
0x2538   : > { %5311 = vpow2.f32 %v3972_v2  ;;  %v4875_v2 = vld [vmem:[%s7237_s6 + $0x148] sm:$0xff] }
0x2539   : > { %5313 = vpow2.f32 %v4039_v3  ;;  %4275 = vmatpush.msrb.mxu0 %v4876_v0  ;;  %v4874_v3 = vld [vmem:[%s7237_s6 + $0x140] sm:$0xff] }
0x253b   : > { %4276 = vmatpush.msrb.mxu0 %v4875_v2 }
0x253d   : > { %4277 = vmatpush.msrb.mxu0 %v4874_v3 }
0x253e   : > { %v5312_v34 = vpop.eup %5311  ;;  %v4103_v4 = vpop.xlane.xlu2 %4102 }
0x253f   : > { %v3913_v5 = vpop.xlane.xlu0 %3912  ;;  %v4104_v6 = vsub.f32 %v4100_v23, %v4103_v4  ;;  %v3974_v8 = vsel %vm1470_vm3, %v5312_v34, 0.0  ;;  %v5314_v7 = vpop.eup %5313  ;;  %v4217_v23 = vld [vmem:[#allocation23 + $0x50] sm:$0xff] }
0x2540   : > { %5315 = vrcp.f32 %v3913_v5  ;;  %3975 = vadd.xlane.f32.xlu2 %v3974_v8  ;;  %v4041_v13 = vsel %vm1470_vm3, %v5314_v7, 0.0  ;;  %v4873_v4 = vld [vmem:[%s7237_s6 + $0x138] sm:$0xff] }
0x2541   : > { %v4105_v9 = vmul.f32 1.442695, %v4104_v6  ;;  %v4872_v6 = vld [vmem:[%s7237_s6 + $0x130] sm:$0xff]  ;;  %4278 = vmatpush.msrb.mxu0 %v4873_v4 }
0x2543   : > { %5317 = vpow2.f32 %v4105_v9  ;;  %v4871_v9 = vld [vmem:[%s7237_s6 + $0x128] sm:$0xff]  ;;  %4279 = vmatpush.msrb.mxu0 %v4872_v6 }
0x2545   : > { %4280 = vmatpush.msrb.mxu0 %v4871_v9 }
0x2546   : > { %v5316_v11 = vpop.eup %5315 }
0x2547   : > { %v3915_v12 = vmul.f32 %v5316_v11, %v5310_v55  ;;  %v4215_v55 = vld [vmem:[#allocation23 + $0x40] sm:$0xff]  ;;  %v4870_v11 = vld [vmem:[%s7237_s6 + $0x120] sm:$0xff] }
0x2548   : > { %4042 = vadd.xlane.f32.xlu2 %v4041_v13  ;;  %v4869_v13 = vld [vmem:[%s7237_s6 + $0x118] sm:$0xff]  ;;  %4281 = vmatpush.msrb.mxu0 %v4870_v11 }
0x2549   : > { %4854 = vmatmul.msk.f32.vlgmr.msra.gmra.mxu3 %vm1470_vm3, %v3915_v12  ;;  %v5318_v14 = vpop.eup %5317 }
0x254a   : > { %v4107_v15 = vsel %vm1470_vm3, %v5318_v14, 0.0  ;;  %4282 = vmatpush.msrb.mxu0 %v4869_v13 }
0x254b   : > { %v3981_v16 = vpop.permute.xlu1 %3980 }
0x254c   : > { %4001 = vmatpush.msrb.mxu1 %v3981_v16 }
0x2550   : > { %4108 = vadd.xlane.f32.xlu2 %v4107_v15  ;;  %v5206_v15 = vld [vmem:[#allocation20 + $0x2] ss:$0 sm:$0xff] }
0x2552   : > { %v4113_v17 = vpop.permute.xlu0 %4112 }
0x2553   : > { %4133 = vmatpush.msra.mxu1 %v4113_v17 }
0x2568   : > { %4046 = vrot.lane.b32.xlu2 %v3876_v61, %s7233_s7 }
0x25b3   : > { %v3976_v18 = vpop.xlane.xlu2 %3975 }
0x25b4   : > { %5319 = vrcp.f32 %v3976_v18  ;;  %v5207_v18 = vld [vmem:[#allocation22 + $0x2] ss:$0 sm:$0xff] }
0x25ba   : > { %v5320_v19 = vpop.eup %5319 }
0x25bb   : > { %v3978_v20 = vmul.f32 %v5320_v19, %v5312_v34  ;;  %v4043_v22 = vpop.xlane.xlu2 %4042 }
0x25bc   : > { %5321 = vrcp.f32 %v4043_v22  ;;  %v4868_v22 = vld [vmem:[%s7237_s6 + $0x110] sm:$0xff] }
0x25bd   : > { %4857 = vmatmul.msk.f32.vlgmr.msrb.gmra.mxu1 %vm1470_vm3, %v3978_v20  ;;  %4283 = vmatpush.msrb.mxu0 %v4868_v22 }
0x25c2   : > { %v5322_v56 = vpop.eup %5321 }
0x25c3   : > { %v4109_v24 = vpop.xlane.xlu2 %4108  ;;  %v4045_v27 = vmul.f32 %v5322_v56, %v5314_v7  ;;  %v4866_v56 = vld [vmem:[%s7237_s6 + $0x100] sm:$0xff] }
0x25c4   : > { %5323 = vrcp.f32 %v4109_v24  ;;  %v4867_v24 = vld [vmem:[%s7237_s6 + $0x108] sm:$0xff] }
0x25c5   : > { %4284 = vmatpush.msrb.mxu0 %v4867_v24 }
0x25c7   : > { %4285 = vmatpush.msrb.mxu0 %v4866_v56 }
0x25ca   : > { %v5324_v26 = vpop.eup %5323 }
0x25cb   : > { %v4111_v28 = vmul.f32 %v5324_v26, %v5318_v14  ;;  %v4047_v29 = vpop.permute.xlu2 %4046  ;;  %v5208_v26 = vld [vmem:[#allocation25 + $0x2] ss:$0 sm:$0xff] }
0x25cc   : > { %4067 = vmatpush.msrb.mxu3 %v4047_v29  ;;  %v3936_v31 = vpop.f32.mrf.mxu3 }
0x25cd   : > { %4860 = vmatmul.msk.f32.vlgmr.msrb.gmra.mxu3 %vm1470_vm3, %v4045_v27  ;;  %4863 = vmatmul.msk.f32.vlgmr.msra.gmra.mxu1 %vm1470_vm3, %v4111_v28 }
0x25ce   : > { %4239 = vmatpush.msra.mxu3 %v4218_v53 }
0x25d0   : > { %4240 = vmatpush.msra.mxu3 %v4217_v23 }
0x263a   : > { %v4003_v30 = vpop.f32.mrf.mxu1 }
0x263b   : > { %4139 = vrot.lane.b32.xlu1 %v4003_v30, %s7234_s10  ;;  %v5209_v30 = vld [vmem:[#allocation26 + $0x2] ss:$0 sm:$0xff] }
0x264a   : > { %v4135_v32 = vpop.f32.mrf.mxu1 }
0x264b   : > { %4147 = vrot.lane.b32.xlu1 %v4135_v32, %s7236_s4  ;;  %s7238_s4 = sld [smem:[#allocation68_spill]] }
0x2650   : > { %v4069_v1 = vpop.f32.mrf.mxu3 }
0x2651   : > { %4143 = vrot.lane.b32.xlu2 %v4069_v1, %s7235_s2  ;;  %s7239_s2 = sld [smem:[#allocation66_spill]]  ;;  %s1328_s0 = sand.u32 1, %s7238_s4  }
0x2652   : > { %s4702_s14 = sshll.u32 %s1328_s0, 3  ;;  %s4358_s6 = scalar_lea.sflag [#allocation4], %s1328_s0 }
0x2653   : > { %s1330_s1 = scalar_lea.vmem [#allocation32], %s4702_s14 }
0x2654   : > { %s4370_s3 = sshll.u32 %s1330_s1, 4  ;;  %s4371_s3 = int_to_ptr.vmem [resolvable:$true] %s4370_s3 }
0x2657   : > { %s4368_s10 = scalar_lea.hbm %s7239_s2, %s4884_s11  ;;  %s5921_s15 = scalar_lea.hbm %s7239_s2, 16 }
0x2658   : > { %s4372_s5 = sshll.u32 %s4368_s10, 4  ;;  %s4373_s5 = int_to_ptr.hbm [resolvable:$true] %s4372_s5 }
0x2659   : > { %s5915_s8 = sshra.s32 %s4373_s5, 4  ;;  %s5916_s8 = int_to_ptr.hbm [resolvable:$true] %s5915_s8 }
0x265a   : > { %s5917_s4 = scalar_lea.hbm %s5916_s8, 8  ;;  %p5922_p7 = scmp.lt.s32.totalorder %s5916_s8, %s7239_s2 }
0x265b   : > { %p5918_p9 = scmp.ne.s32.totalorder %s5916_s8, %s5917_s4  ;;  %p5923_p8 = scmp.lt.s32.totalorder %s5921_s15, %s5917_s4 }
0x265d   : > { %p5919_p12 = pnand %p5918_p9, %p6283_p5  ;;  %p5924_p11 = por %p5923_p8, %p5922_p7 }
0x265f   : > { %p5920_p0 = pneg %p5919_p12 }
0x2661   : > { %p5925_p13 = pnand %p5924_p11, %p5920_p0 }
0x26ab   : > { %v4144_v41 = vpop.permute.xlu2 %4143 }
0x26ad   : > { %v4140_v38 = vpop.permute.xlu1 %4139 }
0x26ae   : > { %v4150_v39 = vsel %vm1470_vm3, %v3936_v31, %v4140_v38 }
0x26af   : > { %v4151_v43 = vsel %vm1353_vm0, %v4150_v39, %v4144_v41  ;;  %v4328_v41 = vld [vmem:[%s6233_s25 + $0x18] sm:$0xff] }
0x26b0   : > { %4348 = vmatpush.msrb.mxu1 %v4328_v41 }
0x26bd   : > { %v4148_v42 = vpop.permute.xlu1 %4147 }
0x26be   : > { %v4152_v44 = vsel %vm1749_vm4, %v4151_v43, %v4148_v42  ;;  %v4327_v42 = vld [vmem:[%s6233_s25 + $0x10] sm:$0xff]  ;;  %v4326_v43 = vld [vmem:[%s6233_s25 + $0x8] sm:$0xff] }
0x26bf   : > { %4864 = vmatmul.msk.f32.vlgmr.msra.gmra.mxu2 %vm1400_vm2, %v4152_v44  ;;  %4349 = vmatpush.msrb.mxu1 %v4327_v42  ;;  %v4325_v44 = vld [vmem:[%s6233_s25] sm:$0xff] }
0x26c1   : > { %4350 = vmatpush.msrb.mxu1 %v4326_v43 }
0x26c3   : > { %4351 = vmatpush.msrb.mxu1 %v4325_v44 }
0x2742   : > { %v4176_v45 = vpop.f32.mrf.mxu2 }
0x2743   : > { %v4177_v46 = vadd.f32 %v5205_v54, %v4176_v45 }
0x2745   : > { %v4179_v47 = vadd.f32 %v4177_v46, %v7011_v25  ;;  %v4216_v25 = vld [vmem:[#allocation23 + $0x48] sm:$0xff] }
0x2746   : > { %4241 = vmatpush.msra.mxu3 %v4216_v25  ;;  %v5211_v25 = vld [vmem:[#allocation29 + $0x2] ss:$0 sm:$0xff] }
0x2747   : > { %v4184_v48 = vsel %vm1400_vm2, %v4179_v47, 0.0 }
0x2748   : > { %4185 = vadd.xlane.f32.xlu2 %v4184_v48  ;;  %4242 = vmatpush.msra.mxu3 %v4215_v55 }
0x27bb   : > { %v4186_v49 = vpop.xlane.xlu2 %4185 }
0x27bc   : > { %v4187_v50 = vmul.f32 %v4186_v49, %v6700_v58 }
0x27be   : > { %v4188_v51 = vsub.f32 %v4179_v47, %v4187_v50 }
0x27c0   : > { %v4189_v52 = vmul.f32 %v4188_v51, %v4188_v51 }
0x27c2   : > { %v4190_v21 = vsel %vm1400_vm2, %v4189_v52, 0.0 }
0x27c3   : > { %4191 = vadd.xlane.f32.xlu0 %v4190_v21  ;;  %v5210_v21 = vld [vmem:[#allocation28 + $0x2] ss:$0 sm:$0xff] }
0x2836   : > { %v4192_v60 = vpop.xlane.xlu0 %4191 }
0x2837   : > { %v4193_v61 = vmul.f32 %v4192_v60, %v6700_v58 }
0x2839   : > { %v4194_v40 = vadd.f32 1e-05, %v4193_v61 }
0x283b   : > { %5325 = vrsqrt.f32 %v4194_v40  ;;  %vm4201_vm4 = vweird.f32 %v4194_v40 }
0x2841   : > { %v5326_v34 = vpop.eup %5325 }
0x2842   : > { %v4196_v5 = vmul.f32 %v5326_v34, %v4194_v40  ;;  %vm4202_vm3 = vweird.f32 %v5326_v34 }
0x2843   : > { %vm4203_vm15 = vmor %vm4201_vm4, %vm4202_vm3 }
0x2844   : > { %v4197_v8 = vmul.f32 %v5326_v34, %v4196_v5 }
0x2846   : > { %v4198_v7 = vmul.f32 0.5, %v4197_v8 }
0x2848   : > { %v4199_v12 = vsub.f32 1.5, %v4198_v7 }
0x284a   : > { %v4200_v14 = vmul.f32 %v5326_v34, %v4199_v12 }
0x284c   : > { %v4204_v16 = vsel %vm4203_vm15, %v5326_v34, %v4200_v14 }
0x284d   : > { %v4205_v17 = vmul.f32 %v4204_v16, %v4188_v51 }
0x284f   : > { %v4209_v19 = vmul.f32 %v5206_v15, %v4205_v17 }
0x2851   : > { %v4213_v20 = vadd.f32 %v5207_v18, %v4209_v19 }
0x2853   : > { %4865 = vmatmul.msk.f32.vlgmr.msra.gmra.mxu3 %vm1400_vm2, %v4213_v20 }
0x28d6   : > { %v4244_v27 = vpop.f32.mrf.mxu3 }
0x28d7   : > { %v4245_v28 = vadd.f32 %v5208_v26, %v4244_v27 }
0x28d9   : > { %v4247_v29 = vmax.f32 %v4245_v28, 0.0 }
0x28db   : > { %4286 = vmatmul.f32.vlgmr.msrb.gmra.mxu0 %v4247_v29 }
0x2958   : > { %v4287_v31 = vpop.f32.mrf.mxu0 }
0x2959   : > { %v4288_v32 = vadd.f32 %v5209_v30, %v4287_v31 }
0x295b   : > { %v4290_v1 = vadd.f32 %v4288_v32, %v4213_v20 }
0x295d   : > { %v4295_v33 = vsel %vm1400_vm2, %v4290_v1, 0.0 }
0x295e   : > { %4296 = vadd.xlane.f32.xlu1 %v4295_v33 }
0x29d1   : > { %v4297_v35 = vpop.xlane.xlu1 %4296 }
0x29d2   : > { %v4298_v36 = vmul.f32 %v4297_v35, %v6700_v58 }
0x29d4   : > { %v4299_v37 = vsub.f32 %v4290_v1, %v4298_v36 }
0x29d6   : > { %v4300_v38 = vmul.f32 %v4299_v37, %v4299_v37 }
0x29d8   : > { %v4301_v39 = vsel %vm1400_vm2, %v4300_v38, 0.0 }
0x29d9   : > { %4302 = vadd.xlane.f32.xlu2 %v4301_v39 }
0x2a4c   : > { %v4303_v54 = vpop.xlane.xlu2 %4302 }
0x2a4d   : > { %v4304_v45 = vmul.f32 %v4303_v54, %v6700_v58 }
0x2a4f   : > { %v4305_v46 = vadd.f32 1e-05, %v4304_v45 }
0x2a51   : > { %5327 = vrsqrt.f32 %v4305_v46  ;;  %vm4312_vm5 = vweird.f32 %v4305_v46 }
0x2a57   : > { %v5328_v47 = vpop.eup %5327 }
0x2a58   : > { %v4307_v48 = vmul.f32 %v5328_v47, %v4305_v46  ;;  %vm4313_vm1 = vweird.f32 %v5328_v47 }
0x2a59   : > { %vm4314_vm6 = vmor %vm4312_vm5, %vm4313_vm1 }
0x2a5a   : > { %v4308_v49 = vmul.f32 %v5328_v47, %v4307_v48 }
0x2a5c   : > { %v4309_v50 = vmul.f32 0.5, %v4308_v49 }
0x2a5e   : > { %v4310_v51 = vsub.f32 1.5, %v4309_v50 }
0x2a60   : > { %v4311_v52 = vmul.f32 %v5328_v47, %v4310_v51 }
0x2a62   : > { %v4315_v53 = vsel %vm4314_vm6, %v5328_v47, %v4311_v52 }
0x2a63   : > { %v4316_v23 = vmul.f32 %v4315_v53, %v4299_v37 }
0x2a65   : > { %v4320_v55 = vmul.f32 %v5210_v21, %v4316_v23 }
0x2a67   : > { %v4324_v58 = vadd.f32 %v5211_v25, %v4320_v55 }
0x2a69   : > { %4882 = vmatmul.msk.f32.vlgmr.msrb.gmra.mxu1 %vm1400_vm2, %v4324_v58 }
0x2ae6   : > { %v4353_v10 = vpop.f32.mrf.mxu1 }
0x2ae7   : > { %v4354_v59 = vadd.f32 %v5212_v57, %v4353_v10 }
0x2ae9   : > { %4356 = vst.msk [vmem:[%s1330_s1] sm:$0xff] %vm1353_vm0, %v4354_v59 }
0x2aea   : > { %5928 = shalt.err (!%p5925_p13)
}
0x2aeb   : > { %4963 = dma.vmem_to_hbm [thread:$0]  (%p6283_p5), %s4371_s3, 128, %s4373_s5, %s4358_s6  }
0x2aec PF: > { %s7241_s14 = sld [smem:[#allocation70_spill]] }
0x2aed   : > { %s7242_s1 = sld [smem:[#allocation67_spill]] }
0x2af2   : > { %p5065_p1 = scmp.ge.s32.totalorder %s7241_s14, 2 }
0x2af3   : > { %s4384_s11 = sand.u32 1, %s7242_s1  }
0x2af4   : > { %p5024_p2 = pnand %p5065_p1, %p6287_p6  ;;  %s4385_s10 = scalar_lea.sflag [#allocation4], %s4384_s11 }
0x2af6   : > { %p5025_p3 = pneg %p5024_p2 }
0x2af8   : > { %5986 = dma.done.wait (%p5025_p3), %s4385_s10, 128  }
0x2af9   : > { %5988 = vsyncadd (%p5025_p3), %s4385_s10, 4294967168  ;;  %s7244_s0 = sld [smem:[#allocation71_spill]] }
0x2afa   : > { %s7245_s7 = sld [smem:[#allocation68_spill]] }
0x2afb   : > { %s7246_s10 = sld [smem:[#allocation69_spill]] }
0x2afc   : > { %s7247_s11 = sld [smem:[#allocation72_spill]] }
0x2aff   : > { %p87_p4 = scmp.ge.s32.totalorder %s7244_s0, 4  }
0x2b01   :  { %89 = sbr.rel (!%p87_p4) target bundleno = 78 (0x4e), region = 352 }
0x2b06   :  { %4391 = vsyncpa [#allocation3], 1 }
0x2b07   :  { %4393 = vsyncpa [#allocation3 + $0x1], 1 }
0x2b08   :  { %4394 = vsyncpa [#allocation6], 1 }
0x2b09   :  { %4395 = vsyncpa [#allocation9], 1 }
0x2b0a   :  { %4396 = vsyncpa [#allocation12], 1 }
0x2b0b   :  { %4397 = vsyncpa [#allocation15], 1 }
0x2b0c   :  { %4398 = vsyncpa [#allocation18], 1 }
0x2b0d   :  { %4399 = vsyncpa [#allocation21], 1 }
0x2b0e   :  { %4400 = vsyncpa [#allocation24], 1 }
0x2b0f   :  { %4401 = vsyncpa [#allocation27], 1 }
0x2b10   :  { %4402 = vsyncpa [#allocation30], 1 }
0x2b11   :  { %4403 = vsyncpa [#allocation4], 1 }
0x2b12   :  { %4405 = vsyncpa [#allocation4 + $0x1], 1 }

</bundles_post_ra>
